<compile_context>
chip_gen: v7x
topology: tpu7x:2x2x1
jax: 0.10.0
libtpu: 0.0.40
codegen_flags: <defaults>
</compile_context>

<pallas_src>
import functools

import jax
import jax.numpy as jnp
from jax import lax
from jax.experimental import pallas as pl
from jax.experimental.pallas import tpu as pltpu

_BN_EPS = 1e-5


# ------------------------------ static geometry ----------------------------- #

def _cdiv(a, b):
    return -(-a // b)


def _round8(a):
    return _cdiv(a, 8) * 8


def _geom(H, W, s):
    """Static geometry for the phase-split, zero-padded layout."""
    Ho = (H - 1) // s + 1                       # = floor((H + 2 - 3)/s) + 1
    Wo = (W - 1) // s + 1
    Wo_pad = _round8(Wo)                        # keep reshapes layout-preserving
    Hc = max(_cdiv(H + 2, s), (2 // s) + Ho)    # rows per phase
    Wc = _round8(max(_cdiv(W + 2, s), (2 // s) + Wo_pad))
    return Ho, Wo, Wo_pad, Hc, Wc


def _prep_input(x_nchw, s, Hc, Wc):
    """(N,C,H,W) -> (N, s*s*Hc*Wc, C): zero-padded, stride-phase-split, channels-last.

    Flat index p = ((ph*s + pw)*Hc + i)*Wc + j  <->  padded pixel (s*i+ph, s*j+pw).
    """
    N, C, H, W = x_nchw.shape
    xp = jnp.pad(x_nchw, ((0, 0), (0, 0),
                          (1, s * Hc - H - 1), (1, s * Wc - W - 1)))
    xp = xp.reshape(N, C, Hc, s, Wc, s)
    xp = jnp.transpose(xp, (0, 3, 5, 2, 4, 1))       # (N, ph, pw, Hc, Wc, C)
    return xp.reshape(N, s * s * Hc * Wc, C)


# ------------------------------ in-kernel helpers --------------------------- #

def _dw3x3(y3d, wd, bias, *, s, Hc, Ho, Wo_pad):
    """3x3 depthwise conv (stride s) on a phase-split padded activation.

    y3d : (s*s*Hc, Wc, C) value, zeros at all padding positions.
    wd  : (3, 3, C) BN-scale-folded taps.  bias: (1, C).
    Returns (Ho, Wo_pad, C).  Every tap read is a static contiguous slice.
    """
    acc = None
    for dy in range(3):
        for dx in range(3):
            r0 = ((dy % s) * s + (dx % s)) * Hc + dy // s
            c0 = dx // s
            tap = y3d[r0:r0 + Ho, c0:c0 + Wo_pad, :] * wd[dy, dx:dx + 1, :]
            acc = tap if acc is None else acc + tap
    return acc + bias


def _pw_cm(w_t, y_sm, bias_cm):
    """1x1 conv + bias + ReLU, channel-major output: (Cout, Cin) x (P, Cin) -> (Cout, P)."""
    out = lax.dot_general(w_t, y_sm, (((1,), (1,)), ((), ())),
                          preferred_element_type=jnp.float32) + bias_cm
    return jnp.maximum(out, 0.0)


def _pw_sm_relu_masked(x_sm, w, bias, mask):
    """1x1 conv + bias + ReLU (spatial-major), then re-zero the conv-pad positions."""
    y = jnp.dot(x_sm, w, preferred_element_type=jnp.float32) + bias
    return jnp.maximum(y, 0.0) * mask


# --------------------------------- kernels ---------------------------------- #

def _branch2_kernel(x_ref, m_ref, w1_ref, b1_ref, wd_ref, b2_ref, w2t_ref, b3_ref,
                    o_ref, *, s, Hc, Wc, Ho, Wo_pad):
    x = x_ref[0]                                                     # (P_in, Cin)
    y1 = _pw_sm_relu_masked(x, w1_ref[...], b1_ref[...], m_ref[...])  # (P_in, bf)
    y1 = y1.reshape(s * s * Hc, Wc, y1.shape[-1])
    y2 = _dw3x3(y1, wd_ref[...], b2_ref[...], s=s, Hc=Hc, Ho=Ho, Wo_pad=Wo_pad)
    y2 = y2.reshape(Ho * Wo_pad, y2.shape[-1])                       # (P_out, bf)
    o_ref[0] = _pw_cm(w2t_ref[...], y2, b3_ref[...])                 # (bf, P_out)


def _dual_kernel(x_ref, m_ref,
                 wd1_ref, bd1_ref, w1t_ref, b1c_ref,                 # branch1
                 wp_ref, bp_ref, wd2_ref, bd2_ref, w2t_ref, b2c_ref,  # branch2
                 o1_ref, o2_ref, *, s, Hc, Wc, Ho, Wo_pad):
    x = x_ref[0]                                                     # (P_in, Cin)

    # ---- branch1: dw3x3(stride)+BN -> 1x1+BN+ReLU (input padding is already zero) ----
    x3 = x.reshape(s * s * Hc, Wc, x.shape[-1])
    z = _dw3x3(x3, wd1_ref[...], bd1_ref[...], s=s, Hc=Hc, Ho=Ho, Wo_pad=Wo_pad)
    z = z.reshape(Ho * Wo_pad, z.shape[-1])
    o1_ref[0] = _pw_cm(w1t_ref[...], z, b1c_ref[...])

    # ---- branch2: 1x1+BN+ReLU -> dw3x3(stride)+BN -> 1x1+BN+ReLU ----
    y1 = _pw_sm_relu_masked(x, wp_ref[...], bp_ref[...], m_ref[...])
    y1 = y1.reshape(s * s * Hc, Wc, y1.shape[-1])
    y2 = _dw3x3(y1, wd2_ref[...], bd2_ref[...], s=s, Hc=Hc, Ho=Ho, Wo_pad=Wo_pad)
    y2 = y2.reshape(Ho * Wo_pad, y2.shape[-1])
    o2_ref[0] = _pw_cm(w2t_ref[...], y2, b2c_ref[...])


# ------------------------------ pallas_call glue ----------------------------- #

def _full_spec(shape):
    nd = len(shape)
    return pl.BlockSpec(shape, lambda n: (0,) * nd)


def _branch2_call(xprep, mask, w1, b1, wd, b2, w2t, b3, *, s, Hc, Wc, Ho, Wo_pad):
    N, P_in, Cin = xprep.shape
    bf = w2t.shape[0]
    P_out = Ho * Wo_pad
    kern = functools.partial(_branch2_kernel, s=s, Hc=Hc, Wc=Wc, Ho=Ho, Wo_pad=Wo_pad)
    args = (xprep, mask, w1, b1, wd, b2, w2t, b3)
    return pl.pallas_call(
        kern,
        out_shape=jax.ShapeDtypeStruct((N, bf, P_out), jnp.float32),
        grid_spec=pltpu.PrefetchScalarGridSpec(
            num_scalar_prefetch=0,
            grid=(N,),
            in_specs=[pl.BlockSpec((1, P_in, Cin), lambda n: (n, 0, 0))]
                     + [_full_spec(a.shape) for a in args[1:]],
            out_specs=pl.BlockSpec((1, bf, P_out), lambda n: (n, 0, 0)),
        ),
        compiler_params=pltpu.CompilerParams(dimension_semantics=("parallel",)),
    )(*args)


def _dual_call(xprep, mask, wd1, bd1, w1t, b1c, wp, bp, wd2, bd2, w2t, b2c,
               *, s, Hc, Wc, Ho, Wo_pad):
    N, P_in, Cin = xprep.shape
    bf = w1t.shape[0]
    P_out = Ho * Wo_pad
    kern = functools.partial(_dual_kernel, s=s, Hc=Hc, Wc=Wc, Ho=Ho, Wo_pad=Wo_pad)
    args = (xprep, mask, wd1, bd1, w1t, b1c, wp, bp, wd2, bd2, w2t, b2c)
    out_spec = pl.BlockSpec((1, bf, P_out), lambda n: (n, 0, 0))
    return pl.pallas_call(
        kern,
        out_shape=(jax.ShapeDtypeStruct((N, bf, P_out), jnp.float32),
                   jax.ShapeDtypeStruct((N, bf, P_out), jnp.float32)),
        grid_spec=pltpu.PrefetchScalarGridSpec(
            num_scalar_prefetch=0,
            grid=(N,),
            in_specs=[pl.BlockSpec((1, P_in, Cin), lambda n: (n, 0, 0))]
                     + [_full_spec(a.shape) for a in args[1:]],
            out_specs=[out_spec, out_spec],
        ),
        compiler_params=pltpu.CompilerParams(dimension_semantics=("parallel",)),
    )(*args)


# ------------------------------ BN weight folding ---------------------------- #

def _fold_bn(bn):
    scale = bn["gamma"] / jnp.sqrt(bn["var"] + _BN_EPS)
    bias = bn["beta"] - bn["mean"] * scale
    return scale, bias


def _fold_pw(w, bn):          # spatial-major use:  y = x @ w_f + b
    s, b = _fold_bn(bn)
    return w * s[None, :], b.reshape(1, -1)


def _fold_pw_cm(w, bn):       # channel-major use:  y = w_f^T @ x^T + b
    s, b = _fold_bn(bn)
    return (w * s[None, :]).T, b.reshape(-1, 1)


def _fold_dw(w, bn):
    s, b = _fold_bn(bn)
    return w * s[None, None, :], b.reshape(1, -1)


# ------------------------------- module forward ------------------------------ #

def inverted_residual(x_nchw, params, stride):
    """Forward pass matching InvertedResidual.forward (NCHW in / NCHW out)."""
    N, C, H, W = x_nchw.shape
    s = int(stride)
    Ho, Wo, Wo_pad, Hc, Wc = _geom(H, W, s)
    geom = dict(s=s, Hc=Hc, Wc=Wc, Ho=Ho, Wo_pad=Wo_pad)

    x = x_nchw.astype(jnp.float32)
    # 1 at real-pixel positions, 0 at every (conv or round-up) padding position.
    mask = _prep_input(jnp.ones((1, 1, H, W), jnp.float32), s, Hc, Wc)[0]  # (P_in, 1)

    if s == 1:
        bf = C // 2
        p = params["branch2"]
        w1, b1 = _fold_pw(p["pw1_w"], p["bn1"])
        wd, b2 = _fold_dw(p["dw_w"], p["bn2"])
        w2t, b3 = _fold_pw_cm(p["pw2_w"], p["bn3"])
        xprep = _prep_input(x[:, bf:], s, Hc, Wc)
        o2 = _branch2_call(xprep, mask, w1, b1, wd, b2, w2t, b3, **geom)
        a = x[:, :bf]                                             # passthrough half
        b = o2.reshape(N, bf, Ho, Wo_pad)[..., :Wo]
    else:
        p1, p2 = params["branch1"], params["branch2"]
        wd1, bd1 = _fold_dw(p1["dw_w"], p1["bn1"])
        w1t, b1c = _fold_pw_cm(p1["pw_w"], p1["bn2"])
        wp, bp = _fold_pw(p2["pw1_w"], p2["bn1"])
        wd2, bd2 = _fold_dw(p2["dw_w"], p2["bn2"])
        w2t, b2c = _fold_pw_cm(p2["pw2_w"], p2["bn3"])
        xprep = _prep_input(x, s, Hc, Wc)
        o1, o2 = _dual_call(xprep, mask, wd1, bd1, w1t, b1c,
                            wp, bp, wd2, bd2, w2t, b2c, **geom)
        bf = o1.shape[1]
        a = o1.reshape(N, bf, Ho, Wo_pad)[..., :Wo]
        b = o2.reshape(N, bf, Ho, Wo_pad)[..., :Wo]

    # concat(dim=1) + channel_shuffle(groups=2) == interleave the two bf-channel halves
    return jnp.stack([a, b], axis=2).reshape(N, 2 * bf, Ho, Wo)


# ------------------------------- parameter init ------------------------------ #

def init_params(key, inp, oup, stride):
    if not 1 <= stride <= 3:
        raise ValueError("illegal stride value")
    bf = oup // 2
    assert stride != 1 or inp == (bf << 1)

    def bn(k, c):
        k1, k2, k3, k4 = jax.random.split(k, 4)
        return {"gamma": jax.random.uniform(k1, (c,), minval=0.5, maxval=1.5),
                "beta": 0.1 * jax.random.normal(k2, (c,)),
                "mean": 0.1 * jax.random.normal(k3, (c,)),
                "var": jax.random.uniform(k4, (c,), minval=0.5, maxval=1.5)}

    keys = jax.random.split(key, 10)
    params = {}
    if stride > 1:
        params["branch1"] = {
            "dw_w": 0.2 * jax.random.normal(keys[0], (3, 3, inp)),   # depthwise 3x3
            "bn1": bn(keys[1], inp),
            "pw_w": 0.2 * jax.random.normal(keys[2], (inp, bf)),     # 1x1 conv
            "bn2": bn(keys[3], bf),
        }
    c_in2 = inp if stride > 1 else bf
    params["branch2"] = {
        "pw1_w": 0.2 * jax.random.normal(keys[4], (c_in2, bf)),
        "bn1": bn(keys[5], bf),
        "dw_w": 0.2 * jax.random.normal(keys[6], (3, 3, bf)),
        "bn2": bn(keys[7], bf),
        "pw2_w": 0.2 * jax.random.normal(keys[8], (bf, bf)),
        "bn3": bn(keys[9], bf),
    }
    return params


# --------------------------- pure-JAX reference check ------------------------ #

def _channel_shuffle_nhwc(x, groups):
    N, H, W, C = x.shape
    x = x.reshape(N, H, W, groups, C // groups)
    x = jnp.transpose(x, (0, 1, 2, 4, 3))
    return x.reshape(N, H, W, C)


def _ref_pointwise(x, w, scale, bias, relu):
    y = lax.conv_general_dilated(x, w.reshape(1, 1, *w.shape), (1, 1), "VALID",
                                 dimension_numbers=("NHWC", "HWIO", "NHWC"))
    y = y * scale + bias
    return jnp.maximum(y, 0.0) if relu else y


def _ref_depthwise(x, w, scale, bias, stride):
    C = x.shape[-1]
    y = lax.conv_general_dilated(x, w.reshape(3, 3, 1, C), (stride, stride),
                                 ((1, 1), (1, 1)),
                                 dimension_numbers=("NHWC", "HWIO", "NHWC"),
                                 feature_group_count=C)
    return y * scale + bias


def inverted_residual_ref(x_nchw, params, stride):
    x = jnp.transpose(x_nchw, (0, 2, 3, 1)).astype(jnp.float32)

    def branch2(z):
        p = params["branch2"]
        s1, b1 = _fold_bn(p["bn1"]); s2, b2 = _fold_bn(p["bn2"]); s3, b3 = _fold_bn(p["bn3"])
        y = _ref_pointwise(z, p["pw1_w"], s1, b1, True)
        y = _ref_depthwise(y, p["dw_w"], s2, b2, stride)
        return _ref_pointwise(y, p["pw2_w"], s3, b3, True)

    def branch1(z):
        p = params["branch1"]
        s1, b1 = _fold_bn(p["bn1"]); s2, b2 = _fold_bn(p["bn2"])
        y = _ref_depthwise(z, p["dw_w"], s1, b1, stride)
        return _ref_pointwise(y, p["pw_w"], s2, b2, True)

    if stride == 1:
        c = x.shape[-1]
        out = jnp.concatenate([x[..., : c // 2], branch2(x[..., c // 2:])], axis=-1)
    else:
        out = jnp.concatenate([branch1(x), branch2(x)], axis=-1)
    out = _channel_shuffle_nhwc(out, 2)
    return jnp.transpose(out, (0, 3, 1, 2))


# ----------------------------------- main ------------------------------------ #

if __name__ == "__main__":
    key = jax.random.PRNGKey(0)

    for inp, oup, stride in [(4, 4, 1), (4, 8, 2)]:
        kx, kp = jax.random.split(jax.random.fold_in(key, stride))
        x = jax.random.normal(kx, (2, inp, 16, 16), dtype=jnp.float32)
        params = init_params(kp, inp, oup, stride)

        fwd = jax.jit(functools.partial(inverted_residual, stride=stride))
        out = jax.block_until_ready(fwd(x, params))
        ref = jax.block_until_ready(inverted_residual_ref(x, params, stride))

        h_out = 16 if stride == 1 else 8
        assert out.shape == (2, oup, h_out, h_out), out.shape
        assert bool(jnp.all(jnp.isfinite(out)))
        err = float(jnp.max(jnp.abs(out - ref)))
        assert err < 1e-2, err

    print("KERNEL_OK")
</pallas_src>

<mosaic_0001>
module attributes {stable_mosaic.version = 11 : i64} {
  func.func @_branch2_kernel(%arg0: i32, %arg1: memref<1x432x2xf32, #tpu.memory_space<vmem>>, %arg2: memref<432x1xf32, #tpu.memory_space<vmem>>, %arg3: memref<2x2xf32, #tpu.memory_space<vmem>>, %arg4: memref<1x2xf32, #tpu.memory_space<vmem>>, %arg5: memref<3x3x2xf32, #tpu.memory_space<vmem>>, %arg6: memref<1x2xf32, #tpu.memory_space<vmem>>, %arg7: memref<2x2xf32, #tpu.memory_space<vmem>>, %arg8: memref<2x1xf32, #tpu.memory_space<vmem>>, %arg9: memref<1x2x256xf32, #tpu.memory_space<vmem>>) attributes {dimension_semantics = [#tpu.dimension_semantics<parallel>], iteration_bounds = array<i64: 2>, scalar_prefetch = 0 : i64, scratch_operands = 0 : i64, tpu.core_type = #tpu.core_type<tc>, window_params = [{transform_indices = @transform_0, window_bounds = array<i64: 1, 432, 2>}, {pipeline_mode = #tpu.pipeline_mode<synchronous>, transform_indices = @transform_1, window_bounds = array<i64: 432, 1>}, {pipeline_mode = #tpu.pipeline_mode<synchronous>, transform_indices = @transform_2, window_bounds = array<i64: 2, 2>}, {pipeline_mode = #tpu.pipeline_mode<synchronous>, transform_indices = @transform_3, window_bounds = array<i64: 1, 2>}, {pipeline_mode = #tpu.pipeline_mode<synchronous>, transform_indices = @transform_4, window_bounds = array<i64: 3, 3, 2>}, {pipeline_mode = #tpu.pipeline_mode<synchronous>, transform_indices = @transform_5, window_bounds = array<i64: 1, 2>}, {pipeline_mode = #tpu.pipeline_mode<synchronous>, transform_indices = @transform_6, window_bounds = array<i64: 2, 2>}, {pipeline_mode = #tpu.pipeline_mode<synchronous>, transform_indices = @transform_7, window_bounds = array<i64: 2, 1>}, {transform_indices = @transform_8, window_bounds = array<i64: 1, 2, 256>}]} {
    %c0 = arith.constant 0 : index
    %c0_0 = arith.constant 0 : index
    %c0_1 = arith.constant 0 : index
    %0 = vector.load %arg1[%c0, %c0_0, %c0_1] : memref<1x432x2xf32, #tpu.memory_space<vmem>>, vector<1x432x2xf32>
    %1 = vector.shape_cast %0 : vector<1x432x2xf32> to vector<432x2xf32>
    %c0_2 = arith.constant 0 : index
    %c0_3 = arith.constant 0 : index
    %2 = vector.load %arg3[%c0_2, %c0_3] : memref<2x2xf32, #tpu.memory_space<vmem>>, vector<2x2xf32>
    %c0_4 = arith.constant 0 : index
    %c0_5 = arith.constant 0 : index
    %3 = vector.load %arg4[%c0_4, %c0_5] : memref<1x2xf32, #tpu.memory_space<vmem>>, vector<1x2xf32>
    %c0_6 = arith.constant 0 : index
    %c0_7 = arith.constant 0 : index
    %4 = vector.load %arg2[%c0_6, %c0_7] : memref<432x1xf32, #tpu.memory_space<vmem>>, vector<432x1xf32>
    %cst = arith.constant dense<0.000000e+00> : vector<432x2xf32>
    %5 = tpu.matmul %1, %2, %cst {dimension_numbers = #tpu.dot_dimension_numbers<[1], [0], [0], [1], [0, 0, 1, 1], [], []>} : vector<432x2xf32>, vector<2x2xf32>, vector<432x2xf32> -> vector<432x2xf32>
    %6 = vector.broadcast %3 : vector<1x2xf32> to vector<432x2xf32>
    %7 = arith.addf %5, %6 : vector<432x2xf32>
    %cst_8 = arith.constant 0.000000e+00 : f32
    %8 = vector.broadcast %cst_8 : f32 to vector<432x2xf32>
    %9 = arith.maximumf %7, %8 : vector<432x2xf32>
    %10 = vector.broadcast %4 : vector<432x1xf32> to vector<432x2xf32>
    %11 = arith.mulf %9, %10 : vector<432x2xf32>
    %12 = vector.shape_cast %11 : vector<432x2xf32> to vector<18x24x2xf32>
    %c0_9 = arith.constant 0 : index
    %c0_10 = arith.constant 0 : index
    %c0_11 = arith.constant 0 : index
    %13 = vector.load %arg5[%c0_9, %c0_10, %c0_11] : memref<3x3x2xf32, #tpu.memory_space<vmem>>, vector<3x3x2xf32>
    %c0_12 = arith.constant 0 : index
    %c0_13 = arith.constant 0 : index
    %14 = vector.load %arg6[%c0_12, %c0_13] : memref<1x2xf32, #tpu.memory_space<vmem>>, vector<1x2xf32>
    %15 = vector.extract_strided_slice %12 {offsets = [0, 0, 0], sizes = [16, 16, 2], strides = [1, 1, 1]} : vector<18x24x2xf32> to vector<16x16x2xf32>
    %16 = vector.extract_strided_slice %13 {offsets = [0, 0, 0], sizes = [1, 1, 2], strides = [1, 1, 1]} : vector<3x3x2xf32> to vector<1x1x2xf32>
    %17 = vector.shape_cast %16 : vector<1x1x2xf32> to vector<1x2xf32>
    %18 = vector.shape_cast %17 : vector<1x2xf32> to vector<1x1x2xf32>
    %19 = vector.broadcast %18 : vector<1x1x2xf32> to vector<16x16x2xf32>
    %20 = arith.mulf %15, %19 : vector<16x16x2xf32>
    %21 = vector.extract_strided_slice %12 {offsets = [0, 1, 0], sizes = [16, 16, 2], strides = [1, 1, 1]} : vector<18x24x2xf32> to vector<16x16x2xf32>
    %22 = vector.extract_strided_slice %13 {offsets = [0, 1, 0], sizes = [1, 1, 2], strides = [1, 1, 1]} : vector<3x3x2xf32> to vector<1x1x2xf32>
    %23 = vector.shape_cast %22 : vector<1x1x2xf32> to vector<1x2xf32>
    %24 = vector.shape_cast %23 : vector<1x2xf32> to vector<1x1x2xf32>
    %25 = vector.broadcast %24 : vector<1x1x2xf32> to vector<16x16x2xf32>
    %26 = arith.mulf %21, %25 : vector<16x16x2xf32>
    %27 = arith.addf %20, %26 : vector<16x16x2xf32>
    %28 = vector.extract_strided_slice %12 {offsets = [0, 2, 0], sizes = [16, 16, 2], strides = [1, 1, 1]} : vector<18x24x2xf32> to vector<16x16x2xf32>
    %29 = vector.extract_strided_slice %13 {offsets = [0, 2, 0], sizes = [1, 1, 2], strides = [1, 1, 1]} : vector<3x3x2xf32> to vector<1x1x2xf32>
    %30 = vector.shape_cast %29 : vector<1x1x2xf32> to vector<1x2xf32>
    %31 = vector.shape_cast %30 : vector<1x2xf32> to vector<1x1x2xf32>
    %32 = vector.broadcast %31 : vector<1x1x2xf32> to vector<16x16x2xf32>
    %33 = arith.mulf %28, %32 : vector<16x16x2xf32>
    %34 = arith.addf %27, %33 : vector<16x16x2xf32>
    %35 = vector.extract_strided_slice %12 {offsets = [1, 0, 0], sizes = [16, 16, 2], strides = [1, 1, 1]} : vector<18x24x2xf32> to vector<16x16x2xf32>
    %36 = vector.extract_strided_slice %13 {offsets = [1, 0, 0], sizes = [1, 1, 2], strides = [1, 1, 1]} : vector<3x3x2xf32> to vector<1x1x2xf32>
    %37 = vector.shape_cast %36 : vector<1x1x2xf32> to vector<1x2xf32>
    %38 = vector.shape_cast %37 : vector<1x2xf32> to vector<1x1x2xf32>
    %39 = vector.broadcast %38 : vector<1x1x2xf32> to vector<16x16x2xf32>
    %40 = arith.mulf %35, %39 : vector<16x16x2xf32>
    %41 = arith.addf %34, %40 : vector<16x16x2xf32>
    %42 = vector.extract_strided_slice %12 {offsets = [1, 1, 0], sizes = [16, 16, 2], strides = [1, 1, 1]} : vector<18x24x2xf32> to vector<16x16x2xf32>
    %43 = vector.extract_strided_slice %13 {offsets = [1, 1, 0], sizes = [1, 1, 2], strides = [1, 1, 1]} : vector<3x3x2xf32> to vector<1x1x2xf32>
    %44 = vector.shape_cast %43 : vector<1x1x2xf32> to vector<1x2xf32>
    %45 = vector.shape_cast %44 : vector<1x2xf32> to vector<1x1x2xf32>
    %46 = vector.broadcast %45 : vector<1x1x2xf32> to vector<16x16x2xf32>
    %47 = arith.mulf %42, %46 : vector<16x16x2xf32>
    %48 = arith.addf %41, %47 : vector<16x16x2xf32>
    %49 = vector.extract_strided_slice %12 {offsets = [1, 2, 0], sizes = [16, 16, 2], strides = [1, 1, 1]} : vector<18x24x2xf32> to vector<16x16x2xf32>
    %50 = vector.extract_strided_slice %13 {offsets = [1, 2, 0], sizes = [1, 1, 2], strides = [1, 1, 1]} : vector<3x3x2xf32> to vector<1x1x2xf32>
    %51 = vector.shape_cast %50 : vector<1x1x2xf32> to vector<1x2xf32>
    %52 = vector.shape_cast %51 : vector<1x2xf32> to vector<1x1x2xf32>
    %53 = vector.broadcast %52 : vector<1x1x2xf32> to vector<16x16x2xf32>
    %54 = arith.mulf %49, %53 : vector<16x16x2xf32>
    %55 = arith.addf %48, %54 : vector<16x16x2xf32>
    %56 = vector.extract_strided_slice %12 {offsets = [2, 0, 0], sizes = [16, 16, 2], strides = [1, 1, 1]} : vector<18x24x2xf32> to vector<16x16x2xf32>
    %57 = vector.extract_strided_slice %13 {offsets = [2, 0, 0], sizes = [1, 1, 2], strides = [1, 1, 1]} : vector<3x3x2xf32> to vector<1x1x2xf32>
    %58 = vector.shape_cast %57 : vector<1x1x2xf32> to vector<1x2xf32>
    %59 = vector.shape_cast %58 : vector<1x2xf32> to vector<1x1x2xf32>
    %60 = vector.broadcast %59 : vector<1x1x2xf32> to vector<16x16x2xf32>
    %61 = arith.mulf %56, %60 : vector<16x16x2xf32>
    %62 = arith.addf %55, %61 : vector<16x16x2xf32>
    %63 = vector.extract_strided_slice %12 {offsets = [2, 1, 0], sizes = [16, 16, 2], strides = [1, 1, 1]} : vector<18x24x2xf32> to vector<16x16x2xf32>
    %64 = vector.extract_strided_slice %13 {offsets = [2, 1, 0], sizes = [1, 1, 2], strides = [1, 1, 1]} : vector<3x3x2xf32> to vector<1x1x2xf32>
    %65 = vector.shape_cast %64 : vector<1x1x2xf32> to vector<1x2xf32>
    %66 = vector.shape_cast %65 : vector<1x2xf32> to vector<1x1x2xf32>
    %67 = vector.broadcast %66 : vector<1x1x2xf32> to vector<16x16x2xf32>
    %68 = arith.mulf %63, %67 : vector<16x16x2xf32>
    %69 = arith.addf %62, %68 : vector<16x16x2xf32>
    %70 = vector.extract_strided_slice %12 {offsets = [2, 2, 0], sizes = [16, 16, 2], strides = [1, 1, 1]} : vector<18x24x2xf32> to vector<16x16x2xf32>
    %71 = vector.extract_strided_slice %13 {offsets = [2, 2, 0], sizes = [1, 1, 2], strides = [1, 1, 1]} : vector<3x3x2xf32> to vector<1x1x2xf32>
    %72 = vector.shape_cast %71 : vector<1x1x2xf32> to vector<1x2xf32>
    %73 = vector.shape_cast %72 : vector<1x2xf32> to vector<1x1x2xf32>
    %74 = vector.broadcast %73 : vector<1x1x2xf32> to vector<16x16x2xf32>
    %75 = arith.mulf %70, %74 : vector<16x16x2xf32>
    %76 = arith.addf %69, %75 : vector<16x16x2xf32>
    %77 = vector.shape_cast %14 : vector<1x2xf32> to vector<1x1x2xf32>
    %78 = vector.broadcast %77 : vector<1x1x2xf32> to vector<16x16x2xf32>
    %79 = arith.addf %76, %78 : vector<16x16x2xf32>
    %80 = vector.shape_cast %79 : vector<16x16x2xf32> to vector<256x2xf32>
    %c0_14 = arith.constant 0 : index
    %c0_15 = arith.constant 0 : index
    %81 = vector.load %arg7[%c0_14, %c0_15] : memref<2x2xf32, #tpu.memory_space<vmem>>, vector<2x2xf32>
    %c0_16 = arith.constant 0 : index
    %c0_17 = arith.constant 0 : index
    %82 = vector.load %arg8[%c0_16, %c0_17] : memref<2x1xf32, #tpu.memory_space<vmem>>, vector<2x1xf32>
    %cst_18 = arith.constant dense<0.000000e+00> : vector<2x256xf32>
    %83 = tpu.matmul %81, %80, %cst_18 {dimension_numbers = #tpu.dot_dimension_numbers<[1], [1], [0], [0], [0, 0, 1, 0], [], []>} : vector<2x2xf32>, vector<256x2xf32>, vector<2x256xf32> -> vector<2x256xf32>
    %84 = vector.broadcast %82 : vector<2x1xf32> to vector<2x256xf32>
    %85 = arith.addf %83, %84 : vector<2x256xf32>
    %cst_19 = arith.constant 0.000000e+00 : f32
    %86 = vector.broadcast %cst_19 : f32 to vector<2x256xf32>
    %87 = arith.maximumf %85, %86 : vector<2x256xf32>
    %c0_20 = arith.constant 0 : index
    %c0_21 = arith.constant 0 : index
    %c0_22 = arith.constant 0 : index
    %88 = vector.load %arg9[%c0_20, %c0_21, %c0_22] : memref<1x2x256xf32, #tpu.memory_space<vmem>>, vector<1x2x256xf32>
    %89 = vector.shape_cast %88 : vector<1x2x256xf32> to vector<2x256xf32>
    %90 = vector.shape_cast %87 : vector<2x256xf32> to vector<1x2x256xf32>
    tpu.vector_store %arg9[%c0_20, %c0_21, %c0_22], %90 {strides = array<i32>} : memref<1x2x256xf32, #tpu.memory_space<vmem>>, vector<1x2x256xf32>,
    return
  }
  func.func @transform_0(%arg0: i32) -> (i32, i32, i32) {
    %c0_i32 = arith.constant 0 : i32
    %c0_i32_0 = arith.constant 0 : i32
    %c0_i32_1 = arith.constant 0 : i32
    return %arg0, %c0_i32, %c0_i32_0 : i32, i32, i32
  }
  func.func @transform_1(%arg0: i32) -> (i32, i32) {
    %c0_i32 = arith.constant 0 : i32
    %c0_i32_0 = arith.constant 0 : i32
    %c0_i32_1 = arith.constant 0 : i32
    return %c0_i32, %c0_i32_0 : i32, i32
  }
  func.func @transform_2(%arg0: i32) -> (i32, i32) {
    %c0_i32 = arith.constant 0 : i32
    %c0_i32_0 = arith.constant 0 : i32
    %c0_i32_1 = arith.constant 0 : i32
    return %c0_i32, %c0_i32_0 : i32, i32
  }
  func.func @transform_3(%arg0: i32) -> (i32, i32) {
    %c0_i32 = arith.constant 0 : i32
    %c0_i32_0 = arith.constant 0 : i32
    %c0_i32_1 = arith.constant 0 : i32
    return %c0_i32, %c0_i32_0 : i32, i32
  }
  func.func @transform_4(%arg0: i32) -> (i32, i32, i32) {
    %c0_i32 = arith.constant 0 : i32
    %c0_i32_0 = arith.constant 0 : i32
    %c0_i32_1 = arith.constant 0 : i32
    %c0_i32_2 = arith.constant 0 : i32
    return %c0_i32, %c0_i32_0, %c0_i32_1 : i32, i32, i32
  }
  func.func @transform_5(%arg0: i32) -> (i32, i32) {
    %c0_i32 = arith.constant 0 : i32
    %c0_i32_0 = arith.constant 0 : i32
    %c0_i32_1 = arith.constant 0 : i32
    return %c0_i32, %c0_i32_0 : i32, i32
  }
  func.func @transform_6(%arg0: i32) -> (i32, i32) {
    %c0_i32 = arith.constant 0 : i32
    %c0_i32_0 = arith.constant 0 : i32
    %c0_i32_1 = arith.constant 0 : i32
    return %c0_i32, %c0_i32_0 : i32, i32
  }
  func.func @transform_7(%arg0: i32) -> (i32, i32) {
    %c0_i32 = arith.constant 0 : i32
    %c0_i32_0 = arith.constant 0 : i32
    %c0_i32_1 = arith.constant 0 : i32
    return %c0_i32, %c0_i32_0 : i32, i32
  }
  func.func @transform_8(%arg0: i32) -> (i32, i32, i32) {
    %c0_i32 = arith.constant 0 : i32
    %c0_i32_0 = arith.constant 0 : i32
    %c0_i32_1 = arith.constant 0 : i32
    return %arg0, %c0_i32, %c0_i32_0 : i32, i32, i32
  }
}

</mosaic_0001>

<bundles_post_ra>
// kernel: inverted_residual.1
= control target key start
LH: loop header
LB: loop body
LE: loop exit
PB: predicated region body
PF: predicated region fallthrough
CT: control target
= control target key end

     0   :  { %s3618_s27 = smov 0   ;;  %s5707_s0 = inlined_call_operand.vmem [shape: f32[2,432,2], index: 0, kind: input, shape index: {}]   ;;  %s5708_s1 = inlined_call_operand.vmem [shape: f32[432,1], index: 1, kind: input, shape index: {}]   ;;  %s5709_s2 = inlined_call_operand.vmem [shape: f32[2,2], index: 2, kind: input, shape index: {}]   ;;  %s5710_s3 = inlined_call_operand.vmem [shape: f32[1,2], index: 3, kind: input, shape index: {}]   ;;  %s5711_s4 = inlined_call_operand.vmem [shape: f32[3,3,2], index: 4, kind: input, shape index: {}]   ;;  %s5712_s5 = inlined_call_operand.vmem [shape: f32[1,2], index: 5, kind: input, shape index: {}]   ;;  %s5713_s6 = inlined_call_operand.vmem [shape: f32[2,2], index: 6, kind: input, shape index: {}]   ;;  %s5714_s7 = inlined_call_operand.vmem [shape: f32[2,1], index: 7, kind: input, shape index: {}]   ;;  %s5715_s8 = inlined_call_operand.vmem [shape: f32[2,2,256], index: 8, kind: output, shape index: {}]  }
   0x1 LB: > { %s3228_s28 = sadd.s32 4294967295, %s3570_s27   ;;  %p3232_p0 = scmp.ge.s32.totalorder %s3570_s27, 1  ;;  %s3570_s27 = sphi %s3618_s27, %s18_s27  }
   0x2   : > { %p262_p1 = scmp.lt.s32.totalorder %s3570_s27, 3 }
   0x4   : > { %p263_p2 = pnand %p3232_p0, %p262_p1 }
   0x6   : > { %266 = sbr.rel (%p263_p2) target bundleno = 815 (0x32f), region = 52 }
   0xd   : > { %v386_v0 = vld [vmem:[%s5708_s1 + $0xc0] sm:$0xff]  ;;  %v388_v1 = vld [vmem:[%s5708_s1 + $0xd0] sm:$0xff]  ;;  %vm585_vm0 = vcmask 1041408   ;;  %p296_p3 = scmp.lt.s32.totalorder %s3228_s28, 1  ;;  %v3572_v2 = vmov 0   ;;  %v387_v4 = vld [vmem:[%s5708_s1 + $0xc8] sm:$0xff] }
   0xe   : > { %3560 = vset.pattern.permute.xlu0 %v3572_v2  ;;  %3561 = vset.pattern.permute.xlu1 %v3572_v2  ;;  %v360_v3 = vld [vmem:[%s5709_s2] sm:$0x3]  ;;  %vm422_vm1 = vcmask 15360   ;;  %v363_v6 = vld [vmem:[%s5708_s1 + $0x8] sm:$0xff]  ;;  %v364_v10 = vld [vmem:[%s5708_s1 + $0x10] sm:$0xff]  ;;  %vm1442_vm2 = vcmask 1046528  }
   0xf   : > { %1100 = vperm.xlu0 %3560, %v386_v0   ;;  %1110 = vperm.xlu1 %3561, %v388_v1   ;;  %s6093_s28 = smov (!%p296_p3, %s3228_s28), 1  ;;  %v362_v5 = vld [vmem:[%s5708_s1] sm:$0xff]  ;;  %v389_v12 = vld [vmem:[%s5708_s1 + $0xd8] sm:$0xff]  ;;  %v391_v16 = vld [vmem:[%s5708_s1 + $0xe8] sm:$0xff]  ;;  %vm1687_vm3 = vcmask 1045504  }
  0x10   : > { %3419 = vmatprep.subr.msk.mxu0 %vm585_vm0, %v360_v3  ;;  %s3550_s17 = smul.u32 432, %s6093_s28  ;;  %v390_v14 = vld [vmem:[%s5708_s1 + $0xe0] sm:$0xff]  ;;  %v365_v18 = vld [vmem:[%s5708_s1 + $0x18] sm:$0xff]  ;;  %v367_v22 = vld [vmem:[%s5708_s1 + $0x28] sm:$0xff]  ;;  %s3329_s24 = sshll.u32 %s6093_s28, 2 }
  0x11   : > { %3420 = vmatpush3.msk.msra.mxu0 %vm585_vm0, %v360_v3  ;;  %v366_v20 = vld [vmem:[%s5708_s1 + $0x20] sm:$0xff]  ;;  %v392_v24 = vld [vmem:[%s5708_s1 + $0xf0] sm:$0xff]  ;;  %v393_v26 = vld [vmem:[%s5708_s1 + $0xf8] sm:$0xff]  ;;  %s305_s29 = scalar_lea.vmem %s5715_s8, %s3329_s24 }
  0x12   : > { %s3647_s20 = scalar_lea.vmem %s5707_s0, %s3550_s17  ;;  %v394_v28 = vld [vmem:[%s5708_s1 + $0x100] sm:$0xff]  ;;  %v368_v30 = vld [vmem:[%s5708_s1 + $0x30] sm:$0xff]  ;;  %v369_v32 = vld [vmem:[%s5708_s1 + $0x38] sm:$0xff] }
  0x13   : > { %1105 = vperm.xlu0 %3560, %v387_v4   ;;  %980 = vperm.xlu1 %3561, %v362_v5   ;;  %v306_v7 = vld [vmem:[%s3647_s20] sm:$0xff]  ;;  %v307_v8 = vld [vmem:[%s3647_s20 + $0x8] sm:$0xff]  ;;  %v308_v9 = vld [vmem:[%s3647_s20 + $0x10] sm:$0xff] }
  0x14   : > { %3421 = vmatprep.mubr.msk.f32.mxu0 %vm422_vm1, %v306_v7  ;;  %v309_v11 = vld [vmem:[%s3647_s20 + $0x18] sm:$0xff]  ;;  %v310_v13 = vld [vmem:[%s3647_s20 + $0x20] sm:$0xff]  ;;  %v311_v15 = vld [vmem:[%s3647_s20 + $0x28] sm:$0xff] }
  0x15   : > { %3422 = vmatmul.mubr.msk.f32.vlgmr.msra.gmra.mrb[0].mxu0 %vm422_vm1, %v307_v8  ;;  %v312_v17 = vld [vmem:[%s3647_s20 + $0x30] sm:$0xff]  ;;  %v313_v19 = vld [vmem:[%s3647_s20 + $0x38] sm:$0xff]  ;;  %v314_v21 = vld [vmem:[%s3647_s20 + $0x40] sm:$0xff] }
  0x16   : > { %3424 = vmatprep.mubr.msk.f32.mxu0 %vm422_vm1, %v308_v9  ;;  %v315_v23 = vld [vmem:[%s3647_s20 + $0x48] sm:$0xff]  ;;  %v316_v25 = vld [vmem:[%s3647_s20 + $0x50] sm:$0xff]  ;;  %v317_v27 = vld [vmem:[%s3647_s20 + $0x58] sm:$0xff] }
  0x17   : > { %985 = vperm.xlu0 %3560, %v363_v6   ;;  %990 = vperm.xlu1 %3561, %v364_v10   ;;  %v318_v29 = vld [vmem:[%s3647_s20 + $0x60] sm:$0xff]  ;;  %v319_v31 = vld [vmem:[%s3647_s20 + $0x68] sm:$0xff]  ;;  %v320_v33 = vld [vmem:[%s3647_s20 + $0x70] sm:$0xff] }
  0x18   : > { %v370_v34 = vld [vmem:[%s5708_s1 + $0x40] sm:$0xff]  ;;  %v321_v35 = vld [vmem:[%s3647_s20 + $0x78] sm:$0xff]  ;;  %v395_v36 = vld [vmem:[%s5708_s1 + $0x108] sm:$0xff] }
  0x19   : > { %3425 = vmatmul.mubr.msk.f32.gmra.mrb[2].mxu0 %vm422_vm1, %v309_v11  ;;  %v322_v37 = vld [vmem:[%s3647_s20 + $0x80] sm:$0xff]  ;;  %v396_v38 = vld [vmem:[%s5708_s1 + $0x110] sm:$0xff]  ;;  %v323_v39 = vld [vmem:[%s3647_s20 + $0x88] sm:$0xff] }
  0x1a   : > { %3427 = vmatprep.mubr.msk.f32.mxu0 %vm422_vm1, %v310_v13  ;;  %v397_v40 = vld [vmem:[%s5708_s1 + $0x118] sm:$0xff]  ;;  %v324_v41 = vld [vmem:[%s3647_s20 + $0x90] sm:$0xff]  ;;  %v371_v42 = vld [vmem:[%s5708_s1 + $0x48] sm:$0xff] }
  0x1b   : > { %1115 = vperm.xlu0 %3560, %v389_v12   ;;  %1120 = vperm.xlu1 %3561, %v390_v14   ;;  %v325_v43 = vld [vmem:[%s3647_s20 + $0x98] sm:$0xff]  ;;  %v372_v44 = vld [vmem:[%s5708_s1 + $0x50] sm:$0xff]  ;;  %v326_v45 = vld [vmem:[%s3647_s20 + $0xa0] sm:$0xff] }
  0x1c   : > { %v373_v46 = vld [vmem:[%s5708_s1 + $0x58] sm:$0xff]  ;;  %v327_v47 = vld [vmem:[%s3647_s20 + $0xa8] sm:$0xff]  ;;  %v398_v48 = vld [vmem:[%s5708_s1 + $0x120] sm:$0xff] }
  0x1d   : > { %3428 = vmatmul.mubr.msk.f32.gmra.mrb[4].mxu0 %vm422_vm1, %v311_v15  ;;  %v328_v49 = vld [vmem:[%s3647_s20 + $0xb0] sm:$0xff]  ;;  %v399_v50 = vld [vmem:[%s5708_s1 + $0x128] sm:$0xff]  ;;  %v329_v51 = vld [vmem:[%s3647_s20 + $0xb8] sm:$0xff] }
  0x1e   : > { %3430 = vmatprep.mubr.msk.f32.mxu0 %vm422_vm1, %v312_v17  ;;  %v400_v52 = vld [vmem:[%s5708_s1 + $0x130] sm:$0xff]  ;;  %v330_v53 = vld [vmem:[%s3647_s20 + $0xc0] sm:$0xff]  ;;  %v331_v55 = vld [vmem:[%s3647_s20 + $0xc8] sm:$0xff] }
  0x1f   : > { %1125 = vperm.xlu0 %3560, %v391_v16   ;;  %995 = vperm.xlu1 %3561, %v365_v18   ;;  %v374_v54 = vld [vmem:[%s5708_s1 + $0x60] sm:$0xff]  ;;  %v375_v56 = vld [vmem:[%s5708_s1 + $0x68] sm:$0xff]  ;;  %v332_v57 = vld [vmem:[%s3647_s20 + $0xd0] sm:$0xff] }
  0x20   : > { %v376_v58 = vld [vmem:[%s5708_s1 + $0x70] sm:$0xff]  ;;  %v333_v59 = vld [vmem:[%s3647_s20 + $0xd8] sm:$0xff]  ;;  %v334_v61 = vld [vmem:[%s3647_s20 + $0xe0] sm:$0xff] }
  0x21   : > { %3431 = vmatmul.mubr.msk.f32.gmra.mrb[6].mxu0 %vm422_vm1, %v313_v19  ;;  %v401_v60 = vld [vmem:[%s5708_s1 + $0x138] sm:$0xff]  ;;  %v402_v62 = vld [vmem:[%s5708_s1 + $0x140] sm:$0xff]  ;;  %v335_v63 = vld [vmem:[%s3647_s20 + $0xe8] sm:$0xff] }
  0x22   : > { %3433 = vmatprep.mubr.msk.f32.mxu0 %vm422_vm1, %v314_v21  ;;  %v403_v0 = vld [vmem:[%s5708_s1 + $0x148] sm:$0xff]  ;;  %v336_v1 = vld [vmem:[%s3647_s20 + $0xf0] sm:$0xff]  ;;  %v377_v2 = vld [vmem:[%s5708_s1 + $0x78] sm:$0xff] }
  0x23   : > { %1000 = vperm.xlu0 %3560, %v366_v20   ;;  %1005 = vperm.xlu1 %3561, %v367_v22   ;;  %v337_v3 = vld [vmem:[%s3647_s20 + $0xf8] sm:$0xff]  ;;  %v378_v4 = vld [vmem:[%s5708_s1 + $0x80] sm:$0xff]  ;;  %v379_v6 = vld [vmem:[%s5708_s1 + $0x88] sm:$0xff] }
  0x24   : > { %v338_v5 = vld [vmem:[%s3647_s20 + $0x100] sm:$0xff]  ;;  %v339_v7 = vld [vmem:[%s3647_s20 + $0x108] sm:$0xff]  ;;  %v404_v8 = vld [vmem:[%s5708_s1 + $0x150] sm:$0xff] }
  0x25   : > { %3434 = vmatmul.mubr.msk.f32.gmra.mrb[8].mxu0 %vm422_vm1, %v315_v23  ;;  %v340_v9 = vld [vmem:[%s3647_s20 + $0x110] sm:$0xff]  ;;  %v405_v10 = vld [vmem:[%s5708_s1 + $0x158] sm:$0xff]  ;;  %v406_v12 = vld [vmem:[%s5708_s1 + $0x160] sm:$0xff] }
  0x26   : > { %3436 = vmatprep.mubr.msk.f32.mxu0 %vm422_vm1, %v316_v25  ;;  %v341_v11 = vld [vmem:[%s3647_s20 + $0x118] sm:$0xff]  ;;  %v342_v13 = vld [vmem:[%s3647_s20 + $0x120] sm:$0xff]  ;;  %v380_v14 = vld [vmem:[%s5708_s1 + $0x90] sm:$0xff] }
  0x27   : > { %1130 = vperm.xlu0 %3560, %v392_v24   ;;  %1135 = vperm.xlu1 %3561, %v393_v26   ;;  %v343_v15 = vld [vmem:[%s3647_s20 + $0x128] sm:$0xff]  ;;  %v381_v16 = vld [vmem:[%s5708_s1 + $0x98] sm:$0xff]  ;;  %v344_v17 = vld [vmem:[%s3647_s20 + $0x130] sm:$0xff] }
  0x28   : > { %v382_v18 = vld [vmem:[%s5708_s1 + $0xa0] sm:$0xff]  ;;  %v345_v19 = vld [vmem:[%s3647_s20 + $0x138] sm:$0xff]  ;;  %v407_v20 = vld [vmem:[%s5708_s1 + $0x168] sm:$0xff] }
  0x29   : > { %3437 = vmatmul.mubr.msk.f32.gmra.mrb[10].mxu0 %vm422_vm1, %v317_v27  ;;  %v346_v21 = vld [vmem:[%s3647_s20 + $0x140] sm:$0xff]  ;;  %v408_v22 = vld [vmem:[%s5708_s1 + $0x170] sm:$0xff]  ;;  %v347_v23 = vld [vmem:[%s3647_s20 + $0x148] sm:$0xff] }
  0x2a   : > { %3439 = vmatprep.mubr.msk.f32.mxu0 %vm422_vm1, %v318_v29  ;;  %v409_v24 = vld [vmem:[%s5708_s1 + $0x178] sm:$0xff]  ;;  %v348_v25 = vld [vmem:[%s3647_s20 + $0x150] sm:$0xff]  ;;  %v383_v26 = vld [vmem:[%s5708_s1 + $0xa8] sm:$0xff] }
  0x2b   : > { %1140 = vperm.xlu0 %3560, %v394_v28   ;;  %1010 = vperm.xlu1 %3561, %v368_v30   ;;  %v349_v27 = vld [vmem:[%s3647_s20 + $0x158] sm:$0xff]  ;;  %v384_v28 = vld [vmem:[%s5708_s1 + $0xb0] sm:$0xff]  ;;  %v350_v29 = vld [vmem:[%s3647_s20 + $0x160] sm:$0xff] }
  0x2c   : > { %v385_v30 = vld [vmem:[%s5708_s1 + $0xb8] sm:$0xff]  ;;  %vm4646_vm4 = vmpackc.low %vm422_vm1, %vm422_vm1 }
  0x2d   : > { %3440 = vmatmul.mubr.msk.f32.gmra.mrb[12].mxu0 %vm422_vm1, %v319_v31  ;;  %v351_v31 = vld [vmem:[%s3647_s20 + $0x168] sm:$0xff] }
  0x2e   : > { %3442 = vmatprep.mubr.msk.f32.mxu0 %vm422_vm1, %v320_v33  ;;  %v352_v33 = vld [vmem:[%s3647_s20 + $0x170] sm:$0xff] }
  0x2f   : > { %1015 = vperm.xlu0 %3560, %v369_v32   ;;  %1020 = vperm.xlu1 %3561, %v370_v34   ;;  %v410_v32 = vld [vmem:[%s5708_s1 + $0x180] sm:$0xff]  ;;  %v411_v34 = vld [vmem:[%s5708_s1 + $0x188] sm:$0xff] }
  0x31   : > { %3443 = vmatmul.mubr.msk.f32.gmra.mrb[14].mxu0 %vm422_vm1, %v321_v35  ;;  %v353_v35 = vld [vmem:[%s3647_s20 + $0x178] sm:$0xff] }
  0x32   : > { %3445 = vmatprep.mubr.msk.f32.mxu0 %vm422_vm1, %v322_v37  ;;  %v354_v37 = vld [vmem:[%s3647_s20 + $0x180] sm:$0xff] }
  0x33   : > { %1145 = vperm.xlu0 %3560, %v395_v36   ;;  %1150 = vperm.xlu1 %3561, %v396_v38   ;;  %v412_v36 = vld [vmem:[%s5708_s1 + $0x190] sm:$0xff]  ;;  %v413_v38 = vld [vmem:[%s5708_s1 + $0x198] sm:$0xff] }
  0x35   : > { %3446 = vmatmul.mubr.msk.f32.gmra.mrb[16].mxu0 %vm422_vm1, %v323_v39  ;;  %v355_v39 = vld [vmem:[%s3647_s20 + $0x188] sm:$0xff] }
  0x36   : > { %3448 = vmatprep.mubr.msk.f32.mxu0 %vm422_vm1, %v324_v41  ;;  %v356_v41 = vld [vmem:[%s3647_s20 + $0x190] sm:$0xff] }
  0x37   : > { %1155 = vperm.xlu0 %3560, %v397_v40   ;;  %1025 = vperm.xlu1 %3561, %v371_v42   ;;  %v414_v40 = vld [vmem:[%s5708_s1 + $0x1a0] sm:$0xff]  ;;  %v415_v42 = vld [vmem:[%s5708_s1 + $0x1a8] sm:$0xff] }
  0x39   : > { %3449 = vmatmul.mubr.msk.f32.gmra.mrb[18].mxu0 %vm422_vm1, %v325_v43  ;;  %v357_v43 = vld [vmem:[%s3647_s20 + $0x198] sm:$0xff] }
  0x3a   : > { %3451 = vmatprep.mubr.msk.f32.mxu0 %vm422_vm1, %v326_v45  ;;  %v358_v45 = vld [vmem:[%s3647_s20 + $0x1a0] sm:$0xff] }
  0x3b   : > { %1030 = vperm.xlu0 %3560, %v372_v44   ;;  %1035 = vperm.xlu1 %3561, %v373_v46   ;;  %v2983_v44 = vld [vmem:[%s5714_s7] sm:$0x3]  ;;  %v359_v46 = vld [vmem:[%s3647_s20 + $0x1a8] sm:$0xff] }
  0x3d   : > { %3452 = vmatmul.mubr.msk.f32.gmra.mrb[20].mxu0 %vm422_vm1, %v327_v47 }
  0x3e   : > { %3454 = vmatprep.mubr.msk.f32.mxu0 %vm422_vm1, %v328_v49 }
  0x3f   : > { %1160 = vperm.xlu0 %3560, %v398_v48   ;;  %1165 = vperm.xlu1 %3561, %v399_v50  }
  0x41   : > { %3455 = vmatmul.mubr.msk.f32.gmra.mrb[22].mxu0 %vm422_vm1, %v329_v51 }
  0x42   : > { %3457 = vmatprep.mubr.msk.f32.mxu0 %vm422_vm1, %v330_v53 }
  0x43   : > { %1170 = vperm.xlu0 %3560, %v400_v52   ;;  %1040 = vperm.xlu1 %3561, %v374_v54  }
  0x45   : > { %3458 = vmatmul.mubr.msk.f32.gmra.mrb[24].mxu0 %vm422_vm1, %v331_v55 }
  0x46   : > { %3460 = vmatprep.mubr.msk.f32.mxu0 %vm422_vm1, %v332_v57 }
  0x47   : > { %1045 = vperm.xlu0 %3560, %v375_v56   ;;  %1050 = vperm.xlu1 %3561, %v376_v58  }
  0x49   : > { %3461 = vmatmul.mubr.msk.f32.gmra.mrb[26].mxu0 %vm422_vm1, %v333_v59 }
  0x4a   : > { %3463 = vmatprep.mubr.msk.f32.mxu0 %vm422_vm1, %v334_v61 }
  0x4b   : > { %1175 = vperm.xlu0 %3560, %v401_v60   ;;  %1180 = vperm.xlu1 %3561, %v402_v62  }
  0x4d   : > { %3464 = vmatmul.mubr.msk.f32.gmra.mrb[28].mxu0 %vm422_vm1, %v335_v63 }
  0x4e   : > { %3466 = vmatprep.mubr.msk.f32.mxu0 %vm422_vm1, %v336_v1 }
  0x4f   : > { %1185 = vperm.xlu0 %3560, %v403_v0   ;;  %1055 = vperm.xlu1 %3561, %v377_v2  }
  0x51   : > { %3467 = vmatmul.mubr.msk.f32.gmra.mrb[30].mxu0 %vm422_vm1, %v337_v3 }
  0x52   : > { %3469 = vmatprep.mubr.msk.f32.mxu0 %vm422_vm1, %v338_v5 }
  0x53   : > { %1060 = vperm.xlu0 %3560, %v378_v4   ;;  %1065 = vperm.xlu1 %3561, %v379_v6  }
  0x55   : > { %3470 = vmatmul.mubr.msk.f32.gmra.mrb[32].mxu0 %vm422_vm1, %v339_v7 }
  0x56   : > { %3472 = vmatprep.mubr.msk.f32.mxu0 %vm422_vm1, %v340_v9 }
  0x57   : > { %1190 = vperm.xlu0 %3560, %v404_v8   ;;  %1195 = vperm.xlu1 %3561, %v405_v10  }
  0x59   : > { %3473 = vmatmul.mubr.msk.f32.gmra.mrb[34].mxu0 %vm422_vm1, %v341_v11  ;;  %v1306_v11 = vlaneseq }
  0x5a   : > { %3475 = vmatprep.mubr.msk.f32.mxu0 %vm422_vm1, %v342_v13 }
  0x5b   : > { %1200 = vperm.xlu0 %3560, %v406_v12   ;;  %1070 = vperm.xlu1 %3561, %v380_v14   ;;  %v1307_v13 = vshrl.u32 %v1306_v11, 7 }
  0x5d   : > { %3476 = vmatmul.mubr.msk.f32.gmra.mrb[36].mxu0 %vm422_vm1, %v343_v15  ;;  %v3969_v15 = vld [vmem:[%s5710_s3] ss:$0 sm:$0xff] }
  0x5e   : > { %3478 = vmatprep.mubr.msk.f32.mxu0 %vm422_vm1, %v344_v17  ;;  %v1344_v17 = vsub.s32 1, %v1307_v13 }
  0x5f   : > { %1075 = vperm.xlu0 %3560, %v381_v16   ;;  %1080 = vperm.xlu1 %3561, %v382_v18   ;;  %v1308_v16 = vsub.s32 0, %v1307_v13  ;;  %v1589_v18 = vsub.s32 2, %v1307_v13 }
  0x61   : > { %3479 = vmatmul.mubr.msk.f32.gmra.mrb[38].mxu0 %vm422_vm1, %v345_v19 }
  0x62   : > { %3481 = vmatprep.mubr.msk.f32.mxu0 %vm422_vm1, %v346_v21 }
  0x63   : > { %1205 = vperm.xlu0 %3560, %v407_v20   ;;  %1210 = vperm.xlu1 %3561, %v408_v22   ;;  %v1302_v20 = vld [vmem:[%s5711_s4] sm:$0x7] }
  0x65   : > { %3482 = vmatmul.mubr.msk.f32.gmra.mrb[40].mxu0 %vm422_vm1, %v347_v23 }
  0x66   : > { %3484 = vmatprep.mubr.msk.f32.mxu0 %vm422_vm1, %v348_v25 }
  0x67   : > { %1215 = vperm.xlu0 %3560, %v409_v24   ;;  %1085 = vperm.xlu1 %3561, %v383_v26   ;;  %v1303_v24 = vld [vmem:[%s5711_s4 + $0x4] sm:$0x7] }
  0x69   : > { %3485 = vmatmul.mubr.msk.f32.gmra.mrb[42].mxu0 %vm422_vm1, %v349_v27 }
  0x6a   : > { %3487 = vmatprep.mubr.msk.f32.mxu0 %vm422_vm1, %v350_v29  ;;  %v3985_v29 = vrot.slane %v1302_v20, %v1344_v17 }
  0x6b   : > { %1090 = vperm.xlu0 %3560, %v384_v28   ;;  %1095 = vperm.xlu1 %3561, %v385_v30   ;;  %v3983_v28 = vrot.slane %v1302_v20, %v1308_v16  ;;  %v3987_v30 = vrot.slane %v1302_v20, %v1589_v18 }
  0x6d   : > { %3488 = vmatmul.mubr.msk.f32.gmra.mrb[44].mxu0 %vm422_vm1, %v351_v31  ;;  %v1304_v31 = vld [vmem:[%s5711_s4 + $0x8] sm:$0x7] }
  0x6e   : > { %3490 = vmatprep.mubr.msk.f32.mxu0 %vm422_vm1, %v352_v33  ;;  %v4008_v11 = vrot.slane %v1304_v31, %v1589_v18 }
  0x6f   : > { %1220 = vperm.xlu0 %3560, %v410_v32   ;;  %1225 = vperm.xlu1 %3561, %v411_v34   ;;  %v3992_v34 = vrot.slane %v1303_v24, %v1344_v17 }
  0x70   : > { %5826 = vst [vmem:[#allocation8_spill] sm:$0xff] %v4008_v11 }
  0x71   : > { %3491 = vmatmul.mubr.msk.f32.gmra.mrb[46].mxu0 %vm422_vm1, %v353_v35 }
  0x72   : > { %3493 = vmatprep.mubr.msk.f32.mxu0 %vm422_vm1, %v354_v37 }
  0x73   : > { %1230 = vperm.xlu0 %3560, %v412_v36   ;;  %1235 = vperm.xlu1 %3561, %v413_v38   ;;  %v3995_v38 = vrot.slane %v1303_v24, %v1589_v18 }
  0x75   : > { %3494 = vmatmul.mubr.msk.f32.gmra.mrb[48].mxu0 %vm422_vm1, %v355_v39  ;;  %v3997_v39 = vrot.slane %v1303_v24, %v1308_v16 }
  0x76   : > { %3496 = vmatprep.mubr.msk.f32.mxu0 %vm422_vm1, %v356_v41 }
  0x77   : > { %1240 = vperm.xlu0 %3560, %v414_v40   ;;  %1245 = vperm.xlu1 %3561, %v415_v42   ;;  %v4000_v42 = vrot.slane %v1304_v31, %v1308_v16 }
  0x79   : > { %3497 = vmatmul.mubr.msk.f32.gmra.mrb[50].mxu0 %vm422_vm1, %v357_v43  ;;  %v4002_v43 = vrot.slane %v1304_v31, %v1344_v17 }
  0x7a   : > { %3499 = vmatprep.mubr.msk.f32.mxu0 %vm422_vm1, %v358_v45 }
  0x7b   : > { %2986 = vperm.xlu0 %3560, %v2983_v44  }
  0x7d   : > { %3500 = vmatmul.mubr.msk.f32.gmra.mrb[52].mxu0 %vm422_vm1, %v359_v46 }
  0x8e   : > { %v3910_v47 = vpop.permute.xlu1 %1110  ;;  %v3912_v48 = vpop.permute.xlu0 %1100 }
  0x92   : > { %v981_v49 = vpop.permute.xlu1 %980  ;;  %v3914_v50 = vpop.permute.xlu0 %1105 }
  0x96   : > { %v3916_v51 = vpop.permute.xlu1 %990  ;;  %v986_v52 = vpop.permute.xlu0 %985 }
  0x9a   : > { %v3918_v53 = vpop.permute.xlu1 %1120  ;;  %v3920_v54 = vpop.permute.xlu0 %1115 }
  0x9e   : > { %v3922_v55 = vpop.permute.xlu1 %995  ;;  %v3924_v56 = vpop.permute.xlu0 %1125 }
  0xa2   : > { %v3926_v57 = vpop.permute.xlu1 %1005  ;;  %v3928_v58 = vpop.permute.xlu0 %1000 }
  0xa6   : > { %v3930_v59 = vpop.permute.xlu1 %1135  ;;  %v3932_v60 = vpop.permute.xlu0 %1130 }
  0xaa   : > { %v3934_v61 = vpop.permute.xlu1 %1010  ;;  %v3936_v62 = vpop.permute.xlu0 %1140 }
  0xae   : > { %v3938_v63 = vpop.permute.xlu1 %1020  ;;  %v3940_v0 = vpop.permute.xlu0 %1015 }
  0xb2   : > { %v3942_v1 = vpop.permute.xlu1 %1150  ;;  %v3944_v2 = vpop.permute.xlu0 %1145 }
  0xb3   : > { %5820 = vst [vmem:[#allocation2_spill] sm:$0xff] %v3942_v1 }
  0xb6   : > { %v3946_v3 = vpop.permute.xlu1 %1025  ;;  %v3948_v4 = vpop.permute.xlu0 %1155 }
  0xba   : > { %v3950_v5 = vpop.permute.xlu1 %1035  ;;  %v3952_v6 = vpop.permute.xlu0 %1030 }
  0xbe   : > { %v3954_v7 = vpop.permute.xlu1 %1165  ;;  %v3956_v8 = vpop.permute.xlu0 %1160 }
  0xbf   : > { %5821 = vst [vmem:[#allocation3_spill] sm:$0xff] %v3954_v7  ;;  %5822 = vst [vmem:[#allocation4_spill] sm:$0xff] %v3956_v8 }
  0xc2   : > { %v3958_v9 = vpop.permute.xlu1 %1040  ;;  %v3960_v10 = vpop.permute.xlu0 %1170 }
  0xc3   : > { %5823 = vst [vmem:[#allocation5_spill] sm:$0xff] %v3960_v10 }
  0xc6   : > { %v3962_v12 = vpop.permute.xlu1 %1050  ;;  %v3964_v14 = vpop.permute.xlu0 %1045 }
  0xca   : > { %v3974_v21 = vpop.permute.xlu1 %1180  ;;  %v3980_v25 = vpop.permute.xlu0 %1175 }
  0xcb   : > { %5824 = vst [vmem:[#allocation6_spill] sm:$0xff] %v3974_v21  ;;  %5825 = vst [vmem:[#allocation7_spill] sm:$0xff] %v3980_v25 }
  0xce   : > { %v4004_v44 = vpop.permute.xlu1 %1055  ;;  %v4010_v13 = vpop.permute.xlu0 %1185 }
  0xcf   : > { %5827 = vst [vmem:[#allocation9_spill] sm:$0xff] %v4010_v13 }
  0xe8   : > { %v3423_v19 = vpop.f32.mrb[0].mxu0 }
  0xe9   : > { %v661_v22 = vadd.f32 %v3423_v19, %v3969_v15  ;;  %v655_v23 = vpop.f32.mrb[1].mxu0 }
  0xea   : > { %v656_v26 = vadd.f32 %v3969_v15, %v655_v23 }
  0xeb   : > { %v925_v27 = vmax.f32 %v661_v22, 0.0 }
  0xec   : > { %v924_v32 = vmax.f32 %v656_v26, 0.0  ;;  %v3426_v33 = vpop.f32.mrb[2].mxu0 }
  0xed   : > { %v1249_v35 = vmul.f32 %v986_v52, %v925_v27  ;;  %v671_v36 = vadd.f32 %v3426_v33, %v3969_v15  ;;  %v665_v37 = vpop.f32.mrb[3].mxu0 }
  0xee   : > { %v1248_v40 = vmul.f32 %v981_v49, %v924_v32  ;;  %v666_v41 = vadd.f32 %v3969_v15, %v665_v37 }
  0xef   : > { %v1347_v45 = vmul.f32 %v3985_v29, %v1249_v35  ;;  %v1592_v46 = vmul.f32 %v3987_v30, %v1249_v35  ;;  %v927_v52 = vmax.f32 %v671_v36, 0.0  ;;  %v1311_v19 = vmul.f32 %v3983_v28, %v1249_v35 }
  0xf0   : > { %v1346_v49 = vmul.f32 %v3985_v29, %v1248_v40  ;;  %v1591_v16 = vmul.f32 %v3987_v30, %v1248_v40  ;;  %v926_v20 = vmax.f32 %v666_v41, 0.0  ;;  %v3429_v17 = vpop.f32.mrb[4].mxu0  ;;  %v1310_v35 = vmul.f32 %v3983_v28, %v1248_v40 }
  0xf1   : > { %v1444_v22 = vrot.slane %v1347_v45, 1  ;;  %v1689_v23 = vrot.slane %v1592_v46, 2  ;;  %v4016_v24 = vmul.f32 %v3922_v55, %v927_v52  ;;  %v681_v26 = vadd.f32 %v3429_v17, %v3969_v15  ;;  %v675_v27 = vpop.f32.mrb[5].mxu0  ;;  %v4036_v52 = vpop.permute.xlu1 %1065 }
  0xf2   : > { %v1443_v18 = vrot.slane %v1346_v49, 1  ;;  %v1688_v31 = vrot.slane %v1591_v16, 2  ;;  %v1250_v32 = vmul.f32 %v3916_v51, %v926_v20  ;;  %v676_v33 = vadd.f32 %v3969_v15, %v675_v27 }
  0xf3   : > { %v4024_v36 = vmul.f32 %v3983_v28, %v4016_v24  ;;  %v1349_v37 = vmul.f32 %v3985_v29, %v4016_v24  ;;  %v4030_v55 = vmul.f32 %v3987_v30, %v4016_v24  ;;  %v4040_v20 = vmul.f32 %v3992_v34, %v4016_v24 }
  0xf4   : > { %v1445_v41 = vsel %vm1442_vm2, %v1443_v18, %v1444_v22  ;;  %v1690_v45 = vsel %vm1687_vm3, %v1688_v31, %v1689_v23  ;;  %v1348_v51 = vmul.f32 %v3985_v29, %v1250_v32  ;;  %v1593_v46 = vmul.f32 %v3987_v30, %v1250_v32  ;;  %v3432_v40 = vpop.f32.mrb[6].mxu0 }
  0xf5   : > { %5828 = vst [vmem:[#allocation10_spill] sm:$0xff] %v4024_v36  ;;  %5829 = vst [vmem:[#allocation11_spill] sm:$0xff] %v4030_v55  ;;  %v1555_v49 = vadd.f32 %v1445_v41, %v1310_v35  ;;  %v1448_v16 = vrot.slane %v1349_v37, 1  ;;  %v929_v17 = vmax.f32 %v681_v26, 0.0  ;;  %v685_v27 = vpop.f32.mrb[7].mxu0  ;;  %v4042_v36 = vpop.permute.xlu0 %1060  ;;  %v928_v31 = vmax.f32 %v676_v33, 0.0 }
  0xf6   : > { %v1446_v18 = vrot.slane %v1348_v51, 1  ;;  %v1691_v11 = vrot.slane %v1593_v46, 2  ;;  %v691_v21 = vadd.f32 %v3432_v40, %v3969_v15  ;;  %v686_v35 = vadd.f32 %v3969_v15, %v685_v27 }
  0xf7   : > { %v1800_v13 = vadd.f32 %v1690_v45, %v1555_v49  ;;  %v1253_v10 = vmul.f32 %v3926_v57, %v929_v17  ;;  %v4051_v26 = vmul.f32 %v3928_v58, %v928_v31 }
  0xf8   : > { %v1447_v37 = vsel %vm1442_vm2, %v1444_v22, %v1446_v18  ;;  %v1692_v41 = vsel %vm1687_vm3, %v1689_v23, %v1691_v11  ;;  %v931_v25 = vmax.f32 %v691_v21, 0.0  ;;  %v3435_v51 = vpop.f32.mrb[8].mxu0  ;;  %v1836_v21 = vmul.f32 %v3997_v39, %v4016_v24 }
  0xf9   : > { %v1556_v46 = vadd.f32 %v1447_v37, %v1311_v19  ;;  %v1351_v33 = vmul.f32 %v3985_v29, %v1253_v10  ;;  %v4055_v45 = vmul.f32 %v3987_v30, %v1253_v10  ;;  %v4058_v40 = vmul.f32 %v3992_v34, %v1253_v10  ;;  %v695_v57 = vpop.f32.mrb[9].mxu0  ;;  %v4071_v19 = vpop.permute.xlu1 %1195 }
  0xfa   : > { %v4061_v49 = vmul.f32 %v3995_v38, %v1253_v10  ;;  %v1350_v11 = vmul.f32 %v3985_v29, %v4051_v26  ;;  %v4067_v58 = vmul.f32 %v3987_v30, %v4051_v26  ;;  %5832 = vst [vmem:[#allocation14_spill] sm:$0xff] %v4071_v19  ;;  %v1313_v10 = vmul.f32 %v3983_v28, %v4051_v26  ;;  %v4078_v27 = vpop.permute.xlu0 %1190 }
  0xfb   : > { %5830 = vst [vmem:[#allocation12_spill] sm:$0xff] %v4055_v45  ;;  %v4073_v22 = vadd.f32 %v1692_v41, %v1556_v46  ;;  %v1451_v23 = vrot.slane %v1351_v33, 1  ;;  %5833 = vst [vmem:[#allocation15_spill] sm:$0xff] %v4078_v27  ;;  %v4084_v19 = vmul.f32 %v3940_v0, %v931_v25  ;;  %v930_v41 = vmax.f32 %v686_v35, 0.0 }
  0xfc   : > { %5831 = vst [vmem:[#allocation13_spill] sm:$0xff] %v4067_v58  ;;  %v1449_v37 = vrot.slane %v1350_v11, 1  ;;  %v3438_v55 = vpop.f32.mrb[10].mxu0  ;;  %v701_v46 = vadd.f32 %v3435_v51, %v3969_v15  ;;  %v696_v33 = vadd.f32 %v3969_v15, %v695_v57  ;;  %v1905_v0 = vmul.f32 %v3992_v34, %v4051_v26 }
  0xfd   : > { %v705_v17 = vpop.f32.mrb[11].mxu0  ;;  %v711_v31 = vadd.f32 %v3438_v55, %v3969_v15  ;;  %v4099_v51 = vmul.f32 %v3934_v61, %v930_v41  ;;  %v4105_v55 = vpop.permute.xlu1 %1070  ;;  %v1837_v61 = vmul.f32 %v3997_v39, %v4051_v26  ;;  %v1868_v41 = vadd.f32 %v1836_v21, %v1800_v13 }
  0xfe   : > { %v4089_v45 = vsel %vm1442_vm2, %v1448_v16, %v1449_v37  ;;  %v1452_v18 = vsel %vm1442_vm2, %v1449_v37, %v1451_v23  ;;  %v706_v11 = vadd.f32 %v3969_v15, %v705_v17  ;;  %v933_v25 = vmax.f32 %v701_v46, 0.0  ;;  %v4115_v46 = vpop.permute.xlu0 %1200 }
  0xff   : > { %5834 = vst [vmem:[#allocation16_spill] sm:$0xff] %v4089_v45  ;;  %v4094_v32 = vadd.f32 %v1452_v18, %v1313_v10  ;;  %v932_v35 = vmax.f32 %v696_v33, 0.0  ;;  %v4103_v16 = vmul.f32 %v3985_v29, %v4084_v19  ;;  %v935_v57 = vmax.f32 %v711_v31, 0.0  ;;  %5838 = vst [vmem:[#allocation20_spill] sm:$0xff] %v4115_v46 }
 0x100   : > { %v934_v23 = vmax.f32 %v706_v11, 0.0  ;;  %v3441_v37 = vpop.f32.mrb[12].mxu0  ;;  %v4108_v17 = vmul.f32 %v3946_v3, %v933_v25  ;;  %v1869_v46 = vadd.f32 %v1837_v61, %v4073_v22  ;;  %v2000_v27 = vrot.slane %v4040_v20, 1 }
 0x101   : > { %5835 = vst [vmem:[#allocation17_spill] sm:$0xff] %v4094_v32  ;;  %5836 = vst [vmem:[#allocation18_spill] sm:$0xff] %v4103_v16  ;;  %v4111_v10 = vmul.f32 %v3938_v63, %v932_v35  ;;  %v715_v18 = vpop.f32.mrb[13].mxu0  ;;  %v4119_v31 = vmul.f32 %v3950_v5, %v935_v57  ;;  %v721_v11 = vadd.f32 %v3441_v37, %v3969_v15  ;;  %v5845_v8 = vrot.slane %v4103_v16, 1 }
 0x102   : > { %5837 = vst [vmem:[#allocation19_spill] sm:$0xff] %v4108_v17  ;;  %v716_v3 = vadd.f32 %v3969_v15, %v715_v18  ;;  %v4156_v58 = vmul.f32 %v3952_v6, %v934_v23  ;;  %v5848_v20 = vrot.slane %v4058_v40, 1 }
 0x103   : > { %5839 = vst [vmem:[#allocation21_spill] sm:$0xff] %v4119_v31  ;;  %v1354_v63 = vmul.f32 %v3985_v29, %v4111_v10  ;;  %v4127_v25 = vmul.f32 %v3987_v30, %v4111_v10  ;;  %v4131_v13 = vmul.f32 %v3992_v34, %v4111_v10  ;;  %v4135_v21 = vmul.f32 %v3995_v38, %v4111_v10 }
 0x104   : > { %v4139_v5 = vmul.f32 %v3985_v29, %v4119_v31  ;;  %v4143_v35 = vmul.f32 %v3987_v30, %v4119_v31  ;;  %v4147_v57 = vmul.f32 %v3992_v34, %v4119_v31  ;;  %v4151_v37 = vmul.f32 %v3995_v38, %v4119_v31  ;;  %v3444_v18 = vpop.f32.mrb[14].mxu0  ;;  %v4162_v31 = vpop.permute.xlu1 %1080 }
 0x105   : > { %5840 = vst [vmem:[#allocation22_spill] sm:$0xff] %v4127_v25  ;;  %v1456_v33 = vrot.slane %v1354_v63, 1  ;;  %v725_v45 = vpop.f32.mrb[15].mxu0  ;;  %v937_v1 = vmax.f32 %v721_v11, 0.0  ;;  %v936_v17 = vmax.f32 %v716_v3, 0.0  ;;  %v731_v32 = vadd.f32 %v3444_v18, %v3969_v15  ;;  %v1076_v25 = vpop.permute.xlu0 %1075 }
 0x106   : > { %5841 = vst [vmem:[#allocation23_spill] sm:$0xff] %v4139_v5  ;;  %5842 = vst [vmem:[#allocation24_spill] sm:$0xff] %v4143_v35  ;;  %v726_v6 = vadd.f32 %v3969_v15, %v725_v45  ;;  %v2001_v5 = vrot.slane %v1905_v0, 1 }
 0x107   : > { %5843 = vst [vmem:[#allocation25_spill] sm:$0xff] %v4147_v57  ;;  %5844 = vst [vmem:[#allocation26_spill] sm:$0xff] %v4151_v37  ;;  %v4172_v7 = vsel %vm1442_vm2, %v5845_v8, %v1456_v33  ;;  %v4175_v63 = vmul.f32 %v3964_v14, %v937_v1  ;;  %v939_v11 = vmax.f32 %v731_v32, 0.0  ;;  %v4184_v61 = vmul.f32 %v3958_v9, %v936_v17 }
 0x108   : > { %v3447_v23 = vpop.f32.mrb[16].mxu0  ;;  %5846 = vst [vmem:[#allocation27_spill] sm:$0xff] %v4172_v7  ;;  %v938_v35 = vmax.f32 %v726_v6, 0.0  ;;  %v2002_v22 = vsel %vm1442_vm2, %v2000_v27, %v2001_v5  ;;  %v2004_v0 = vsel %vm1442_vm2, %v2001_v5, %v5848_v20 }
 0x109   : > { %5847 = vst [vmem:[#allocation28_spill] sm:$0xff] %v4175_v63  ;;  %v741_v3 = vadd.f32 %v3447_v23, %v3969_v15  ;;  %v735_v18 = vpop.f32.mrb[17].mxu0  ;;  %5849 = vst [vmem:[#allocation29_spill] sm:$0xff] %v4184_v61  ;;  %v4187_v8 = vmul.f32 %v4004_v44, %v939_v11  ;;  %v2112_v14 = vadd.f32 %v2002_v22, %v1868_v41  ;;  %v4196_v23 = vpop.permute.xlu1 %1210 }
 0x10a   : > { %v736_v45 = vadd.f32 %v3969_v15, %v735_v18  ;;  %v4190_v32 = vmul.f32 %v3962_v12, %v938_v35  ;;  %v4194_v33 = vmul.f32 %v3985_v29, %v4175_v63  ;;  %v2113_v40 = vadd.f32 %v2004_v0, %v1869_v46  ;;  %v4206_v5 = vpop.permute.xlu0 %1205 }
 0x10b   : > { %5850 = vst [vmem:[#allocation30_spill] sm:$0xff] %v4187_v8  ;;  %v941_v1 = vmax.f32 %v741_v3, 0.0  ;;  %v2148_v41 = vmul.f32 %v3995_v38, %v4016_v24  ;;  %v2149_v12 = vmul.f32 %v3995_v38, %v4051_v26 }
 0x10c   : > { %5851 = vst [vmem:[#allocation31_spill] sm:$0xff] %v4190_v32  ;;  %5852 = vst [vmem:[#allocation32_spill] sm:$0xff] %v4194_v33  ;;  %v940_v27 = vmax.f32 %v736_v45, 0.0  ;;  %v3450_v6 = vpop.f32.mrb[18].mxu0  ;;  %v1360_v35 = vmul.f32 %v3985_v29, %v4190_v32  ;;  %v4212_v46 = vmul.f32 %v3987_v30, %v4190_v32  ;;  %v4220_v11 = vmul.f32 %v3995_v38, %v4190_v32 }
 0x10d   : > { %v4199_v9 = vmul.f32 %v4036_v52, %v941_v1  ;;  %v751_v44 = vadd.f32 %v3450_v6, %v3969_v15  ;;  %v745_v17 = vpop.f32.mrb[19].mxu0  ;;  %v4216_v52 = vmul.f32 %v3992_v34, %v4190_v32  ;;  %v5738_v45 = vrot.slane %v4194_v33, 1 }
 0x10e   : > { %5854 = vst [vmem:[#allocation34_spill] sm:$0xff] %v4212_v46  ;;  %5856 = vst [vmem:[#allocation36_spill] sm:$0xff] %v4220_v11  ;;  %v1466_v22 = vrot.slane %v1360_v35, 1  ;;  %v746_v0 = vadd.f32 %v3969_v15, %v745_v17  ;;  %v1086_v46 = vpop.permute.xlu1 %1085  ;;  %v2245_v37 = vrot.slane %v2149_v12, 2  ;;  %v4257_v57 = vmul.f32 %v4042_v36, %v940_v27 }
 0x10f   : > { %5853 = vst [vmem:[#allocation33_spill] sm:$0xff] %v4199_v9  ;;  %5855 = vst [vmem:[#allocation35_spill] sm:$0xff] %v4216_v52  ;;  %v4224_v24 = vmul.f32 %v3985_v29, %v4199_v9  ;;  %v4228_v26 = vmul.f32 %v3987_v30, %v4199_v9  ;;  %v4232_v3 = vmul.f32 %v3992_v34, %v4199_v9  ;;  %v943_v20 = vmax.f32 %v751_v44, 0.0 }
 0x110   : > { %v4236_v18 = vmul.f32 %v3995_v38, %v4199_v9  ;;  %v3453_v1 = vpop.f32.mrb[20].mxu0  ;;  %v4248_v9 = vsel %vm1442_vm2, %v5738_v45, %v1466_v22  ;;  %5862 = vst [vmem:[#allocation42_spill] sm:$0xff] %v4257_v57  ;;  %v942_v22 = vmax.f32 %v746_v0, 0.0  ;;  %v2392_v44 = vmul.f32 %v4000_v42, %v4099_v51 }
 0x111   : > { %5857 = vst [vmem:[#allocation37_spill] sm:$0xff] %v4224_v24  ;;  %5858 = vst [vmem:[#allocation38_spill] sm:$0xff] %v4228_v26  ;;  %v755_v32 = vpop.f32.mrb[21].mxu0  ;;  %v761_v6 = vadd.f32 %v3453_v1, %v3969_v15  ;;  %v2244_v24 = vrot.slane %v2148_v41, 2  ;;  %v4254_v26 = vpop.permute.xlu0 %1215  ;;  %v2393_v12 = vmul.f32 %v4000_v42, %v4084_v19 }
 0x112   : > { %5859 = vst [vmem:[#allocation39_spill] sm:$0xff] %v4232_v3  ;;  %5860 = vst [vmem:[#allocation40_spill] sm:$0xff] %v4236_v18  ;;  %v756_v8 = vadd.f32 %v3969_v15, %v755_v32  ;;  %v4259_v3 = vmul.f32 %v1076_v25, %v943_v20  ;;  %v5865_v25 = vrot.slane %v4061_v49, 2  ;;  %v1096_v33 = vpop.permute.xlu1 %1095 }
 0x113   : > { %5861 = vst [vmem:[#allocation41_spill] sm:$0xff] %v4248_v9  ;;  %v945_v17 = vmax.f32 %v761_v6, 0.0  ;;  %v2246_v32 = vsel %vm1687_vm3, %v2244_v24, %v2245_v37 }
 0x114   : > { %5863 = vst [vmem:[#allocation43_spill] sm:$0xff] %v4259_v3  ;;  %v3456_v45 = vpop.f32.mrb[22].mxu0  ;;  %v944_v35 = vmax.f32 %v756_v8, 0.0  ;;  %v4267_v41 = vmul.f32 %v3985_v29, %v4259_v3  ;;  %v2248_v27 = vsel %vm1687_vm3, %v2245_v37, %v5865_v25  ;;  %v4276_v8 = vmul.f32 %v4105_v55, %v942_v22 }
 0x115   : > { %v771_v1 = vadd.f32 %v3456_v45, %v3969_v15  ;;  %v765_v18 = vpop.f32.mrb[23].mxu0  ;;  %v2356_v20 = vadd.f32 %v2246_v32, %v2112_v14  ;;  %v4281_v0 = vmul.f32 %v1086_v46, %v945_v17  ;;  %v2357_v49 = vadd.f32 %v2248_v27, %v2113_v40 }
 0x116   : > { %5864 = vst [vmem:[#allocation44_spill] sm:$0xff] %v4267_v41  ;;  %v766_v36 = vadd.f32 %v3969_v15, %v765_v18  ;;  %5866 = vst [vmem:[#allocation45_spill] sm:$0xff] %v4276_v8  ;;  %v4279_v45 = vmul.f32 %v4162_v31, %v944_v35  ;;  %v4296_v46 = vmul.f32 %v4002_v43, %v4099_v51  ;;  %v1091_v35 = vpop.permute.xlu0 %1090 }
 0x117   : > { %v947_v24 = vmax.f32 %v771_v1, 0.0  ;;  %5868 = vst [vmem:[#allocation47_spill] sm:$0xff] %v4281_v0 }
 0x118   : > { %5867 = vst [vmem:[#allocation46_spill] sm:$0xff] %v4279_v45  ;;  %v946_v18 = vmax.f32 %v766_v36, 0.0  ;;  %v3459_v3 = vpop.f32.mrb[24].mxu0  ;;  %v1366_v37 = vmul.f32 %v3985_v29, %v4279_v45  ;;  %v4288_v55 = vmul.f32 %v3987_v30, %v4279_v45  ;;  %v4292_v31 = vmul.f32 %v3992_v34, %v4279_v45 }
 0x119   : > { %v775_v14 = vpop.f32.mrb[25].mxu0  ;;  %v4300_v40 = vmul.f32 %v3995_v38, %v4279_v45  ;;  %v4302_v22 = vmul.f32 %v1096_v33, %v947_v24  ;;  %v781_v17 = vadd.f32 %v3459_v3, %v3969_v15 }
 0x11a   : > { %5869 = vst [vmem:[#allocation48_spill] sm:$0xff] %v4288_v55  ;;  %5870 = vst [vmem:[#allocation49_spill] sm:$0xff] %v4292_v31  ;;  %v776_v1 = vadd.f32 %v3969_v15, %v775_v14  ;;  %v1476_v32 = vrot.slane %v1366_v37, 1  ;;  %v4308_v27 = vmul.f32 %v1091_v35, %v946_v18  ;;  %v5878_v18 = vrot.slane %v4267_v41, 1 }
 0x11b   : > { %5871 = vst [vmem:[#allocation50_spill] sm:$0xff] %v4300_v40  ;;  %5872 = vst [vmem:[#allocation51_spill] sm:$0xff] %v4302_v22  ;;  %v4312_v6 = vmul.f32 %v3985_v29, %v4302_v22  ;;  %v4316_v0 = vmul.f32 %v3987_v30, %v4302_v22  ;;  %v4320_v33 = vmul.f32 %v3992_v34, %v4302_v22  ;;  %v949_v14 = vmax.f32 %v781_v17, 0.0 }
 0x11c   : > { %5873 = vst [vmem:[#allocation52_spill] sm:$0xff] %v4308_v27  ;;  %v4324_v3 = vmul.f32 %v3995_v38, %v4302_v22  ;;  %v3462_v24 = vpop.f32.mrb[26].mxu0  ;;  %v4329_v37 = vsel %vm1442_vm2, %v5878_v18, %v1476_v32  ;;  %v948_v35 = vmax.f32 %v776_v1, 0.0  ;;  %v4344_v18 = vadd.f32 %v2392_v44, %v2356_v20 }
 0x11d   : > { %5874 = vst [vmem:[#allocation53_spill] sm:$0xff] %v4312_v6  ;;  %5875 = vst [vmem:[#allocation54_spill] sm:$0xff] %v4316_v0  ;;  %v791_v36 = vadd.f32 %v3462_v24, %v3969_v15  ;;  %v785_v25 = vpop.f32.mrb[27].mxu0  ;;  %v4337_v45 = vmul.f32 %v3914_v50, %v949_v14  ;;  %v4346_v55 = vadd.f32 %v2393_v12, %v2357_v49 }
 0x11e   : > { %5876 = vst [vmem:[#allocation55_spill] sm:$0xff] %v4320_v33  ;;  %5877 = vst [vmem:[#allocation56_spill] sm:$0xff] %v4324_v3  ;;  %v4340_v41 = vmul.f32 %v3912_v48, %v948_v35  ;;  %v786_v17 = vadd.f32 %v3969_v15, %v785_v25  ;;  %v4350_v27 = vmul.f32 %v4002_v43, %v4084_v19 }
 0x11f   : > { %5879 = vst [vmem:[#allocation57_spill] sm:$0xff] %v4329_v37  ;;  %5880 = vst [vmem:[#allocation58_spill] sm:$0xff] %v4337_v45  ;;  %v951_v32 = vmax.f32 %v791_v36, 0.0  ;;  %v4358_v25 = vmul.f32 %v4002_v43, %v4111_v10  ;;  %v1616_v22 = vmul.f32 %v3987_v30, %v4337_v45 }
 0x120   : > { %5881 = vst [vmem:[#allocation59_spill] sm:$0xff] %v4340_v41  ;;  %v3465_v24 = vpop.f32.mrb[28].mxu0  ;;  %v950_v14 = vmax.f32 %v786_v17, 0.0  ;;  %v1326_v12 = vmul.f32 %v3983_v28, %v4340_v41  ;;  %v1370_v20 = vmul.f32 %v3985_v29, %v4340_v41  ;;  %v1615_v17 = vmul.f32 %v3987_v30, %v4340_v41 }
 0x121   : > { %v4353_v50 = vmul.f32 %v3920_v54, %v951_v32  ;;  %v801_v48 = vadd.f32 %v3465_v24, %v3969_v15  ;;  %v795_v36 = vpop.f32.mrb[29].mxu0  ;;  %v1371_v54 = vmul.f32 %v3985_v29, %v4337_v45  ;;  %v1327_v32 = vmul.f32 %v3983_v28, %v4337_v45 }
 0x122   : > { %v796_v44 = vadd.f32 %v3969_v15, %v795_v36  ;;  %v4368_v49 = vmul.f32 %v3910_v47, %v950_v14  ;;  %v1483_v31 = vrot.slane %v1370_v20, 1  ;;  %v1728_v9 = vrot.slane %v1615_v17, 2 }
 0x123   : > { %5882 = vst [vmem:[#allocation60_spill] sm:$0xff] %v4353_v50  ;;  %v953_v35 = vmax.f32 %v801_v48, 0.0  ;;  %v1484_v1 = vrot.slane %v1371_v54, 1  ;;  %v4395_v3 = vmul.f32 %v3997_v39, %v4353_v50 }
 0x124   : > { %5883 = vst [vmem:[#allocation61_spill] sm:$0xff] %v4368_v49  ;;  %v952_v24 = vmax.f32 %v796_v44, 0.0  ;;  %v3468_v36 = vpop.f32.mrb[30].mxu0  ;;  %v1372_v0 = vmul.f32 %v3985_v29, %v4368_v49  ;;  %v1617_v47 = vmul.f32 %v3987_v30, %v4368_v49  ;;  %v4382_v14 = vmul.f32 %v3992_v34, %v4368_v49 }
 0x125   : > { %v4386_v48 = vmul.f32 %v3995_v38, %v4368_v49  ;;  %v805_v44 = vpop.f32.mrb[31].mxu0  ;;  %v4389_v20 = vmul.f32 %v3924_v56, %v953_v35  ;;  %v811_v54 = vadd.f32 %v3468_v36, %v3969_v15  ;;  %v1485_v33 = vsel %vm1442_vm2, %v1483_v31, %v1484_v1 }
 0x126   : > { %5884 = vst [vmem:[#allocation62_spill] sm:$0xff] %v4382_v14  ;;  %v806_v6 = vadd.f32 %v3969_v15, %v805_v44  ;;  %v1486_v41 = vrot.slane %v1372_v0, 1  ;;  %v1731_v45 = vrot.slane %v1617_v47, 2  ;;  %v4399_v37 = vmul.f32 %v3918_v53, %v952_v24 }
 0x127   : > { %5885 = vst [vmem:[#allocation63_spill] sm:$0xff] %v4386_v48  ;;  %5886 = vst [vmem:[#allocation64_spill] sm:$0xff] %v4389_v20  ;;  %v4403_v49 = vmul.f32 %v3985_v29, %v4389_v20  ;;  %v4407_v56 = vmul.f32 %v3987_v30, %v4389_v20  ;;  %v955_v35 = vmax.f32 %v811_v54, 0.0  ;;  %v1729_v24 = vrot.slane %v1616_v22, 2 }
 0x128   : > { %5887 = vst [vmem:[#allocation65_spill] sm:$0xff] %v4399_v37  ;;  %v954_v36 = vmax.f32 %v806_v6, 0.0  ;;  %v3471_v44 = vpop.f32.mrb[32].mxu0  ;;  %v1487_v53 = vsel %vm1442_vm2, %v1484_v1, %v1486_v41  ;;  %v1928_v14 = vmul.f32 %v3992_v34, %v4353_v50 }
 0x129   : > { %v821_v0 = vadd.f32 %v3471_v44, %v3969_v15  ;;  %v815_v47 = vpop.f32.mrb[33].mxu0  ;;  %v4416_v8 = vmul.f32 %v3930_v59, %v955_v35  ;;  %v1571_v44 = vadd.f32 %v1485_v33, %v1326_v12  ;;  %v1572_v1 = vadd.f32 %v1487_v53, %v1327_v32 }
 0x12a   : > { %v4419_v6 = vmul.f32 %v3932_v60, %v954_v36  ;;  %v816_v40 = vadd.f32 %v3969_v15, %v815_v47  ;;  %v1853_v60 = vmul.f32 %v3997_v39, %v4399_v37  ;;  %v1929_v33 = vmul.f32 %v3992_v34, %v4399_v37 }
 0x12b   : > { %v957_v54 = vmax.f32 %v821_v0, 0.0  ;;  %v4424_v31 = vmul.f32 %v3985_v29, %v4416_v8  ;;  %v1730_v32 = vsel %vm1687_vm3, %v1728_v9, %v1729_v24  ;;  %v1732_v47 = vsel %vm1687_vm3, %v1729_v24, %v1731_v45 }
 0x12c   : > { %v3474_v41 = vpop.f32.mrb[34].mxu0  ;;  %v956_v59 = vmax.f32 %v816_v40, 0.0  ;;  %v1816_v53 = vadd.f32 %v1730_v32, %v1571_v44  ;;  %v1817_v11 = vadd.f32 %v1732_v47, %v1572_v1  ;;  %v2041_v24 = vrot.slane %v1929_v33, 1  ;;  %v5890_v32 = vld [vmem:[#allocation2_spill] sm:$0xff] }
 0x12d   : > { %5888 = vst [vmem:[#allocation66_spill] sm:$0xff] %v4424_v31  ;;  %v831_v17 = vadd.f32 %v3474_v41, %v3969_v15  ;;  %v825_v35 = vpop.f32.mrb[35].mxu0  ;;  %v4434_v12 = vmul.f32 %v3944_v2, %v957_v54  ;;  %v1930_v2 = vmul.f32 %v3992_v34, %v4389_v20  ;;  %v2040_v54 = vrot.slane %v1928_v14, 1 }
 0x12e   : > { %v826_v22 = vadd.f32 %v3969_v15, %v825_v35  ;;  %v4440_v40 = vmul.f32 %v3936_v62, %v956_v59 }
 0x12f   : > { %v959_v0 = vmax.f32 %v831_v17, 0.0  ;;  %v2042_v57 = vsel %vm1442_vm2, %v2040_v54, %v2041_v24  ;;  %v2043_v63 = vrot.slane %v1930_v2, 1  ;;  %v5904_v2 = vld [vmem:[#allocation5_spill] sm:$0xff] }
 0x130   : > { %v958_v41 = vmax.f32 %v826_v22, 0.0  ;;  %v3477_v48 = vpop.f32.mrb[36].mxu0  ;;  %v1378_v36 = vmul.f32 %v3985_v29, %v4440_v40  ;;  %v4449_v9 = vmul.f32 %v3987_v30, %v4440_v40  ;;  %v4453_v62 = vmul.f32 %v3992_v34, %v4440_v40 }
 0x131   : > { %v835_v45 = vpop.f32.mrb[37].mxu0  ;;  %v4457_v44 = vmul.f32 %v3995_v38, %v4440_v40  ;;  %v4460_v1 = vmul.f32 %v3948_v4, %v959_v0  ;;  %v841_v14 = vadd.f32 %v3477_v48, %v3969_v15 }
 0x132   : > { %5889 = vst [vmem:[#allocation67_spill] sm:$0xff] %v4449_v9  ;;  %v836_v59 = vadd.f32 %v3969_v15, %v835_v45  ;;  %v1496_v17 = vrot.slane %v1378_v36, 1  ;;  %v4467_v47 = vmul.f32 %v5890_v32, %v958_v41  ;;  %v5895_v41 = vrot.slane %v4424_v31, 1  ;;  %v5897_v9 = vld [vmem:[#allocation3_spill] sm:$0xff] }
 0x133   : > { %v4471_v33 = vmul.f32 %v3985_v29, %v4460_v1  ;;  %v4475_v4 = vmul.f32 %v3987_v30, %v4460_v1  ;;  %v4479_v48 = vmul.f32 %v3992_v34, %v4460_v1  ;;  %v4483_v36 = vmul.f32 %v3995_v38, %v4460_v1 }
 0x134   : > { %v3480_v0 = vpop.f32.mrb[38].mxu0  ;;  %v4488_v45 = vsel %vm1442_vm2, %v5895_v41, %v1496_v17  ;;  %v961_v32 = vmax.f32 %v841_v14, 0.0  ;;  %v960_v35 = vmax.f32 %v836_v59, 0.0  ;;  %v5899_v59 = vld [vmem:[#allocation4_spill] sm:$0xff] }
 0x135   : > { %5891 = vst [vmem:[#allocation2_spill] sm:$0xff] %v4471_v33  ;;  %5892 = vst [vmem:[#allocation68_spill] sm:$0xff] %v4475_v4  ;;  %v851_v22 = vadd.f32 %v3480_v0, %v3969_v15  ;;  %v845_v52 = vpop.f32.mrb[39].mxu0 }
 0x136   : > { %5893 = vst [vmem:[#allocation69_spill] sm:$0xff] %v4479_v48  ;;  %5894 = vst [vmem:[#allocation70_spill] sm:$0xff] %v4483_v36  ;;  %v4497_v31 = vmul.f32 %v5897_v9, %v961_v32  ;;  %v846_v14 = vadd.f32 %v3969_v15, %v845_v52  ;;  %v4501_v41 = vmul.f32 %v5899_v59, %v960_v35  ;;  %v5902_v32 = vld [vmem:[#allocation7_spill] sm:$0xff]  ;;  %v2557_v48 = vrot.slane %v4350_v27, 1 }
 0x137   : > { %5896 = vst [vmem:[#allocation71_spill] sm:$0xff] %v4488_v45  ;;  %v963_v17 = vmax.f32 %v851_v22, 0.0  ;;  %v1885_v45 = vadd.f32 %v1853_v60, %v1817_v11  ;;  %v1884_v22 = vadd.f32 %v4395_v3, %v1816_v53  ;;  %v2044_v11 = vsel %vm1442_vm2, %v2041_v24, %v2043_v63 }
 0x138   : > { %5898 = vst [vmem:[#allocation3_spill] sm:$0xff] %v4497_v31  ;;  %5900 = vst [vmem:[#allocation4_spill] sm:$0xff] %v4501_v41  ;;  %v3483_v0 = vpop.f32.mrb[40].mxu0  ;;  %v962_v33 = vmax.f32 %v846_v14, 0.0  ;;  %v4506_v61 = vmul.f32 %v3985_v29, %v4497_v31  ;;  %v2172_v60 = vmul.f32 %v3995_v38, %v4353_v50  ;;  %v2173_v53 = vmul.f32 %v3995_v38, %v4399_v37  ;;  %v5919_v31 = vld [vmem:[#allocation14_spill] sm:$0xff] }
 0x139   : > { %v861_v7 = vadd.f32 %v3483_v0, %v3969_v15  ;;  %v855_v9 = vpop.f32.mrb[41].mxu0  ;;  %v4511_v52 = vmul.f32 %v5902_v32, %v963_v17  ;;  %v2128_v0 = vadd.f32 %v2042_v57, %v1884_v22  ;;  %v2129_v3 = vadd.f32 %v2044_v11, %v1885_v45  ;;  %v5909_v45 = vld [vmem:[#allocation9_spill] sm:$0xff] }
 0x13a   : > { %5901 = vst [vmem:[#allocation72_spill] sm:$0xff] %v4506_v61  ;;  %v856_v35 = vadd.f32 %v3969_v15, %v855_v9  ;;  %v4518_v54 = vmul.f32 %v5904_v2, %v962_v33  ;;  %v2174_v17 = vmul.f32 %v3995_v38, %v4389_v20  ;;  %v5911_v20 = vld [vmem:[#allocation6_spill] sm:$0xff]  ;;  %v2285_v2 = vrot.slane %v2173_v53, 2 }
 0x13b   : > { %5903 = vst [vmem:[#allocation7_spill] sm:$0xff] %v4511_v52  ;;  %v965_v59 = vmax.f32 %v861_v7, 0.0  ;;  %v2408_v53 = vmul.f32 %v4000_v42, %v4419_v6 }
 0x13c   : > { %5905 = vst [vmem:[#allocation5_spill] sm:$0xff] %v4518_v54  ;;  %v964_v16 = vmax.f32 %v856_v35, 0.0  ;;  %v3486_v4 = vpop.f32.mrb[42].mxu0  ;;  %v1384_v63 = vmul.f32 %v3985_v29, %v4518_v54  ;;  %v4529_v24 = vmul.f32 %v3987_v30, %v4518_v54  ;;  %v4533_v7 = vmul.f32 %v3992_v34, %v4518_v54 }
 0x13d   : > { %v4537_v57 = vmul.f32 %v3995_v38, %v4518_v54  ;;  %v865_v33 = vpop.f32.mrb[43].mxu0  ;;  %v4540_v9 = vmul.f32 %v5909_v45, %v965_v59  ;;  %v871_v22 = vadd.f32 %v3486_v4, %v3969_v15  ;;  %v2284_v35 = vrot.slane %v2172_v60, 2 }
 0x13e   : > { %5906 = vst [vmem:[#allocation73_spill] sm:$0xff] %v4529_v24  ;;  %5907 = vst [vmem:[#allocation74_spill] sm:$0xff] %v4533_v7  ;;  %v4544_v32 = vadd.f32 %v3969_v15, %v865_v33  ;;  %v1506_v11 = vrot.slane %v1384_v63, 1  ;;  %v4549_v52 = vmul.f32 %v5911_v20, %v964_v16  ;;  %v5917_v16 = vrot.slane %v4506_v61, 1 }
 0x13f   : > { %5908 = vst [vmem:[#allocation75_spill] sm:$0xff] %v4537_v57  ;;  %5910 = vst [vmem:[#allocation9_spill] sm:$0xff] %v4540_v9  ;;  %v4553_v36 = vmul.f32 %v3985_v29, %v4540_v9  ;;  %v4557_v59 = vmul.f32 %v3987_v30, %v4540_v9  ;;  %v4561_v4 = vmul.f32 %v3992_v34, %v4540_v9  ;;  %v967_v45 = vmax.f32 %v871_v22, 0.0 }
 0x140   : > { %5912 = vst [vmem:[#allocation6_spill] sm:$0xff] %v4549_v52  ;;  %v4565_v60 = vmul.f32 %v3995_v38, %v4540_v9  ;;  %v3489_v63 = vpop.f32.mrb[44].mxu0  ;;  %v4570_v20 = vsel %vm1442_vm2, %v5917_v16, %v1506_v11  ;;  %v966_v9 = vmax.f32 %v4544_v32, 0.0  ;;  %v2286_v11 = vsel %vm1687_vm3, %v2284_v35, %v2285_v2 }
 0x141   : > { %5913 = vst [vmem:[#allocation76_spill] sm:$0xff] %v4553_v36  ;;  %5914 = vst [vmem:[#allocation77_spill] sm:$0xff] %v4557_v59  ;;  %v875_v14 = vpop.f32.mrb[45].mxu0  ;;  %v4579_v61 = vmul.f32 %v5919_v31, %v967_v45  ;;  %v2287_v16 = vrot.slane %v2174_v17, 2  ;;  %v2372_v33 = vadd.f32 %v2286_v11, %v2128_v0  ;;  %v2409_v22 = vmul.f32 %v4000_v42, %v4416_v8  ;;  %v5920_v0 = vld [vmem:[#allocation8_spill] sm:$0xff] }
 0x142   : > { %5915 = vst [vmem:[#allocation78_spill] sm:$0xff] %v4561_v4  ;;  %5916 = vst [vmem:[#allocation79_spill] sm:$0xff] %v4565_v60  ;;  %v2484_v52 = vmul.f32 %v4002_v43, %v4419_v6  ;;  %v2485_v31 = vmul.f32 %v4002_v43, %v4416_v8  ;;  %v2486_v17 = vmul.f32 %v4002_v43, %v4440_v40  ;;  %v2556_v57 = vrot.slane %v4296_v46, 1 }
 0x143   : > { %5918 = vst [vmem:[#allocation80_spill] sm:$0xff] %v4570_v20  ;;  %v2288_v32 = vsel %vm1687_vm3, %v2285_v2, %v2287_v16  ;;  %v2728_v35 = vmul.f32 %v5920_v0, %v4419_v6  ;;  %v2440_v54 = vadd.f32 %v2408_v53, %v2372_v33  ;;  %v2729_v59 = vmul.f32 %v5920_v0, %v4416_v8 }
 0x144   : > { %v4588_v24 = vpop.f32.mrb[46].mxu0  ;;  %v2373_v11 = vadd.f32 %v2288_v32, %v2129_v3  ;;  %v2596_v7 = vrot.slane %v2484_v52, 1  ;;  %v2597_v36 = vrot.slane %v2485_v31, 1  ;;  %v2599_v60 = vrot.slane %v2486_v17, 1 }
 0x145   : > { %v4597_v45 = vpop.f32.mrb[47].mxu0  ;;  %v2730_v2 = vmul.f32 %v5920_v0, %v4440_v40  ;;  %v2840_v16 = vrot.slane %v2728_v35, 2  ;;  %v2841_v20 = vrot.slane %v2729_v59, 2  ;;  %v2559_v53 = vrot.slane %v4358_v25, 1 }
 0x146   : > { %v2441_v4 = vadd.f32 %v2409_v22, %v2373_v11  ;;  %v2598_v3 = vsel %vm1442_vm2, %v2596_v7, %v2597_v36  ;;  %v2600_v52 = vsel %vm1442_vm2, %v2597_v36, %v2599_v60  ;;  %v2558_v59 = vsel %vm1442_vm2, %v2556_v57, %v2557_v48  ;;  %v4627_v57 = vld [vmem:[%s5712_s5] ss:$0 sm:$0xff] }
 0x147   : > { %v2843_v33 = vrot.slane %v2730_v2, 2  ;;  %v2684_v31 = vadd.f32 %v2598_v3, %v2440_v54  ;;  %v2842_v22 = vsel %vm1687_vm3, %v2840_v16, %v2841_v20  ;;  %v2560_v27 = vsel %vm1442_vm2, %v2557_v48, %v2559_v53 }
 0x148   : > { %v4605_v41 = vpop.f32.mrb[48].mxu0  ;;  %v2685_v40 = vadd.f32 %v2600_v52, %v2441_v4  ;;  %v2668_v17 = vadd.f32 %v2558_v59, %v4344_v18  ;;  %v2704_v36 = vmul.f32 %v5920_v0, %v4099_v51  ;;  %v2669_v25 = vadd.f32 %v2560_v27, %v4346_v55  ;;  %v5922_v52 = vld [vmem:[#allocation15_spill] sm:$0xff]  ;;  %v5925_v27 = vld [vmem:[#allocation20_spill] sm:$0xff] }
 0x149   : > { %v4610_v32 = vpop.f32.mrb[49].mxu0  ;;  %v2844_v46 = vsel %vm1687_vm3, %v2841_v20, %v2843_v33  ;;  %v2928_v7 = vadd.f32 %v2842_v22, %v2684_v31  ;;  %v2705_v54 = vmul.f32 %v5920_v0, %v4084_v19  ;;  %v2706_v18 = vmul.f32 %v5920_v0, %v4111_v10 }
 0x14a   : > { %v2929_v60 = vadd.f32 %v2844_v46, %v2685_v40  ;;  %v2800_v48 = vrot.slane %v2704_v36, 2  ;;  %v881_v20 = vadd.f32 %v3489_v63, %v3969_v15  ;;  %v876_v35 = vadd.f32 %v3969_v15, %v875_v14 }
 0x14b   : > { %v2966_v55 = vadd.f32 %v4627_v57, %v2928_v7  ;;  %v2801_v16 = vrot.slane %v2705_v54, 2  ;;  %v4639_v3 = vmul.f32 %v3985_v29, %v4579_v61  ;;  %v4642_v33 = vmul.f32 %v5922_v52, %v966_v9 }
 0x14c   : > { %v4622_v4 = vpop.f32.mrb[50].mxu0  ;;  %v2967_v2 = vadd.f32 %v4627_v57, %v2929_v60  ;;  %v2803_v15 = vrot.slane %v2706_v18, 2  ;;  %v969_v14 = vmax.f32 %v881_v20, 0.0  ;;  %v968_v63 = vmax.f32 %v876_v35, 0.0 }
 0x14d   : > { %v4633_v11 = vpop.f32.mrb[51].mxu0  ;;  %5921 = vst [vmem:[#allocation14_spill] sm:$0xff] %v4639_v3  ;;  %v2802_v31 = vsel %vm1687_vm3, %v2800_v48, %v2801_v16  ;;  %v1328_v22 = vmul.f32 %v3983_v28, %v4353_v50  ;;  %v1329_v7 = vmul.f32 %v3983_v28, %v4399_v37  ;;  %v1373_v18 = vmul.f32 %v3985_v29, %v4353_v50 }
 0x14e   : > { %v3502_v53 = vpack.c.bf16 %v2967_v2, %v2966_v55  ;;  %v2804_v9 = vsel %vm1687_vm3, %v2801_v16, %v2803_v15  ;;  %v2912_v46 = vadd.f32 %v2802_v31, %v2668_v17  ;;  %v4658_v36 = vmul.f32 %v5925_v27, %v968_v63 }
 0x14f   : > { %v2913_v54 = vadd.f32 %v2804_v9, %v2669_v25  ;;  %v1374_v48 = vmul.f32 %v3985_v29, %v4399_v37  ;;  %v1618_v17 = vmul.f32 %v3987_v30, %v4353_v50  ;;  %v1488_v52 = vrot.slane %v1373_v18, 1 }
 0x150   : > { %v4654_v59 = vpop.f32.mrb[52].mxu0  ;;  %3504 = vmatprep.subr.msk.bf16.mxu1 %vm4646_vm4, %v3502_v53  ;;  %v2950_v20 = vadd.f32 %v4627_v57, %v2912_v46  ;;  %v1390_v35 = vmul.f32 %v3985_v29, %v4658_v36  ;;  %v4677_v55 = vmul.f32 %v3987_v30, %v4658_v36  ;;  %v4681_v25 = vmul.f32 %v3992_v34, %v4658_v36 }
 0x151   : > { %v4662_v60 = vpop.f32.mrb[53].mxu0  ;;  %v2951_v2 = vadd.f32 %v4627_v57, %v2913_v54  ;;  %v4686_v16 = vmul.f32 %v3995_v38, %v4658_v36  ;;  %v1489_v15 = vrot.slane %v1374_v48, 1  ;;  %v4689_v63 = vmul.f32 %v4206_v5, %v969_v14 }
 0x152   : > { %5926 = vst [vmem:[#allocation8_spill] sm:$0xff] %v4677_v55  ;;  %5927 = vst [vmem:[#allocation15_spill] sm:$0xff] %v4681_v25  ;;  %v1516_v53 = vrot.slane %v1390_v35, 1  ;;  %v1619_v9 = vmul.f32 %v3987_v30, %v4399_v37  ;;  %v5930_v40 = vrot.slane %v4403_v49, 1  ;;  %v5931_v18 = vrot.slane %v4639_v3, 1  ;;  %v5940_v25 = vld [vmem:[#allocation11_spill] sm:$0xff] }
 0x153   : > { %5928 = vst [vmem:[#allocation20_spill] sm:$0xff] %v4686_v16  ;;  %5929 = vst [vmem:[#allocation81_spill] sm:$0xff] %v4689_v63  ;;  %v3505_v46 = vpack.c.bf16 %v2951_v2, %v2950_v20  ;;  %v1490_v54 = vsel %vm1442_vm2, %v1488_v52, %v1489_v15  ;;  %v1733_v20 = vrot.slane %v1618_v17, 2  ;;  %v1854_v52 = vmul.f32 %v3997_v39, %v4419_v6 }
 0x154   : > { %v1492_v50 = vsel %vm1442_vm2, %v1489_v15, %v5930_v40  ;;  %v4702_v5 = vsel %vm1442_vm2, %v5931_v18, %v1516_v53  ;;  %v1573_v48 = vadd.f32 %v1490_v54, %v1328_v22  ;;  %v1734_v2 = vrot.slane %v1619_v9, 2 }
 0x155   : > { %5932 = vst [vmem:[#allocation82_spill] sm:$0xff] %v4702_v5  ;;  %v1574_v35 = vadd.f32 %v1492_v50, %v1329_v7  ;;  %3507 = vmatpush3.bf16.xpose.msk.msra.mxu1 %vm4646_vm4, %v3505_v46  ;;  %v1931_v49 = vmul.f32 %v3992_v34, %v4419_v6  ;;  %v1855_v40 = vmul.f32 %v3997_v39, %v4416_v8  ;;  %v5933_v17 = vrot.slane %v4407_v56, 2  ;;  %v5938_v5 = vld [vmem:[#allocation13_spill] sm:$0xff] }
 0x156   : > { %v1932_v15 = vmul.f32 %v3992_v34, %v4416_v8  ;;  %v2175_v50 = vmul.f32 %v3995_v38, %v4419_v6  ;;  %v2176_v22 = vmul.f32 %v3995_v38, %v4416_v8  ;;  %v1735_v7 = vsel %vm1687_vm3, %v1733_v20, %v1734_v2 }
 0x157   : > { %v1737_v53 = vsel %vm1687_vm3, %v1734_v2, %v5933_v17  ;;  %v2045_v9 = vrot.slane %v1931_v49, 1  ;;  %v2410_v46 = vmul.f32 %v4000_v42, %v4434_v12  ;;  %v1818_v54 = vadd.f32 %v1735_v7, %v1573_v48 }
 0x158   : > { %v1819_v18 = vadd.f32 %v1737_v53, %v1574_v35  ;;  %v2046_v31 = vrot.slane %v1932_v15, 1  ;;  %v2289_v14 = vrot.slane %v2175_v50, 2  ;;  %v2290_v27 = vrot.slane %v2176_v22, 2 }
 0x159   : > { %v2487_v37 = vmul.f32 %v4002_v43, %v4434_v12  ;;  %v2488_v55 = vmul.f32 %v4002_v43, %v4467_v47  ;;  %v2489_v56 = vmul.f32 %v4002_v43, %v4460_v1  ;;  %v1886_v20 = vadd.f32 %v1854_v52, %v1818_v54 }
 0x15a   : > { %v1887_v2 = vadd.f32 %v1855_v40, %v1819_v18  ;;  %v2047_v49 = vsel %vm1442_vm2, %v2045_v9, %v2046_v31  ;;  %v5934_v17 = vrot.slane %v4453_v62, 1  ;;  %v2291_v35 = vsel %vm1687_vm3, %v2289_v14, %v2290_v27 }
 0x15b   : > { %v5935_v15 = vrot.slane %v4457_v44, 2  ;;  %v2411_v22 = vmul.f32 %v4000_v42, %v4467_v47  ;;  %v2602_v7 = vrot.slane %v2488_v55, 1  ;;  %v2130_v53 = vadd.f32 %v2047_v49, %v1886_v20  ;;  %v4750_v44 = vld [vmem:[%s5710_s3] ss:$0 sm:$0xff] }
 0x15c   : > { %v2049_v48 = vsel %vm1442_vm2, %v2046_v31, %v5934_v17  ;;  %v2601_v52 = vrot.slane %v2487_v37, 1  ;;  %v2731_v40 = vmul.f32 %v5920_v0, %v4434_v12  ;;  %v2604_v9 = vrot.slane %v2489_v56, 1  ;;  %v5936_v17 = vld [vmem:[#allocation10_spill] sm:$0xff] }
 0x15d   : > { %v2293_v50 = vsel %vm1687_vm3, %v2290_v27, %v5935_v15  ;;  %v2131_v3 = vadd.f32 %v2049_v48, %v1887_v2  ;;  %v2732_v62 = vmul.f32 %v5920_v0, %v4467_v47  ;;  %v2733_v31 = vmul.f32 %v5920_v0, %v4460_v1  ;;  %v5937_v48 = vld [vmem:[#allocation16_spill] sm:$0xff] }
 0x15e   : > { %v891_v55 = vadd.f32 %v4750_v44, %v4588_v24  ;;  %v2374_v27 = vadd.f32 %v2291_v35, %v2130_v53  ;;  %v2603_v14 = vsel %vm1442_vm2, %v2601_v52, %v2602_v7  ;;  %v2845_v54 = vrot.slane %v2731_v40, 2 }
 0x15f   : > { %v2375_v37 = vadd.f32 %v2293_v50, %v2131_v3  ;;  %v2846_v18 = vrot.slane %v2732_v62, 2  ;;  %v2848_v56 = vrot.slane %v2733_v31, 2  ;;  %v886_v2 = vadd.f32 %v4750_v44, %v4597_v45 }
 0x160   : > { %v971_v20 = vmax.f32 %v891_v55, 0.0  ;;  %v2442_v1 = vadd.f32 %v2410_v46, %v2374_v27  ;;  %v1557_v15 = vadd.f32 %v5937_v48, %v5936_v17  ;;  %v5939_v16 = vrot.slane %v5938_v5, 2 }
 0x161   : > { %v2443_v49 = vadd.f32 %v2411_v22, %v2375_v37  ;;  %v5941_v24 = vrot.slane %v5940_v25, 2  ;;  %v2605_v35 = vsel %vm1442_vm2, %v2602_v7, %v2604_v9  ;;  %v2847_v50 = vsel %vm1687_vm3, %v2845_v54, %v2846_v18  ;;  %v5943_v22 = vld [vmem:[#allocation12_spill] sm:$0xff]  ;;  %v5948_v37 = vld [vmem:[#allocation17_spill] sm:$0xff] }
 0x162   : > { %v4767_v53 = vmul.f32 %v4254_v26, %v971_v20  ;;  %v970_v52 = vmax.f32 %v886_v2, 0.0  ;;  %v2686_v45 = vadd.f32 %v2603_v14, %v2442_v1  ;;  %v5944_v40 = vrot.slane %v5943_v22, 2 }
 0x163   : > { %v1695_v3 = vsel %vm1687_vm3, %v5941_v24, %v5939_v16  ;;  %v2687_v46 = vadd.f32 %v2605_v35, %v2443_v49  ;;  %v5945_v62 = vmov %v5939_v16  ;;  %v2849_v25 = vsel %vm1687_vm3, %v2846_v18, %v2848_v56  ;;  %v5972_v18 = vld [vmem:[#allocation22_spill] sm:$0xff] }
 0x164   : > { %5942 = vst [vmem:[#allocation10_spill] sm:$0xff] %v4767_v53  ;;  %v1697_v31 = vsel %vm1687_vm3, %v5945_v62, %v5944_v40  ;;  %v1802_v55 = vadd.f32 %v1695_v3, %v1557_v15  ;;  %v4777_v16 = vmul.f32 %v3985_v29, %v4767_v53  ;;  %v4781_v26 = vmul.f32 %v3987_v30, %v4767_v53  ;;  %v5949_v62 = vld [vmem:[#allocation19_spill] sm:$0xff] }
 0x165   : > { %v4785_v7 = vmul.f32 %v3992_v34, %v4767_v53  ;;  %v2930_v9 = vadd.f32 %v2847_v50, %v2686_v45  ;;  %v2931_v27 = vadd.f32 %v2849_v25, %v2687_v46  ;;  %v4789_v5 = vmul.f32 %v3995_v38, %v4767_v53 }
 0x166   : > { %v1803_v14 = vadd.f32 %v1697_v31, %v5948_v37  ;;  %v4796_v20 = vmul.f32 %v4196_v23, %v970_v52  ;;  %v1838_v49 = vmul.f32 %v3997_v39, %v4099_v51  ;;  %v1839_v17 = vmul.f32 %v3997_v39, %v4084_v19 }
 0x167   : > { %5946 = vst [vmem:[#allocation16_spill] sm:$0xff] %v4785_v7  ;;  %5947 = vst [vmem:[#allocation13_spill] sm:$0xff] %v4789_v5  ;;  %v2968_v2 = vadd.f32 %v4627_v57, %v2930_v9  ;;  %v2969_v1 = vadd.f32 %v4627_v57, %v2931_v27  ;;  %v1907_v48 = vmul.f32 %v3992_v34, %v4099_v51  ;;  %v5950_v27 = vld [vmem:[#allocation21_spill] sm:$0xff] }
 0x168   : > { %v1908_v15 = vmul.f32 %v3992_v34, %v4084_v19  ;;  %v2151_v23 = vmul.f32 %v3995_v38, %v4099_v51  ;;  %v2152_v24 = vmul.f32 %v3995_v38, %v4084_v19  ;;  %v1870_v50 = vadd.f32 %v1838_v49, %v1802_v55  ;;  %v5977_v5 = vld [vmem:[#allocation25_spill] sm:$0xff] }
 0x169   : > { %v3508_v3 = vpack.c.bf16 %v2969_v1, %v2968_v2  ;;  %v1871_v52 = vadd.f32 %v1839_v17, %v1803_v14  ;;  %v2005_v45 = vrot.slane %v1907_v48, 1  ;;  %v2394_v31 = vmul.f32 %v4000_v42, %v5949_v62 }
 0x16a   : > { %v2006_v46 = vrot.slane %v1908_v15, 1  ;;  %v2249_v22 = vrot.slane %v2151_v23, 2  ;;  %v2250_v40 = vrot.slane %v2152_v24, 2  ;;  %v2463_v25 = vmul.f32 %v4002_v43, %v5949_v62 }
 0x16b   : > { %3510 = vmatprep.subr.msk.bf16.mxu1 %vm4646_vm4, %v3508_v3  ;;  %v2464_v9 = vmul.f32 %v4002_v43, %v4156_v58  ;;  %v2465_v55 = vmul.f32 %v4002_v43, %v5950_v27  ;;  %v5951_v14 = vrot.slane %v4131_v13, 1  ;;  %v5952_v49 = vrot.slane %v4135_v21, 2 }
 0x16c   : > { %v2007_v37 = vsel %vm1442_vm2, %v2005_v45, %v2006_v46  ;;  %v2251_v1 = vsel %vm1687_vm3, %v2249_v22, %v2250_v40  ;;  %v2561_v23 = vrot.slane %v2463_v25, 1  ;;  %v2707_v35 = vmul.f32 %v5920_v0, %v5949_v62 }
 0x16d   : > { %v2009_v2 = vsel %vm1442_vm2, %v2006_v46, %v5951_v14  ;;  %v2253_v17 = vsel %vm1687_vm3, %v2250_v40, %v5952_v49  ;;  %v2114_v48 = vadd.f32 %v2007_v37, %v1870_v50  ;;  %v2562_v24 = vrot.slane %v2464_v9, 1 }
 0x16e   : > { %v2115_v15 = vadd.f32 %v2009_v2, %v1871_v52  ;;  %v2564_v3 = vrot.slane %v2465_v55, 1  ;;  %v2708_v45 = vmul.f32 %v5920_v0, %v4156_v58  ;;  %v2709_v13 = vmul.f32 %v5920_v0, %v5950_v27 }
 0x16f   : > { %v2358_v46 = vadd.f32 %v2251_v1, %v2114_v48  ;;  %v2395_v21 = vmul.f32 %v4000_v42, %v4156_v58  ;;  %v901_v50 = vadd.f32 %v4750_v44, %v4605_v41  ;;  %v2563_v52 = vsel %vm1442_vm2, %v2561_v23, %v2562_v24  ;;  %v1226_v23 = vpop.permute.xlu1 %1225 }
 0x170   : > { %v2359_v22 = vadd.f32 %v2253_v17, %v2115_v15  ;;  %v2805_v40 = vrot.slane %v2707_v35, 2  ;;  %v2806_v25 = vrot.slane %v2708_v45, 2  ;;  %v2808_v9 = vrot.slane %v2709_v13, 2  ;;  %v1221_v15 = vpop.permute.xlu0 %1220  ;;  %v5953_v45 = vld [vmem:[#allocation71_spill] sm:$0xff] }
 0x171   : > { %v2426_v55 = vadd.f32 %v2394_v31, %v2358_v46  ;;  %v973_v14 = vmax.f32 %v901_v50, 0.0  ;;  %v896_v2 = vadd.f32 %v4750_v44, %v4610_v32  ;;  %v2565_v27 = vsel %vm1442_vm2, %v2562_v24, %v2564_v3 }
 0x172   : > { %v2427_v37 = vadd.f32 %v2395_v21, %v2359_v22  ;;  %v2807_v1 = vsel %vm1687_vm3, %v2805_v40, %v2806_v25  ;;  %v2809_v49 = vsel %vm1687_vm3, %v2806_v25, %v2808_v9  ;;  %v1331_v41 = vmul.f32 %v3983_v28, %v4416_v8 }
 0x173   : > { %v2670_v17 = vadd.f32 %v2563_v52, %v2426_v55  ;;  %v972_v35 = vmax.f32 %v896_v2, 0.0  ;;  %v1330_v31 = vmul.f32 %v3983_v28, %v4419_v6  ;;  %v1376_v32 = vmul.f32 %v3985_v29, %v4419_v6 }
 0x174   : > { %v2671_v48 = vadd.f32 %v2565_v27, %v2427_v37  ;;  %v1576_v24 = vadd.f32 %v5953_v45, %v1331_v41  ;;  %v1621_v3 = vmul.f32 %v3987_v30, %v4419_v6  ;;  %v1622_v13 = vmul.f32 %v3987_v30, %v4416_v8 }
 0x175   : > { %v2914_v46 = vadd.f32 %v2807_v1, %v2670_v17  ;;  %v4858_v21 = vmul.f32 %v1226_v23, %v973_v14  ;;  %v4860_v50 = vmul.f32 %v1221_v15, %v972_v35  ;;  %v1493_v52 = vrot.slane %v1376_v32, 1  ;;  %v5955_v14 = vld [vmem:[#allocation66_spill] sm:$0xff] }
 0x176   : > { %v2915_v22 = vadd.f32 %v2809_v49, %v2671_v48  ;;  %v1738_v40 = vrot.slane %v1621_v3, 2  ;;  %v1739_v25 = vrot.slane %v1622_v13, 2  ;;  %v1856_v9 = vmul.f32 %v3997_v39, %v4434_v12  ;;  %v5957_v49 = vld [vmem:[#allocation67_spill] sm:$0xff] }
 0x177   : > { %5954 = vst [vmem:[#allocation11_spill] sm:$0xff] %v4860_v50  ;;  %v2952_v55 = vadd.f32 %v4627_v57, %v2914_v46  ;;  %v1934_v6 = vmul.f32 %v3992_v34, %v4434_v12  ;;  %v1935_v8 = vmul.f32 %v3992_v34, %v4467_v47  ;;  %v5956_v2 = vrot.slane %v5955_v14, 1  ;;  %v5962_v14 = vld [vmem:[#allocation3_spill] sm:$0xff] }
 0x178   : > { %v2953_v37 = vadd.f32 %v4627_v57, %v2915_v22  ;;  %v1740_v1 = vsel %vm1687_vm3, %v1738_v40, %v1739_v25  ;;  %v5958_v41 = vrot.slane %v5957_v49, 2  ;;  %v2178_v48 = vmul.f32 %v3995_v38, %v4434_v12  ;;  %v5959_v40 = vld [vmem:[#allocation4_spill] sm:$0xff] }
 0x179   : > { %v1495_v27 = vsel %vm1442_vm2, %v1493_v52, %v5956_v2  ;;  %v1857_v32 = vmul.f32 %v3997_v39, %v4467_v47  ;;  %v2050_v45 = vrot.slane %v1934_v6, 1  ;;  %v2051_v3 = vrot.slane %v1935_v8, 1 }
 0x17a   : > { %v1742_v17 = vsel %vm1687_vm3, %v1739_v25, %v5958_v41  ;;  %v3511_v35 = vpack.c.bf16 %v2953_v37, %v2952_v55  ;;  %v1575_v15 = vadd.f32 %v1495_v27, %v1330_v31  ;;  %v2179_v13 = vmul.f32 %v3995_v38, %v4467_v47  ;;  %v5960_v55 = vld [vmem:[#allocation69_spill] sm:$0xff] }
 0x17b   : > { %v1821_v23 = vadd.f32 %v1742_v17, %v1576_v24  ;;  %v2294_v46 = vrot.slane %v2178_v48, 2  ;;  %v2412_v25 = vmul.f32 %v4000_v42, %v5959_v40  ;;  %v2490_v31 = vmul.f32 %v4002_v43, %v5959_v40  ;;  %v5963_v41 = vld [vmem:[#allocation5_spill] sm:$0xff]  ;;  %v5964_v48 = vld [vmem:[#allocation70_spill] sm:$0xff] }
 0x17c   : > { %3513 = vmatpush3.bf16.xpose.msk.msra.mxu1 %vm4646_vm4, %v3511_v35  ;;  %v1820_v22 = vadd.f32 %v1740_v1, %v1575_v15  ;;  %v2052_v24 = vsel %vm1442_vm2, %v2050_v45, %v2051_v3  ;;  %v5961_v37 = vrot.slane %v5960_v55, 1  ;;  %v2295_v8 = vrot.slane %v2179_v13, 2 }
 0x17d   : > { %v1889_v52 = vadd.f32 %v1857_v32, %v1821_v23  ;;  %v2491_v2 = vmul.f32 %v4002_v43, %v5962_v14  ;;  %v2413_v1 = vmul.f32 %v4000_v42, %v5962_v14  ;;  %v2492_v17 = vmul.f32 %v4002_v43, %v5963_v41 }
 0x17e   : > { %v2054_v6 = vsel %vm1442_vm2, %v2051_v3, %v5961_v37  ;;  %v1888_v27 = vadd.f32 %v1856_v9, %v1820_v22  ;;  %v5965_v35 = vrot.slane %v5964_v48, 2  ;;  %v2606_v23 = vrot.slane %v2490_v31, 1 }
 0x17f   : > { %v2133_v49 = vadd.f32 %v2054_v6, %v1889_v52  ;;  %v2607_v32 = vrot.slane %v2491_v2, 1  ;;  %v2734_v45 = vmul.f32 %v5920_v0, %v5959_v40  ;;  %v2609_v55 = vrot.slane %v2492_v17, 1 }
 0x180   : > { %v2298_v15 = vsel %vm1687_vm3, %v2295_v8, %v5965_v35  ;;  %v2132_v3 = vadd.f32 %v2052_v24, %v1888_v27  ;;  %v2735_v9 = vmul.f32 %v5920_v0, %v5962_v14  ;;  %v2296_v22 = vsel %vm1687_vm3, %v2294_v46, %v2295_v8 }
 0x181   : > { %v2377_v13 = vadd.f32 %v2298_v15, %v2133_v49  ;;  %v2736_v52 = vmul.f32 %v5920_v0, %v5963_v41  ;;  %v2850_v37 = vrot.slane %v2734_v45, 2  ;;  %v911_v6 = vadd.f32 %v4750_v44, %v4622_v4 }
 0x182   : > { %v2376_v31 = vadd.f32 %v2296_v22, %v2132_v3  ;;  %v2610_v48 = vsel %vm1442_vm2, %v2607_v32, %v2609_v55  ;;  %v2851_v35 = vrot.slane %v2735_v9, 2  ;;  %v2608_v24 = vsel %vm1442_vm2, %v2606_v23, %v2607_v32  ;;  %v1236_v32 = vpop.permute.xlu1 %1235 }
 0x183   : > { %v2445_v2 = vadd.f32 %v2413_v1, %v2377_v13  ;;  %v2853_v27 = vrot.slane %v2736_v52, 2  ;;  %v975_v49 = vmax.f32 %v911_v6, 0.0  ;;  %v1391_v17 = vmul.f32 %v3985_v29, %v4689_v63 }
 0x184   : > { %v2444_v46 = vadd.f32 %v2412_v25, %v2376_v31  ;;  %v1340_v41 = vmul.f32 %v3983_v28, %v4689_v63  ;;  %v4919_v4 = vmul.f32 %v3985_v29, %v4796_v20  ;;  %v2852_v1 = vsel %vm1687_vm3, %v2850_v37, %v2851_v35 }
 0x185   : > { %v2689_v8 = vadd.f32 %v2610_v48, %v2445_v2  ;;  %v2854_v15 = vsel %vm1687_vm3, %v2851_v35, %v2853_v27  ;;  %v1518_v45 = vrot.slane %v1391_v17, 1  ;;  %v1636_v23 = vmul.f32 %v3987_v30, %v4689_v63 }
 0x186   : > { %v2688_v3 = vadd.f32 %v2608_v24, %v2444_v46  ;;  %v5809_v25 = vrot.slane %v4919_v4, 1  ;;  %v4928_v55 = vmul.f32 %v3987_v30, %v4796_v20  ;;  %v1299_v9 = vmul.f32 %v1236_v32, %v975_v49 }
 0x187   : > { %v2933_v13 = vadd.f32 %v2854_v15, %v2689_v8  ;;  %v1763_v22 = vrot.slane %v1636_v23, 2  ;;  %v1949_v52 = vmul.f32 %v3992_v34, %v4860_v50  ;;  %v4934_v37 = vmul.f32 %v3992_v34, %v4858_v21 }
 0x188   : > { %v2932_v6 = vadd.f32 %v2852_v1, %v2688_v3  ;;  %v1520_v2 = vsel %vm1442_vm2, %v1518_v45, %v5809_v25  ;;  %v5808_v48 = vrot.slane %v4928_v55, 2  ;;  %v2193_v49 = vmul.f32 %v3995_v38, %v4860_v50 }
 0x189   : > { %v2971_v31 = vadd.f32 %v4627_v57, %v2933_v13  ;;  %v1585_v35 = vadd.f32 %v1520_v2, %v1340_v41  ;;  %v2075_v24 = vrot.slane %v1949_v52, 1  ;;  %v5807_v27 = vrot.slane %v4934_v37, 1 }
 0x18a   : > { %v2970_v17 = vadd.f32 %v4627_v57, %v2932_v6  ;;  %v1765_v46 = vsel %vm1687_vm3, %v1763_v22, %v5808_v48  ;;  %v1866_v8 = vmul.f32 %v3997_v39, %v4860_v50  ;;  %v4952_v1 = vmul.f32 %v3995_v38, %v4858_v21 }
 0x18b   : > { %v1830_v41 = vadd.f32 %v1765_v46, %v1585_v35  ;;  %v2077_v15 = vsel %vm1442_vm2, %v2075_v24, %v5807_v27  ;;  %v2319_v45 = vrot.slane %v2193_v49, 2  ;;  %v4958_v23 = vmul.f32 %v4002_v43, %v1299_v9  ;;  %v5975_v46 = vld [vmem:[#allocation28_spill] sm:$0xff] }
 0x18c   : > { %v3514_v32 = vpack.c.bf16 %v2971_v31, %v2970_v17  ;;  %v5806_v3 = vrot.slane %v4952_v1, 2  ;;  %v4962_v13 = vmul.f32 %v5920_v0, %v1299_v9  ;;  %v906_v22 = vadd.f32 %v4750_v44, %v4633_v11 }
 0x18d   : > { %v1898_v52 = vadd.f32 %v1866_v8, %v1830_v41  ;;  %v2422_v6 = vmul.f32 %v4000_v42, %v1299_v9  ;;  %v1314_v35 = vmul.f32 %v3983_v28, %v4099_v51  ;;  %v1315_v49 = vmul.f32 %v3983_v28, %v4084_v19  ;;  %v1231_v9 = vpop.permute.xlu0 %1230 }
 0x18e   : > { %5966 = vst [vmem:[#allocation12_spill] sm:$0xff] %v4962_v13  ;;  %3516 = vmatprep.subr.msk.bf16.mxu1 %vm4646_vm4, %v3514_v32  ;;  %v2321_v31 = vsel %vm1687_vm3, %v2319_v45, %v5806_v3  ;;  %v974_v24 = vmax.f32 %v906_v22, 0.0  ;;  %v1352_v11 = vmul.f32 %v3985_v29, %v4099_v51  ;;  %v1597_v8 = vmul.f32 %v3987_v30, %v4099_v51  ;;  %v5967_v45 = vld [vmem:[#allocation27_spill] sm:$0xff] }
 0x18f   : > { %v2142_v17 = vadd.f32 %v2077_v15, %v1898_v52  ;;  %v1598_v41 = vmul.f32 %v3987_v30, %v4084_v19  ;;  %v1560_v22 = vadd.f32 %v5967_v45, %v1315_v49  ;;  %v1840_v2 = vmul.f32 %v3997_v39, %v5949_v62 }
 0x190   : > { %v1298_v32 = vmul.f32 %v1231_v9, %v974_v24  ;;  %v1453_v56 = vrot.slane %v1352_v11, 1  ;;  %v1698_v27 = vrot.slane %v1597_v8, 2  ;;  %v1910_v15 = vmul.f32 %v3992_v34, %v5949_v62  ;;  %v5970_v11 = vld [vmem:[#allocation18_spill] sm:$0xff] }
 0x191   : > { %v2386_v3 = vadd.f32 %v2321_v31, %v2142_v17  ;;  %v1699_v48 = vrot.slane %v1598_v41, 2  ;;  %v1841_v24 = vmul.f32 %v3997_v39, %v4156_v58  ;;  %v5971_v9 = vrot.slane %v5970_v11, 1 }
 0x192   : > { %v4990_v52 = vmul.f32 %v3992_v34, %v1298_v32  ;;  %v4993_v51 = vmul.f32 %v3995_v38, %v1298_v32  ;;  %v4996_v19 = vmul.f32 %v4002_v43, %v1298_v32  ;;  %v5003_v31 = vmul.f32 %v5920_v0, %v1298_v32 }
 0x193   : > { %v5000_v49 = vadd.f32 %v2422_v6, %v2386_v3  ;;  %v1455_v17 = vsel %vm1442_vm2, %v1453_v56, %v5971_v9  ;;  %v1700_v8 = vsel %vm1687_vm3, %v1698_v27, %v1699_v48  ;;  %v5973_v25 = vrot.slane %v5972_v18, 2  ;;  %v5974_v9 = vld [vmem:[#allocation29_spill] sm:$0xff] }
 0x194   : > { %5968 = vst [vmem:[#allocation17_spill] sm:$0xff] %v4996_v19  ;;  %v1559_v6 = vadd.f32 %v1455_v17, %v1314_v35  ;;  %v1911_v32 = vmul.f32 %v3992_v34, %v4156_v58  ;;  %v2010_v11 = vrot.slane %v1910_v15, 1  ;;  %v2154_v56 = vmul.f32 %v3995_v38, %v5949_v62 }
 0x195   : > { %5969 = vst [vmem:[#allocation19_spill] sm:$0xff] %v5000_v49  ;;  %v1702_v3 = vsel %vm1687_vm3, %v1699_v48, %v5973_v25  ;;  %v2155_v27 = vmul.f32 %v3995_v38, %v4156_v58  ;;  %v2396_v45 = vmul.f32 %v4000_v42, %v5974_v9  ;;  %v2397_v18 = vmul.f32 %v4000_v42, %v5975_v46 }
 0x196   : > { %v1805_v54 = vadd.f32 %v1702_v3, %v1560_v22  ;;  %v1804_v41 = vadd.f32 %v1700_v8, %v1559_v6  ;;  %v2011_v48 = vrot.slane %v1911_v32, 1  ;;  %v2466_v35 = vmul.f32 %v4002_v43, %v5974_v9  ;;  %v5976_v3 = vld [vmem:[#allocation31_spill] sm:$0xff]  ;;  %v5979_v32 = vld [vmem:[#allocation26_spill] sm:$0xff] }
 0x197   : > { %v2254_v22 = vrot.slane %v2154_v56, 2  ;;  %v2255_v15 = vrot.slane %v2155_v27, 2  ;;  %v2467_v17 = vmul.f32 %v4002_v43, %v5975_v46  ;;  %v2468_v13 = vmul.f32 %v4002_v43, %v5976_v3 }
 0x198   : > { %v1873_v25 = vadd.f32 %v1841_v24, %v1805_v54  ;;  %v1872_v49 = vadd.f32 %v1840_v2, %v1804_v41  ;;  %v2012_v19 = vsel %vm1442_vm2, %v2010_v11, %v2011_v48  ;;  %v5978_v50 = vrot.slane %v5977_v5, 1 }
 0x199   : > { %v2566_v54 = vrot.slane %v2466_v35, 1  ;;  %v2256_v6 = vsel %vm1687_vm3, %v2254_v22, %v2255_v15  ;;  %v5980_v56 = vrot.slane %v5979_v32, 2  ;;  %v2567_v7 = vrot.slane %v2467_v17, 1 }
 0x19a   : > { %v2014_v8 = vsel %vm1442_vm2, %v2011_v48, %v5978_v50  ;;  %v2116_v53 = vadd.f32 %v2012_v19, %v1872_v49  ;;  %v2569_v63 = vrot.slane %v2468_v13, 1  ;;  %v2710_v2 = vmul.f32 %v5920_v0, %v5974_v9 }
 0x19b   : > { %v2117_v24 = vadd.f32 %v2014_v8, %v1873_v25  ;;  %v2258_v27 = vsel %vm1687_vm3, %v2255_v15, %v5980_v56  ;;  %v2711_v41 = vmul.f32 %v5920_v0, %v5975_v46  ;;  %v2568_v50 = vsel %vm1442_vm2, %v2566_v54, %v2567_v7 }
 0x19c   : > { %v2712_v11 = vmul.f32 %v5920_v0, %v5976_v3  ;;  %v1332_v25 = vmul.f32 %v3983_v28, %v4434_v12  ;;  %v2360_v48 = vadd.f32 %v2256_v6, %v2116_v53  ;;  %v2570_v35 = vsel %vm1442_vm2, %v2567_v7, %v2569_v63 }
 0x19d   : > { %v2361_v5 = vadd.f32 %v2258_v27, %v2117_v24  ;;  %v2810_v19 = vrot.slane %v2710_v2, 2  ;;  %v2811_v13 = vrot.slane %v2711_v41, 2  ;;  %v1333_v15 = vmul.f32 %v3983_v28, %v4467_v47 }
 0x19e   : > { %v2813_v22 = vrot.slane %v2712_v11, 2  ;;  %v1379_v17 = vmul.f32 %v3985_v29, %v4434_v12  ;;  %v2428_v8 = vadd.f32 %v2396_v45, %v2360_v48  ;;  %v1380_v3 = vmul.f32 %v3985_v29, %v4467_v47  ;;  %v5981_v48 = vld [vmem:[#allocation2_spill] sm:$0xff] }
 0x19f   : > { %v2429_v49 = vadd.f32 %v2397_v18, %v2361_v5  ;;  %v2812_v54 = vsel %vm1687_vm3, %v2810_v19, %v2811_v13  ;;  %v1624_v53 = vmul.f32 %v3987_v30, %v4434_v12  ;;  %v1625_v24 = vmul.f32 %v3987_v30, %v4467_v47 }
 0x1a0   : > { %v2814_v7 = vsel %vm1687_vm3, %v2811_v13, %v2813_v22  ;;  %v1498_v18 = vrot.slane %v1379_v17, 1  ;;  %v2672_v6 = vadd.f32 %v2568_v50, %v2428_v8  ;;  %v1499_v32 = vrot.slane %v1380_v3, 1  ;;  %v5983_v8 = vld [vmem:[#allocation68_spill] sm:$0xff] }
 0x1a1   : > { %v2673_v63 = vadd.f32 %v2570_v35, %v2429_v49  ;;  %v1743_v56 = vrot.slane %v1624_v53, 2  ;;  %v1858_v45 = vmul.f32 %v3997_v39, %v5959_v40  ;;  %v1744_v2 = vrot.slane %v1625_v24, 2 }
 0x1a2   : > { %v1859_v41 = vmul.f32 %v3997_v39, %v5962_v14  ;;  %v1937_v12 = vmul.f32 %v3992_v34, %v5959_v40  ;;  %v2916_v5 = vadd.f32 %v2812_v54, %v2672_v6  ;;  %v1500_v11 = vsel %vm1442_vm2, %v1498_v18, %v1499_v32 }
 0x1a3   : > { %v2917_v27 = vadd.f32 %v2814_v7, %v2673_v63  ;;  %v5982_v35 = vrot.slane %v5981_v48, 1  ;;  %v1938_v50 = vmul.f32 %v3992_v34, %v5962_v14  ;;  %v1577_v13 = vadd.f32 %v1500_v11, %v1332_v25 }
 0x1a4   : > { %v1745_v22 = vsel %vm1687_vm3, %v1743_v56, %v1744_v2  ;;  %v2954_v17 = vadd.f32 %v4627_v57, %v2916_v5  ;;  %v5984_v3 = vrot.slane %v5983_v8, 2  ;;  %v2055_v53 = vrot.slane %v1937_v12, 1  ;;  %v5987_v5 = vld [vmem:[#allocation7_spill] sm:$0xff] }
 0x1a5   : > { %v1502_v47 = vsel %vm1442_vm2, %v1499_v32, %v5982_v35  ;;  %v2955_v19 = vadd.f32 %v4627_v57, %v2917_v27  ;;  %v2056_v63 = vrot.slane %v1938_v50, 1  ;;  %v1822_v7 = vadd.f32 %v1745_v22, %v1577_v13  ;;  %v5985_v32 = vld [vmem:[#allocation74_spill] sm:$0xff]  ;;  %v5990_v8 = vld [vmem:[#allocation75_spill] sm:$0xff] }
 0x1a6   : > { %v1578_v49 = vadd.f32 %v1502_v47, %v1333_v15  ;;  %v1747_v54 = vsel %vm1687_vm3, %v1744_v2, %v5984_v3  ;;  %v2181_v24 = vmul.f32 %v3995_v38, %v5959_v40  ;;  %v2182_v6 = vmul.f32 %v3995_v38, %v5962_v14  ;;  %v5988_v47 = vld [vmem:[#allocation6_spill] sm:$0xff] }
 0x1a7   : > { %v3517_v25 = vpack.c.bf16 %v2955_v19, %v2954_v17  ;;  %v2057_v15 = vsel %vm1442_vm2, %v2055_v53, %v2056_v63  ;;  %v5986_v56 = vrot.slane %v5985_v32, 1  ;;  %v2414_v2 = vmul.f32 %v4000_v42, %v5987_v5 }
 0x1a8   : > { %v1823_v18 = vadd.f32 %v1747_v54, %v1578_v49  ;;  %v1890_v12 = vadd.f32 %v1858_v45, %v1822_v7  ;;  %v2299_v48 = vrot.slane %v2181_v24, 2  ;;  %v2300_v35 = vrot.slane %v2182_v6, 2  ;;  %v5989_v49 = vld [vmem:[#allocation9_spill] sm:$0xff] }
 0x1a9   : > { %v2059_v27 = vsel %vm1442_vm2, %v2056_v63, %v5986_v56  ;;  %3519 = vmatpush3.bf16.xpose.msk.msra.mxu1 %vm4646_vm4, %v3517_v25  ;;  %v2415_v50 = vmul.f32 %v4000_v42, %v5988_v47  ;;  %v2493_v19 = vmul.f32 %v4002_v43, %v5987_v5  ;;  %v2494_v13 = vmul.f32 %v4002_v43, %v5988_v47 }
 0x1aa   : > { %v1891_v11 = vadd.f32 %v1859_v41, %v1823_v18  ;;  %v2495_v22 = vmul.f32 %v4002_v43, %v5989_v49  ;;  %v2134_v17 = vadd.f32 %v2057_v15, %v1890_v12  ;;  %v2301_v41 = vsel %vm1687_vm3, %v2299_v48, %v2300_v35 }
 0x1ab   : > { %v5991_v3 = vrot.slane %v5990_v8, 2  ;;  %v2611_v53 = vrot.slane %v2493_v19, 1  ;;  %v2612_v63 = vrot.slane %v2494_v13, 1  ;;  %v2737_v18 = vmul.f32 %v5920_v0, %v5987_v5  ;;  %v1246_v8 = vpop.permute.xlu1 %1245 }
 0x1ac   : > { %v2135_v45 = vadd.f32 %v2059_v27, %v1891_v11  ;;  %v2614_v7 = vrot.slane %v2495_v22, 1  ;;  %v2378_v24 = vadd.f32 %v2301_v41, %v2134_v17  ;;  %v2738_v25 = vmul.f32 %v5920_v0, %v5988_v47 }
 0x1ad   : > { %v2303_v54 = vsel %vm1687_vm3, %v2300_v35, %v5991_v3  ;;  %v2739_v15 = vmul.f32 %v5920_v0, %v5989_v49  ;;  %v2613_v32 = vsel %vm1442_vm2, %v2611_v53, %v2612_v63  ;;  %v2855_v27 = vrot.slane %v2737_v18, 2 }
 0x1ae   : > { %v2379_v6 = vadd.f32 %v2303_v54, %v2135_v45  ;;  %v2615_v56 = vsel %vm1442_vm2, %v2612_v63, %v2614_v7  ;;  %v921_v12 = vadd.f32 %v4750_v44, %v4654_v59  ;;  %v2446_v11 = vadd.f32 %v2414_v2, %v2378_v24  ;;  %v1241_v7 = vpop.permute.xlu0 %1240 }
 0x1af   : > { %v2856_v35 = vrot.slane %v2738_v25, 2  ;;  %v2858_v19 = vrot.slane %v2739_v15, 2  ;;  %v916_v22 = vadd.f32 %v4750_v44, %v4662_v60  ;;  %v1341_v17 = vmul.f32 %v3983_v28, %v4796_v20 }
 0x1b0   : > { %v2447_v48 = vadd.f32 %v2415_v50, %v2379_v6  ;;  %v977_v13 = vmax.f32 %v921_v12, 0.0  ;;  %v5992_v49 = vrot.slane %v4777_v16, 1  ;;  %v5993_v45 = vrot.slane %v4919_v4, 1 }
 0x1b1   : > { %v2690_v3 = vadd.f32 %v2613_v32, %v2446_v11  ;;  %v2857_v2 = vsel %vm1687_vm3, %v2855_v27, %v2856_v35  ;;  %v2859_v50 = vsel %vm1687_vm3, %v2856_v35, %v2858_v19  ;;  %v976_v53 = vmax.f32 %v916_v22, 0.0 }
 0x1b2   : > { %v1522_v41 = vsel %vm1442_vm2, %v5993_v45, %v5992_v49  ;;  %v2691_v59 = vadd.f32 %v2615_v56, %v2447_v48  ;;  %v1301_v54 = vmul.f32 %v1246_v8, %v977_v13  ;;  %v5994_v60 = vrot.slane %v4781_v26, 2 }
 0x1b3   : > { %v1586_v63 = vadd.f32 %v1522_v41, %v1341_v17  ;;  %v5995_v44 = vrot.slane %v4928_v55, 2  ;;  %v2934_v4 = vadd.f32 %v2857_v2, %v2690_v3  ;;  %v1867_v24 = vmul.f32 %v3997_v39, %v4858_v21 }
 0x1b4   : > { %v2935_v18 = vadd.f32 %v2859_v50, %v2691_v59  ;;  %v5996_v6 = vrot.slane %v4990_v52, 1  ;;  %v5997_v25 = vrot.slane %v4934_v37, 1  ;;  %v2507_v32 = vmul.f32 %v4002_v43, %v1301_v54 }
 0x1b5   : > { %v1767_v16 = vsel %vm1687_vm3, %v5995_v44, %v5994_v60  ;;  %v5138_v26 = vmul.f32 %v5920_v0, %v1301_v54  ;;  %v1300_v55 = vmul.f32 %v1241_v7, %v976_v53  ;;  %v2873_v27 = vrot.slane %v5003_v31, 2 }
 0x1b6   : > { %v2079_v15 = vsel %vm1442_vm2, %v5997_v25, %v5996_v6  ;;  %v1831_v56 = vadd.f32 %v1767_v16, %v1586_v63  ;;  %v2972_v12 = vadd.f32 %v4627_v57, %v2934_v4  ;;  %v2973_v11 = vadd.f32 %v4627_v57, %v2935_v18 }
 0x1b7   : > { %v5998_v48 = vrot.slane %v4993_v51, 2  ;;  %v5999_v52 = vrot.slane %v4952_v1, 2  ;;  %v2634_v35 = vrot.slane %v2507_v32, 1  ;;  %v2878_v19 = vrot.slane %v5138_v26, 2 }
 0x1b8   : > { %v1899_v13 = vadd.f32 %v1867_v24, %v1831_v56  ;;  %v1316_v22 = vmul.f32 %v3983_v28, %v5949_v62  ;;  %v3520_v17 = vpack.c.bf16 %v2973_v11, %v2972_v12  ;;  %v2423_v49 = vmul.f32 %v4000_v42, %v1300_v55  ;;  %v6001_v24 = vld [vmem:[#allocation23_spill] sm:$0xff]  ;;  %v6003_v56 = vld [vmem:[#allocation24_spill] sm:$0xff] }
 0x1b9   : > { %v2323_v37 = vsel %vm1687_vm3, %v5999_v52, %v5998_v48  ;;  %v2506_v45 = vmul.f32 %v4002_v43, %v1300_v55  ;;  %v5154_v57 = vmul.f32 %v5920_v0, %v1300_v55  ;;  %v1355_v1 = vmul.f32 %v3985_v29, %v5949_v62 }
 0x1ba   : > { %v2143_v51 = vadd.f32 %v2079_v15, %v1899_v13  ;;  %v1356_v41 = vmul.f32 %v3985_v29, %v4156_v58  ;;  %v1600_v8 = vmul.f32 %v3987_v30, %v5949_v62  ;;  %3522 = vmatprep.subr.msk.bf16.mxu1 %vm4646_vm4, %v3520_v17  ;;  %v1317_v59 = vmul.f32 %v3983_v28, %v4156_v58 }
 0x1bb   : > { %v2632_v3 = vrot.slane %v2506_v45, 1  ;;  %v1601_v2 = vmul.f32 %v3987_v30, %v4156_v58  ;;  %v1842_v50 = vmul.f32 %v3997_v39, %v5974_v9  ;;  %v1458_v53 = vrot.slane %v1355_v1, 1 }
 0x1bc   : > { %v2387_v54 = vadd.f32 %v2323_v37, %v2143_v51  ;;  %v1459_v63 = vrot.slane %v1356_v41, 1  ;;  %v1703_v60 = vrot.slane %v1600_v8, 2  ;;  %v6000_v44 = vrot.slane %v4958_v23, 1  ;;  %v6006_v41 = vld [vmem:[#allocation42_spill] sm:$0xff] }
 0x1bd   : > { %v2635_v16 = vsel %vm1442_vm2, %v2632_v3, %v2634_v35  ;;  %v1704_v7 = vrot.slane %v1601_v2, 2  ;;  %v1843_v4 = vmul.f32 %v3997_v39, %v5975_v46  ;;  %v6002_v6 = vrot.slane %v6001_v24, 1 }
 0x1be   : > { %v5173_v62 = vsel %vm1442_vm2, %v6000_v44, %v2632_v3  ;;  %v2455_v18 = vadd.f32 %v2423_v49, %v2387_v54  ;;  %v1460_v58 = vsel %vm1442_vm2, %v1458_v53, %v1459_v63  ;;  %v1913_v15 = vmul.f32 %v3992_v34, %v5974_v9  ;;  %v6005_v49 = vld [vmem:[#allocation30_spill] sm:$0xff]  ;;  %v6007_v44 = vld [vmem:[#allocation35_spill] sm:$0xff] }
 0x1bf   : > { %v1462_v25 = vsel %vm1442_vm2, %v1459_v63, %v6002_v6  ;;  %v1561_v23 = vadd.f32 %v1460_v58, %v1316_v22  ;;  %v1705_v55 = vsel %vm1687_vm3, %v1703_v60, %v1704_v7  ;;  %v6004_v12 = vrot.slane %v6003_v56, 2  ;;  %v5207_v63 = vld [vmem:[%s5713_s6] sm:$0x3] }
 0x1c0   : > { %v1562_v32 = vadd.f32 %v1462_v25, %v1317_v59  ;;  %v5188_v48 = vadd.f32 %v2635_v16, %v2455_v18  ;;  %v1914_v52 = vmul.f32 %v3992_v34, %v5975_v46  ;;  %v2015_v37 = vrot.slane %v1913_v15, 1  ;;  %v6009_v18 = vld [vmem:[#allocation33_spill] sm:$0xff]  ;;  %3417 = vmatprep.mubr.msk.f32.mxu1 %vm422_vm1, %v5207_v63  ;;  %v6010_v25 = vld [vmem:[#allocation36_spill] sm:$0xff] }
 0x1c1   : > { %v1707_v11 = vsel %vm1687_vm3, %v1704_v7, %v6004_v12  ;;  %v2157_v35 = vmul.f32 %v3995_v38, %v5974_v9  ;;  %v1806_v13 = vadd.f32 %v1705_v55, %v1561_v23  ;;  %v2158_v22 = vmul.f32 %v3995_v38, %v5975_v46 }
 0x1c2   : > { %v1807_v17 = vadd.f32 %v1707_v11, %v1562_v32  ;;  %v2398_v45 = vmul.f32 %v4000_v42, %v6005_v49  ;;  %v2016_v51 = vrot.slane %v1914_v52, 1  ;;  %v2399_v8 = vmul.f32 %v4000_v42, %v6006_v41 }
 0x1c3   : > { %v2259_v1 = vrot.slane %v2157_v35, 2  ;;  %v2469_v3 = vmul.f32 %v4002_v43, %v6005_v49  ;;  %v1874_v59 = vadd.f32 %v1842_v50, %v1806_v13  ;;  %v2260_v54 = vrot.slane %v2158_v22, 2 }
 0x1c4   : > { %v1875_v2 = vadd.f32 %v1843_v4, %v1807_v17  ;;  %v2470_v53 = vmul.f32 %v4002_v43, %v6006_v41  ;;  %v2017_v60 = vsel %vm1442_vm2, %v2015_v37, %v2016_v51  ;;  %v6008_v16 = vrot.slane %v6007_v44, 1 }
 0x1c5   : > { %v2471_v58 = vmul.f32 %v4002_v43, %v6009_v18  ;;  %v2571_v50 = vrot.slane %v2469_v3, 1  ;;  %v2118_v4 = vadd.f32 %v2017_v60, %v1874_v59  ;;  %v2261_v6 = vsel %vm1687_vm3, %v2259_v1, %v2260_v54 }
 0x1c6   : > { %v2019_v7 = vsel %vm1442_vm2, %v2016_v51, %v6008_v16  ;;  %v6011_v15 = vrot.slane %v6010_v25, 2  ;;  %v2572_v32 = vrot.slane %v2470_v53, 1  ;;  %v2713_v56 = vmul.f32 %v5920_v0, %v6005_v49 }
 0x1c7   : > { %v2119_v24 = vadd.f32 %v2019_v7, %v1875_v2  ;;  %v2574_v55 = vrot.slane %v2471_v58, 1  ;;  %v2714_v12 = vmul.f32 %v5920_v0, %v6006_v41  ;;  %v2362_v11 = vadd.f32 %v2261_v6, %v2118_v4 }
 0x1c8   : > { %v2263_v23 = vsel %vm1687_vm3, %v2260_v54, %v6011_v15  ;;  %v2715_v37 = vmul.f32 %v5920_v0, %v6009_v18  ;;  %v1334_v35 = vmul.f32 %v3983_v28, %v5959_v40  ;;  %v2573_v13 = vsel %vm1442_vm2, %v2571_v50, %v2572_v32  ;;  %v6013_v15 = vld [vmem:[#allocation72_spill] sm:$0xff] }
 0x1c9   : > { %v2363_v52 = vadd.f32 %v2263_v23, %v2119_v24  ;;  %v2575_v17 = vsel %vm1442_vm2, %v2572_v32, %v2574_v55  ;;  %v2815_v22 = vrot.slane %v2713_v56, 2  ;;  %v2816_v51 = vrot.slane %v2714_v12, 2  ;;  %v6015_v56 = vld [vmem:[#allocation73_spill] sm:$0xff] }
 0x1ca   : > { %v2430_v1 = vadd.f32 %v2398_v45, %v2362_v11  ;;  %v2818_v59 = vrot.slane %v2715_v37, 2  ;;  %v1335_v2 = vmul.f32 %v3983_v28, %v5962_v14  ;;  %v1382_v53 = vmul.f32 %v3985_v29, %v5959_v40  ;;  %v5260_v37 = vld [vmem:[%s5712_s5] ss:$0 sm:$0xff] }
 0x1cb   : > { %v2431_v3 = vadd.f32 %v2399_v8, %v2363_v52  ;;  %v2817_v54 = vsel %vm1687_vm3, %v2815_v22, %v2816_v51  ;;  %v1627_v60 = vmul.f32 %v3987_v30, %v5959_v40  ;;  %v1628_v44 = vmul.f32 %v3987_v30, %v5962_v14  ;;  %v6012_v8 = vld [vmem:[#allocation80_spill] sm:$0xff] }
 0x1cc   : > { %v2674_v16 = vadd.f32 %v2573_v13, %v2430_v1  ;;  %v2819_v45 = vsel %vm1687_vm3, %v2816_v51, %v2818_v59  ;;  %v1580_v18 = vadd.f32 %v6012_v8, %v1335_v2  ;;  %v1503_v58 = vrot.slane %v1382_v53, 1 }
 0x1cd   : > { %v2675_v7 = vadd.f32 %v2575_v17, %v2431_v3  ;;  %v1748_v50 = vrot.slane %v1627_v60, 2  ;;  %v1749_v4 = vrot.slane %v1628_v44, 2  ;;  %v1860_v24 = vmul.f32 %v3997_v39, %v5987_v5 }
 0x1ce   : > { %v2918_v6 = vadd.f32 %v2817_v54, %v2674_v16  ;;  %v1861_v40 = vmul.f32 %v3997_v39, %v5988_v47  ;;  %v1940_v14 = vmul.f32 %v3992_v34, %v5987_v5  ;;  %v6014_v23 = vrot.slane %v6013_v15, 1 }
 0x1cf   : > { %v2919_v25 = vadd.f32 %v2819_v45, %v2675_v7  ;;  %v1750_v55 = vsel %vm1687_vm3, %v1748_v50, %v1749_v4  ;;  %v6016_v12 = vrot.slane %v6015_v56, 2  ;;  %v1941_v52 = vmul.f32 %v3992_v34, %v5988_v47  ;;  %v6017_v7 = vld [vmem:[#allocation78_spill] sm:$0xff] }
 0x1d0   : > { %v1505_v32 = vsel %vm1442_vm2, %v1503_v58, %v6014_v23  ;;  %v2956_v13 = vadd.f32 %v5260_v37, %v2918_v6  ;;  %v2060_v1 = vrot.slane %v1940_v14, 1  ;;  %v2184_v59 = vmul.f32 %v3995_v38, %v5987_v5 }
 0x1d1   : > { %v1752_v11 = vsel %vm1687_vm3, %v1749_v4, %v6016_v12  ;;  %v2957_v17 = vadd.f32 %v5260_v37, %v2919_v25  ;;  %v1579_v22 = vadd.f32 %v1505_v32, %v1334_v35  ;;  %v2061_v3 = vrot.slane %v1941_v52, 1 }
 0x1d2   : > { %v1825_v51 = vadd.f32 %v1752_v11, %v1580_v18  ;;  %v2185_v2 = vmul.f32 %v3995_v38, %v5988_v47  ;;  %v2416_v44 = vmul.f32 %v4000_v42, %v4642_v33  ;;  %v6018_v45 = vrot.slane %v6017_v7, 1 }
 0x1d3   : > { %v3523_v54 = vpack.c.bf16 %v2957_v17, %v2956_v13  ;;  %v1824_v53 = vadd.f32 %v1750_v55, %v1579_v22  ;;  %v2062_v16 = vsel %vm1442_vm2, %v2060_v1, %v2061_v3  ;;  %v2304_v8 = vrot.slane %v2184_v59, 2 }
 0x1d4   : > { %v1893_v60 = vadd.f32 %v1861_v40, %v1825_v51  ;;  %v2064_v35 = vsel %vm1442_vm2, %v2061_v3, %v6018_v45  ;;  %v2305_v18 = vrot.slane %v2185_v2, 2  ;;  %v2417_v4 = vmul.f32 %v4000_v42, %v4579_v61  ;;  %v6019_v40 = vld [vmem:[#allocation79_spill] sm:$0xff] }
 0x1d5   : > { %3525 = vmatpush3.bf16.xpose.msk.msra.mxu1 %vm4646_vm4, %v3523_v54  ;;  %v1892_v58 = vadd.f32 %v1860_v24, %v1824_v53  ;;  %v2496_v6 = vmul.f32 %v4002_v43, %v4642_v33  ;;  %v6020_v14 = vrot.slane %v6019_v40, 2  ;;  %v2497_v23 = vmul.f32 %v4002_v43, %v4579_v61 }
 0x1d6   : > { %v2137_v50 = vadd.f32 %v2064_v35, %v1893_v60  ;;  %v2306_v25 = vsel %vm1687_vm3, %v2304_v8, %v2305_v18  ;;  %v2498_v32 = vmul.f32 %v4002_v43, %v4658_v36  ;;  %v2740_v12 = vmul.f32 %v5920_v0, %v4642_v33 }
 0x1d7   : > { %v2308_v15 = vsel %vm1687_vm3, %v2305_v18, %v6020_v14  ;;  %v2136_v24 = vadd.f32 %v2062_v16, %v1892_v58  ;;  %v2616_v56 = vrot.slane %v2496_v6, 1  ;;  %v2617_v11 = vrot.slane %v2497_v23, 1 }
 0x1d8   : > { %v2381_v55 = vadd.f32 %v2308_v15, %v2137_v50  ;;  %v2619_v52 = vrot.slane %v2498_v32, 1  ;;  %v2741_v13 = vmul.f32 %v5920_v0, %v4579_v61  ;;  %v2742_v17 = vmul.f32 %v5920_v0, %v4658_v36 }
 0x1d9   : > { %v2380_v22 = vadd.f32 %v2306_v25, %v2136_v24  ;;  %v2860_v1 = vrot.slane %v2740_v12, 2  ;;  %v1318_v3 = vmul.f32 %v3983_v28, %v5974_v9  ;;  %v2618_v59 = vsel %vm1442_vm2, %v2616_v56, %v2617_v11 }
 0x1da   : > { %v2449_v51 = vadd.f32 %v2417_v4, %v2381_v55  ;;  %v2620_v2 = vsel %vm1442_vm2, %v2617_v11, %v2619_v52  ;;  %v2861_v54 = vrot.slane %v2741_v13, 2  ;;  %v2863_v53 = vrot.slane %v2742_v17, 2  ;;  %v6021_v4 = vld [vmem:[#allocation41_spill] sm:$0xff]  ;;  %v6024_v11 = vld [vmem:[#allocation34_spill] sm:$0xff] }
 0x1db   : > { %v2448_v60 = vadd.f32 %v2416_v44, %v2380_v22  ;;  %v1319_v7 = vmul.f32 %v3983_v28, %v5975_v46  ;;  %v1358_v36 = vmul.f32 %v3985_v29, %v5974_v9  ;;  %v1603_v8 = vmul.f32 %v3987_v30, %v5974_v9  ;;  %v6022_v9 = vld [vmem:[#allocation32_spill] sm:$0xff] }
 0x1dc   : > { %v2693_v16 = vadd.f32 %v2620_v2, %v2449_v51  ;;  %v2862_v45 = vsel %vm1687_vm3, %v2860_v1, %v2861_v54  ;;  %v2864_v35 = vsel %vm1687_vm3, %v2861_v54, %v2863_v53  ;;  %v1604_v18 = vmul.f32 %v3987_v30, %v5975_v46  ;;  %v6026_v53 = vld [vmem:[#allocation45_spill] sm:$0xff] }
 0x1dd   : > { %v2692_v58 = vadd.f32 %v2618_v59, %v2448_v60  ;;  %v1463_v44 = vrot.slane %v1358_v36, 1  ;;  %v1564_v6 = vadd.f32 %v6021_v4, %v1319_v7  ;;  %v1708_v25 = vrot.slane %v1603_v8, 2 }
 0x1de   : > { %v2937_v50 = vadd.f32 %v2864_v35, %v2693_v16  ;;  %v1709_v40 = vrot.slane %v1604_v18, 2  ;;  %v1844_v14 = vmul.f32 %v3997_v39, %v6005_v49  ;;  %v1845_v15 = vmul.f32 %v3997_v39, %v6006_v41 }
 0x1df   : > { %v2936_v23 = vadd.f32 %v2862_v45, %v2692_v58  ;;  %v6023_v24 = vrot.slane %v6022_v9, 1  ;;  %v1916_v55 = vmul.f32 %v3992_v34, %v6005_v49  ;;  %v6025_v52 = vrot.slane %v6024_v11, 2  ;;  %v6027_v45 = vld [vmem:[#allocation43_spill] sm:$0xff]  ;;  %v6031_v9 = vld [vmem:[#allocation40_spill] sm:$0xff] }
 0x1e0   : > { %v2975_v32 = vadd.f32 %v5260_v37, %v2937_v50  ;;  %v1710_v12 = vsel %vm1687_vm3, %v1708_v25, %v1709_v40  ;;  %v1917_v17 = vmul.f32 %v3992_v34, %v6006_v41  ;;  %v2160_v59 = vmul.f32 %v3995_v38, %v6005_v49  ;;  %v6028_v58 = vld [vmem:[#allocation39_spill] sm:$0xff] }
 0x1e1   : > { %v1465_v46 = vsel %vm1442_vm2, %v1463_v44, %v6023_v24  ;;  %v1712_v13 = vsel %vm1687_vm3, %v1709_v40, %v6025_v52  ;;  %v2974_v22 = vadd.f32 %v5260_v37, %v2936_v23  ;;  %v2020_v1 = vrot.slane %v1916_v55, 1 }
 0x1e2   : > { %v1563_v56 = vadd.f32 %v1465_v46, %v1318_v3  ;;  %v1809_v51 = vadd.f32 %v1712_v13, %v1564_v6  ;;  %v2021_v54 = vrot.slane %v1917_v17, 1  ;;  %v2161_v3 = vmul.f32 %v3995_v38, %v6006_v41 }
 0x1e3   : > { %v2400_v60 = vmul.f32 %v4000_v42, %v6026_v53  ;;  %v3526_v16 = vpack.c.bf16 %v2975_v32, %v2974_v22  ;;  %v2264_v36 = vrot.slane %v2160_v59, 2  ;;  %v2401_v35 = vmul.f32 %v4000_v42, %v6027_v45 }
 0x1e4   : > { %v1808_v2 = vadd.f32 %v1710_v12, %v1563_v56  ;;  %v1877_v7 = vadd.f32 %v1845_v15, %v1809_v51  ;;  %v2022_v18 = vsel %vm1442_vm2, %v2020_v1, %v2021_v54  ;;  %v6029_v50 = vrot.slane %v6028_v58, 1  ;;  %v6030_v15 = vld [vmem:[#allocation46_spill] sm:$0xff] }
 0x1e5   : > { %v2265_v4 = vrot.slane %v2161_v3, 2  ;;  %3528 = vmatprep.subr.msk.bf16.mxu1 %vm4646_vm4, %v3526_v16  ;;  %v2472_v25 = vmul.f32 %v4002_v43, %v6026_v53  ;;  %v2473_v40 = vmul.f32 %v4002_v43, %v6027_v45  ;;  %v6032_v24 = vrot.slane %v6031_v9, 2 }
 0x1e6   : > { %v1876_v8 = vadd.f32 %v1844_v14, %v1808_v2  ;;  %v2024_v44 = vsel %vm1442_vm2, %v2021_v54, %v6029_v50  ;;  %v2474_v14 = vmul.f32 %v4002_v43, %v6030_v15  ;;  %v2716_v55 = vmul.f32 %v5920_v0, %v6026_v53 }
 0x1e7   : > { %v2121_v6 = vadd.f32 %v2024_v44, %v1877_v7  ;;  %v2266_v32 = vsel %vm1687_vm3, %v2264_v36, %v2265_v4  ;;  %v2268_v46 = vsel %vm1687_vm3, %v2265_v4, %v6032_v24  ;;  %v2576_v12 = vrot.slane %v2472_v25, 1 }
 0x1e8   : > { %v2120_v23 = vadd.f32 %v2022_v18, %v1876_v8  ;;  %v2577_v11 = vrot.slane %v2473_v40, 1  ;;  %v2579_v52 = vrot.slane %v2474_v14, 1  ;;  %v2717_v17 = vmul.f32 %v5920_v0, %v6027_v45 }
 0x1e9   : > { %v2365_v56 = vadd.f32 %v2268_v46, %v2121_v6  ;;  %v2718_v22 = vmul.f32 %v5920_v0, %v6030_v15  ;;  %v2820_v51 = vrot.slane %v2716_v55, 2  ;;  %v1336_v54 = vmul.f32 %v3983_v28, %v5987_v5  ;;  %v6033_v46 = vld [vmem:[#allocation76_spill] sm:$0xff] }
 0x1ea   : > { %v2364_v13 = vadd.f32 %v2266_v32, %v2120_v23  ;;  %v2578_v59 = vsel %vm1442_vm2, %v2576_v12, %v2577_v11  ;;  %v2580_v2 = vsel %vm1442_vm2, %v2577_v11, %v2579_v52  ;;  %v2821_v16 = vrot.slane %v2717_v17, 2  ;;  %v6035_v17 = vld [vmem:[#allocation77_spill] sm:$0xff] }
 0x1eb   : > { %v2433_v1 = vadd.f32 %v2401_v35, %v2365_v56  ;;  %v2823_v7 = vrot.slane %v2718_v22, 2  ;;  %v1337_v36 = vmul.f32 %v3983_v28, %v5988_v47  ;;  %v1385_v18 = vmul.f32 %v3985_v29, %v5987_v5 }
 0x1ec   : > { %v2432_v3 = vadd.f32 %v2400_v60, %v2364_v13  ;;  %v1386_v35 = vmul.f32 %v3985_v29, %v5988_v47  ;;  %v1630_v58 = vmul.f32 %v3987_v30, %v5987_v5  ;;  %v2822_v44 = vsel %vm1687_vm3, %v2820_v51, %v2821_v16 }
 0x1ed   : > { %v2677_v8 = vadd.f32 %v2580_v2, %v2433_v1  ;;  %v2824_v60 = vsel %vm1687_vm3, %v2821_v16, %v2823_v7  ;;  %v1631_v4 = vmul.f32 %v3987_v30, %v5988_v47  ;;  %v1508_v25 = vrot.slane %v1385_v18, 1  ;;  %v6037_v18 = vld [vmem:[#allocation81_spill] sm:$0xff] }
 0x1ee   : > { %v2676_v50 = vadd.f32 %v2578_v59, %v2432_v3  ;;  %v1509_v40 = vrot.slane %v1386_v35, 1  ;;  %v1753_v15 = vrot.slane %v1630_v58, 2  ;;  %v1862_v32 = vmul.f32 %v3997_v39, %v4642_v33 }
 0x1ef   : > { %v2921_v6 = vadd.f32 %v2824_v60, %v2677_v8  ;;  %v1754_v23 = vrot.slane %v1631_v4, 2  ;;  %v1863_v5 = vmul.f32 %v3997_v39, %v4579_v61  ;;  %v6034_v55 = vrot.slane %v6033_v46, 1 }
 0x1f0   : > { %v2920_v14 = vadd.f32 %v2822_v44, %v2676_v50  ;;  %v1510_v24 = vsel %vm1442_vm2, %v1508_v25, %v1509_v40  ;;  %v1943_v56 = vmul.f32 %v3992_v34, %v4642_v33  ;;  %v6036_v22 = vrot.slane %v6035_v17, 2  ;;  %v6038_v25 = vld [vmem:[#allocation15_spill] sm:$0xff] }
 0x1f1   : > { %v2959_v9 = vadd.f32 %v5260_v37, %v2921_v6  ;;  %v1512_v47 = vsel %vm1442_vm2, %v1509_v40, %v6034_v55  ;;  %v1581_v11 = vadd.f32 %v1510_v24, %v1336_v54  ;;  %v1755_v13 = vsel %vm1687_vm3, %v1753_v15, %v1754_v23 }
 0x1f2   : > { %v2958_v12 = vadd.f32 %v5260_v37, %v2920_v14  ;;  %v1582_v52 = vadd.f32 %v1512_v47, %v1337_v36  ;;  %v1757_v51 = vsel %vm1687_vm3, %v1754_v23, %v6036_v22  ;;  %v1944_v1 = vmul.f32 %v3992_v34, %v4579_v61  ;;  %v6040_v23 = vld [vmem:[#allocation10_spill] sm:$0xff] }
 0x1f3   : > { %v2065_v59 = vrot.slane %v1943_v56, 1  ;;  %v2187_v2 = vmul.f32 %v3995_v38, %v4642_v33  ;;  %v1826_v16 = vadd.f32 %v1755_v13, %v1581_v11  ;;  %v2188_v54 = vmul.f32 %v3995_v38, %v4579_v61 }
 0x1f4   : > { %v3529_v3 = vpack.c.bf16 %v2959_v9, %v2958_v12  ;;  %v1827_v7 = vadd.f32 %v1757_v51, %v1582_v52  ;;  %v2066_v36 = vrot.slane %v1944_v1, 1  ;;  %v2418_v35 = vmul.f32 %v4000_v42, %v6037_v18 }
 0x1f5   : > { %v2309_v8 = vrot.slane %v2187_v2, 2  ;;  %v2419_v58 = vmul.f32 %v4000_v42, %v4796_v20  ;;  %v1894_v50 = vadd.f32 %v1862_v32, %v1826_v16  ;;  %v2310_v60 = vrot.slane %v2188_v54, 2 }
 0x1f6   : > { %3531 = vmatpush3.bf16.xpose.msk.msra.mxu1 %vm4646_vm4, %v3529_v3  ;;  %v1895_v44 = vadd.f32 %v1863_v5, %v1827_v7  ;;  %v2499_v4 = vmul.f32 %v4002_v43, %v6037_v18  ;;  %v2067_v6 = vsel %vm1442_vm2, %v2065_v59, %v2066_v36  ;;  %v6039_v40 = vrot.slane %v6038_v25, 1  ;;  %v6041_v5 = vld [vmem:[#allocation20_spill] sm:$0xff] }
 0x1f7   : > { %v2500_v14 = vmul.f32 %v4002_v43, %v4796_v20  ;;  %v2501_v9 = vmul.f32 %v4002_v43, %v6040_v23  ;;  %v2138_v24 = vadd.f32 %v2067_v6, %v1894_v50  ;;  %v2311_v32 = vsel %vm1687_vm3, %v2309_v8, %v2310_v60 }
 0x1f8   : > { %v2069_v15 = vsel %vm1442_vm2, %v2066_v36, %v6039_v40  ;;  %v6042_v55 = vrot.slane %v6041_v5, 2  ;;  %v2621_v56 = vrot.slane %v2499_v4, 1  ;;  %v2743_v52 = vmul.f32 %v5920_v0, %v6037_v18 }
 0x1f9   : > { %v2139_v46 = vadd.f32 %v2069_v15, %v1895_v44  ;;  %v2622_v12 = vrot.slane %v2500_v14, 1  ;;  %v2624_v11 = vrot.slane %v2501_v9, 1  ;;  %v2382_v13 = vadd.f32 %v2311_v32, %v2138_v24  ;;  %v6043_v32 = vld [vmem:[#allocation37_spill] sm:$0xff] }
 0x1fa   : > { %v2313_v47 = vsel %vm1687_vm3, %v2310_v60, %v6042_v55  ;;  %v2744_v22 = vmul.f32 %v5920_v0, %v4796_v20  ;;  %v2745_v51 = vmul.f32 %v5920_v0, %v6040_v23  ;;  %v2865_v2 = vrot.slane %v2743_v52, 2 }
 0x1fb   : > { %v2383_v17 = vadd.f32 %v2313_v47, %v2139_v46  ;;  %v2623_v1 = vsel %vm1442_vm2, %v2621_v56, %v2622_v12  ;;  %v2625_v59 = vsel %vm1442_vm2, %v2622_v12, %v2624_v11  ;;  %v1320_v3 = vmul.f32 %v3983_v28, %v6005_v49 }
 0x1fc   : > { %v2450_v16 = vadd.f32 %v2418_v35, %v2382_v13  ;;  %v2866_v54 = vrot.slane %v2744_v22, 2  ;;  %v2868_v36 = vrot.slane %v2745_v51, 2  ;;  %v1321_v8 = vmul.f32 %v3983_v28, %v6006_v41 }
 0x1fd   : > { %v2451_v7 = vadd.f32 %v2419_v58, %v2383_v17  ;;  %v1361_v50 = vmul.f32 %v3985_v29, %v6005_v49  ;;  %v1362_v44 = vmul.f32 %v3985_v29, %v6006_v41  ;;  %v1606_v60 = vmul.f32 %v3987_v30, %v6005_v49  ;;  %v6045_v17 = vld [vmem:[#allocation38_spill] sm:$0xff] }
 0x1fe   : > { %v2694_v4 = vadd.f32 %v2623_v1, %v2450_v16  ;;  %v2867_v25 = vsel %vm1687_vm3, %v2865_v2, %v2866_v54  ;;  %v2869_v35 = vsel %vm1687_vm3, %v2866_v54, %v2868_v36  ;;  %v1607_v15 = vmul.f32 %v3987_v30, %v6006_v41 }
 0x1ff   : > { %v2695_v6 = vadd.f32 %v2625_v59, %v2451_v7  ;;  %v1468_v58 = vrot.slane %v1361_v50, 1  ;;  %v1469_v40 = vrot.slane %v1362_v44, 1  ;;  %v1713_v14 = vrot.slane %v1606_v60, 2  ;;  %v6048_v44 = vld [vmem:[#allocation52_spill] sm:$0xff] }
 0x200   : > { %v2938_v23 = vadd.f32 %v2867_v25, %v2694_v4  ;;  %v1846_v24 = vmul.f32 %v3997_v39, %v6026_v53  ;;  %v1847_v49 = vmul.f32 %v3997_v39, %v6027_v45  ;;  %v6044_v5 = vrot.slane %v6043_v32, 1 }
 0x201   : > { %v2939_v9 = vadd.f32 %v2869_v35, %v2695_v6  ;;  %v1470_v46 = vsel %vm1442_vm2, %v1468_v58, %v1469_v40  ;;  %v1714_v47 = vrot.slane %v1607_v15, 2  ;;  %v1919_v56 = vmul.f32 %v3992_v34, %v6026_v53 }
 0x202   : > { %v1472_v55 = vsel %vm1442_vm2, %v1469_v40, %v6044_v5  ;;  %v2976_v41 = vadd.f32 %v5260_v37, %v2938_v23  ;;  %v1565_v11 = vadd.f32 %v1470_v46, %v1320_v3  ;;  %v6046_v22 = vrot.slane %v6045_v17, 2  ;;  %v6049_v40 = vld [vmem:[#allocation49_spill] sm:$0xff]  ;;  %v6051_v5 = vld [vmem:[#allocation51_spill] sm:$0xff] }
 0x203   : > { %v2977_v12 = vadd.f32 %v5260_v37, %v2939_v9  ;;  %v1566_v52 = vadd.f32 %v1472_v55, %v1321_v8  ;;  %v1715_v13 = vsel %vm1687_vm3, %v1713_v14, %v1714_v47  ;;  %v1920_v1 = vmul.f32 %v3992_v34, %v6027_v45  ;;  %v6047_v8 = vld [vmem:[#allocation47_spill] sm:$0xff] }
 0x204   : > { %v1717_v51 = vsel %vm1687_vm3, %v1714_v47, %v6046_v22  ;;  %v2025_v59 = vrot.slane %v1919_v56, 1  ;;  %v1810_v16 = vadd.f32 %v1715_v13, %v1565_v11  ;;  %v2163_v54 = vmul.f32 %v3995_v38, %v6026_v53  ;;  %v6052_v47 = vld [vmem:[#allocation50_spill] sm:$0xff] }
 0x205   : > { %v3532_v2 = vpack.c.bf16 %v2977_v12, %v2976_v41  ;;  %v1811_v7 = vadd.f32 %v1717_v51, %v1566_v52  ;;  %v2026_v36 = vrot.slane %v1920_v1, 1  ;;  %v2164_v3 = vmul.f32 %v3995_v38, %v6027_v45 }
 0x206   : > { %v2402_v50 = vmul.f32 %v4000_v42, %v6047_v8  ;;  %v2403_v60 = vmul.f32 %v4000_v42, %v6048_v44  ;;  %v1878_v4 = vadd.f32 %v1846_v24, %v1810_v16  ;;  %v2269_v25 = vrot.slane %v2163_v54, 2 }
 0x207   : > { %3534 = vmatprep.subr.msk.bf16.mxu1 %vm4646_vm4, %v3532_v2  ;;  %v1879_v6 = vadd.f32 %v1847_v49, %v1811_v7  ;;  %v2475_v35 = vmul.f32 %v4002_v43, %v6047_v8  ;;  %v2027_v58 = vsel %vm1442_vm2, %v2025_v59, %v2026_v36  ;;  %v6050_v15 = vrot.slane %v6049_v40, 1 }
 0x208   : > { %v2270_v23 = vrot.slane %v2164_v3, 2  ;;  %v2476_v9 = vmul.f32 %v4002_v43, %v6048_v44  ;;  %v2122_v46 = vadd.f32 %v2027_v58, %v1878_v4  ;;  %v2477_v24 = vmul.f32 %v4002_v43, %v6051_v5 }
 0x209   : > { %v2029_v14 = vsel %vm1442_vm2, %v2026_v36, %v6050_v15  ;;  %v2581_v49 = vrot.slane %v2475_v35, 1  ;;  %v6053_v56 = vrot.slane %v6052_v47, 2  ;;  %v2719_v11 = vmul.f32 %v5920_v0, %v6047_v8 }
 0x20a   : > { %v2123_v32 = vadd.f32 %v2029_v14, %v1879_v6  ;;  %v2271_v55 = vsel %vm1687_vm3, %v2269_v25, %v2270_v23  ;;  %v2582_v12 = vrot.slane %v2476_v9, 1  ;;  %v2584_v17 = vrot.slane %v2477_v24, 1  ;;  %v6054_v14 = vld [vmem:[#allocation82_spill] sm:$0xff] }
 0x20b   : > { %v2273_v41 = vsel %vm1687_vm3, %v2270_v23, %v6053_v56  ;;  %v2366_v52 = vadd.f32 %v2271_v55, %v2122_v46  ;;  %v2720_v22 = vmul.f32 %v5920_v0, %v6048_v44  ;;  %v2721_v1 = vmul.f32 %v5920_v0, %v6051_v5 }
 0x20c   : > { %v2367_v13 = vadd.f32 %v2273_v41, %v2123_v32  ;;  %v2583_v51 = vsel %vm1442_vm2, %v2581_v49, %v2582_v12  ;;  %v2825_v59 = vrot.slane %v2719_v11, 2  ;;  %v1338_v2 = vmul.f32 %v3983_v28, %v4642_v33 }
 0x20d   : > { %v2434_v16 = vadd.f32 %v2402_v50, %v2366_v52  ;;  %v2585_v54 = vsel %vm1442_vm2, %v2582_v12, %v2584_v17  ;;  %v2826_v36 = vrot.slane %v2720_v22, 2  ;;  %v2828_v3 = vrot.slane %v2721_v1, 2 }
 0x20e   : > { %v2435_v7 = vadd.f32 %v2403_v60, %v2367_v13  ;;  %v1339_v4 = vmul.f32 %v3983_v28, %v4579_v61  ;;  %v1388_v6 = vmul.f32 %v3985_v29, %v4642_v33  ;;  %v1633_v25 = vmul.f32 %v3987_v30, %v4642_v33  ;;  %v6055_v33 = vld [vmem:[#allocation14_spill] sm:$0xff]  ;;  %v6057_v13 = vld [vmem:[#allocation8_spill] sm:$0xff] }
 0x20f   : > { %v2678_v35 = vadd.f32 %v2583_v51, %v2434_v16  ;;  %v2827_v40 = vsel %vm1687_vm3, %v2825_v59, %v2826_v36  ;;  %v1634_v50 = vmul.f32 %v3987_v30, %v4579_v61  ;;  %v2829_v60 = vsel %vm1687_vm3, %v2826_v36, %v2828_v3 }
 0x210   : > { %v2679_v58 = vadd.f32 %v2585_v54, %v2435_v7  ;;  %v1513_v15 = vrot.slane %v1388_v6, 1  ;;  %v1584_v23 = vadd.f32 %v6054_v14, %v1339_v4  ;;  %v1758_v9 = vrot.slane %v1633_v25, 2  ;;  %v6059_v4 = vld [vmem:[#allocation16_spill] sm:$0xff] }
 0x211   : > { %v2922_v46 = vadd.f32 %v2827_v40, %v2678_v35  ;;  %v1759_v5 = vrot.slane %v1634_v50, 2  ;;  %v1864_v24 = vmul.f32 %v3997_v39, %v6037_v18  ;;  %v6056_v49 = vrot.slane %v6055_v33, 1  ;;  %v6061_v50 = vld [vmem:[#allocation11_spill] sm:$0xff] }
 0x212   : > { %v2923_v32 = vadd.f32 %v2829_v60, %v2679_v58  ;;  %v1865_v47 = vmul.f32 %v3997_v39, %v4796_v20  ;;  %v1946_v61 = vmul.f32 %v3992_v34, %v6037_v18  ;;  %v1947_v56 = vmul.f32 %v3992_v34, %v4796_v20 }
 0x213   : > { %v1515_v55 = vsel %vm1442_vm2, %v1513_v15, %v6056_v49  ;;  %v2960_v41 = vadd.f32 %v5260_v37, %v2922_v46  ;;  %v1760_v52 = vsel %vm1687_vm3, %v1758_v9, %v1759_v5  ;;  %v6058_v17 = vrot.slane %v6057_v13, 2  ;;  %v6064_v13 = vld [vmem:[#allocation17_spill] sm:$0xff] }
 0x214   : > { %v2961_v12 = vadd.f32 %v5260_v37, %v2923_v32  ;;  %v1583_v11 = vadd.f32 %v1515_v55, %v1338_v2  ;;  %v2070_v51 = vrot.slane %v1946_v61, 1  ;;  %v2071_v1 = vrot.slane %v1947_v56, 1 }
 0x215   : > { %v1762_v22 = vsel %vm1687_vm3, %v1759_v5, %v6058_v17  ;;  %v2190_v59 = vmul.f32 %v3995_v38, %v6037_v18  ;;  %v2191_v36 = vmul.f32 %v3995_v38, %v4796_v20  ;;  %v2876_v3 = vrot.slane %v5154_v57, 2  ;;  %v6062_v5 = vld [vmem:[#allocation13_spill] sm:$0xff] }
 0x216   : > { %v3535_v16 = vpack.c.bf16 %v2961_v12, %v2960_v41  ;;  %v1828_v7 = vadd.f32 %v1760_v52, %v1583_v11  ;;  %v1829_v54 = vadd.f32 %v1762_v22, %v1584_v23  ;;  %v2072_v2 = vsel %vm1442_vm2, %v2070_v51, %v2071_v1 }
 0x217   : > { %v6060_v6 = vrot.slane %v6059_v4, 1  ;;  %v2314_v35 = vrot.slane %v2190_v59, 2  ;;  %v2315_v40 = vrot.slane %v2191_v36, 2  ;;  %v2420_v60 = vmul.f32 %v4000_v42, %v6061_v50 }
 0x218   : > { %3537 = vmatpush3.bf16.xpose.msk.msra.mxu1 %vm4646_vm4, %v3535_v16  ;;  %v1896_v58 = vadd.f32 %v1864_v24, %v1828_v7  ;;  %v1897_v18 = vadd.f32 %v1865_v47, %v1829_v54  ;;  %v2502_v20 = vmul.f32 %v4002_v43, %v6061_v50  ;;  %v2503_v15 = vmul.f32 %v4002_v43, %v4858_v21  ;;  %v6066_v7 = vld [vmem:[#allocation57_spill] sm:$0xff] }
 0x219   : > { %v2074_v25 = vsel %vm1442_vm2, %v2071_v1, %v6060_v6  ;;  %v2746_v14 = vmul.f32 %v5920_v0, %v6061_v50  ;;  %v2747_v23 = vmul.f32 %v5920_v0, %v4858_v21  ;;  %v2316_v32 = vsel %vm1687_vm3, %v2314_v35, %v2315_v40 }
 0x21a   : > { %v2140_v9 = vadd.f32 %v2072_v2, %v1896_v58  ;;  %v2141_v46 = vadd.f32 %v2074_v25, %v1897_v18  ;;  %v6063_v24 = vrot.slane %v6062_v5, 2  ;;  %v2626_v49 = vrot.slane %v2502_v20, 1 }
 0x21b   : > { %v2627_v55 = vrot.slane %v2503_v15, 1  ;;  %v2870_v47 = vrot.slane %v2746_v14, 2  ;;  %v2871_v61 = vrot.slane %v2747_v23, 2  ;;  %v2421_v12 = vmul.f32 %v4000_v42, %v4858_v21 }
 0x21c   : > { %v2318_v33 = vsel %vm1687_vm3, %v2315_v40, %v6063_v24  ;;  %v2384_v56 = vadd.f32 %v2316_v32, %v2140_v9  ;;  %v1323_v11 = vmul.f32 %v3983_v28, %v6027_v45  ;;  %v6065_v17 = vrot.slane %v6064_v13, 1 }
 0x21d   : > { %v2385_v41 = vadd.f32 %v2318_v33, %v2141_v46  ;;  %v2628_v52 = vsel %vm1442_vm2, %v2626_v49, %v2627_v55  ;;  %v2872_v51 = vsel %vm1687_vm3, %v2870_v47, %v2871_v61  ;;  %v2874_v1 = vsel %vm1687_vm3, %v2871_v61, %v2873_v27  ;;  %v6069_v46 = vld [vmem:[#allocation48_spill] sm:$0xff] }
 0x21e   : > { %v2630_v22 = vsel %vm1442_vm2, %v2627_v55, %v6065_v17  ;;  %v2452_v59 = vadd.f32 %v2420_v60, %v2384_v56  ;;  %v1364_v21 = vmul.f32 %v3985_v29, %v6026_v53  ;;  %v1568_v54 = vadd.f32 %v6066_v7, %v1323_v11 }
 0x21f   : > { %v2453_v16 = vadd.f32 %v2421_v12, %v2385_v41  ;;  %v1322_v36 = vmul.f32 %v3983_v28, %v6026_v53  ;;  %v1609_v2 = vmul.f32 %v3987_v30, %v6026_v53  ;;  %v1610_v4 = vmul.f32 %v3987_v30, %v6027_v45  ;;  %v6067_v45 = vld [vmem:[#allocation44_spill] sm:$0xff]  ;;  %v6071_v12 = vld [vmem:[#allocation55_spill] sm:$0xff] }
 0x220   : > { %v1849_v31 = vmul.f32 %v3997_v39, %v6048_v44  ;;  %v2696_v27 = vadd.f32 %v2628_v52, %v2452_v59  ;;  %v1473_v25 = vrot.slane %v1364_v21, 1  ;;  %v1922_v35 = vmul.f32 %v3992_v34, %v6047_v8  ;;  %v6073_v59 = vld [vmem:[#allocation58_spill] sm:$0xff]  ;;  %v6074_v21 = vld [vmem:[#allocation59_spill] sm:$0xff] }
 0x221   : > { %v2697_v6 = vadd.f32 %v2630_v22, %v2453_v16  ;;  %v1718_v58 = vrot.slane %v1609_v2, 2  ;;  %v1719_v18 = vrot.slane %v1610_v4, 2  ;;  %v1923_v40 = vmul.f32 %v3992_v34, %v6048_v44  ;;  %v6075_v4 = vld [vmem:[#allocation56_spill] sm:$0xff] }
 0x222   : > { %v2166_v53 = vmul.f32 %v3995_v38, %v6047_v8  ;;  %v2940_v50 = vadd.f32 %v2872_v51, %v2696_v27  ;;  %v6068_v20 = vrot.slane %v6067_v45, 1  ;;  %v2030_v14 = vrot.slane %v1922_v35, 1 }
 0x223   : > { %v2941_v60 = vadd.f32 %v2874_v1, %v2697_v6  ;;  %v1720_v9 = vsel %vm1687_vm3, %v1718_v58, %v1719_v18  ;;  %v6070_v32 = vrot.slane %v6069_v46, 2  ;;  %v2031_v24 = vrot.slane %v1923_v40, 1  ;;  %v6077_v6 = vld [vmem:[#allocation61_spill] sm:$0xff] }
 0x224   : > { %v1475_v15 = vsel %vm1442_vm2, %v1473_v25, %v6068_v20  ;;  %v2978_v33 = vadd.f32 %v5260_v37, %v2940_v50  ;;  %v2167_v47 = vmul.f32 %v3995_v38, %v6048_v44  ;;  %v1848_v56 = vmul.f32 %v3997_v39, %v6047_v8 }
 0x225   : > { %v1567_v23 = vadd.f32 %v1475_v15, %v1322_v36  ;;  %v1722_v5 = vsel %vm1687_vm3, %v1719_v18, %v6070_v32  ;;  %v2979_v49 = vadd.f32 %v5260_v37, %v2941_v60  ;;  %v2032_v41 = vsel %vm1442_vm2, %v2030_v14, %v2031_v24 }
 0x226   : > { %v1813_v55 = vadd.f32 %v1722_v5, %v1568_v54  ;;  %v6072_v11 = vrot.slane %v6071_v12, 1  ;;  %v2274_v22 = vrot.slane %v2166_v53, 2  ;;  %v2275_v51 = vrot.slane %v2167_v47, 2 }
 0x227   : > { %v1812_v61 = vadd.f32 %v1720_v9, %v1567_v23  ;;  %v3538_v13 = vpack.c.bf16 %v2979_v49, %v2978_v33  ;;  %v2405_v16 = vmul.f32 %v4000_v42, %v6073_v59  ;;  %v2478_v7 = vmul.f32 %v4002_v43, %v6074_v21  ;;  %v6078_v23 = vld [vmem:[#allocation19_spill] sm:$0xff] }
 0x228   : > { %v2034_v52 = vsel %vm1442_vm2, %v2031_v24, %v6072_v11  ;;  %v1881_v17 = vadd.f32 %v1849_v31, %v1813_v55  ;;  %v2479_v54 = vmul.f32 %v4002_v43, %v6073_v59  ;;  %v2276_v2 = vsel %vm1687_vm3, %v2274_v22, %v2275_v51  ;;  %v6079_v55 = vld [vmem:[#allocation12_spill] sm:$0xff] }
 0x229   : > { %v1880_v1 = vadd.f32 %v1848_v56, %v1812_v61  ;;  %3540 = vmatprep.subr.msk.bf16.mxu1 %vm4646_vm4, %v3538_v13  ;;  %v6076_v31 = vrot.slane %v6075_v4, 2  ;;  %v2480_v25 = vmul.f32 %v4002_v43, %v6077_v6  ;;  %v2586_v58 = vrot.slane %v2478_v7, 1 }
 0x22a   : > { %v2125_v36 = vadd.f32 %v2034_v52, %v1881_v17  ;;  %v2587_v18 = vrot.slane %v2479_v54, 1  ;;  %v2722_v40 = vmul.f32 %v5920_v0, %v6074_v21  ;;  %v2723_v60 = vmul.f32 %v5920_v0, %v6073_v59 }
 0x22b   : > { %v2278_v27 = vsel %vm1687_vm3, %v2275_v51, %v6076_v31  ;;  %v2124_v35 = vadd.f32 %v2032_v41, %v1880_v1  ;;  %v2589_v50 = vrot.slane %v2480_v25, 1  ;;  %v2724_v45 = vmul.f32 %v5920_v0, %v6077_v6 }
 0x22c   : > { %v2369_v53 = vadd.f32 %v2278_v27, %v2125_v36  ;;  %v2404_v15 = vmul.f32 %v4000_v42, %v6074_v21  ;;  %v2830_v14 = vrot.slane %v2722_v40, 2  ;;  %v2698_v9 = vadd.f32 %v5173_v62, %v6078_v23  ;;  %v6081_v27 = vld [vmem:[#allocation53_spill] sm:$0xff] }
 0x22d   : > { %v2368_v20 = vadd.f32 %v2276_v2, %v2124_v35  ;;  %v2590_v32 = vsel %vm1442_vm2, %v2587_v18, %v2589_v50  ;;  %v2831_v5 = vrot.slane %v2723_v60, 2  ;;  %v2833_v24 = vrot.slane %v2724_v45, 2 }
 0x22e   : > { %v2437_v46 = vadd.f32 %v2405_v16, %v2369_v53  ;;  %v2588_v49 = vsel %vm1442_vm2, %v2586_v58, %v2587_v18  ;;  %v6080_v47 = vrot.slane %v6079_v55, 2  ;;  %v2879_v62 = vsel %vm1687_vm3, %v2876_v3, %v2878_v19  ;;  %v6083_v53 = vld [vmem:[#allocation54_spill] sm:$0xff] }
 0x22f   : > { %v2436_v33 = vadd.f32 %v2404_v15, %v2368_v20  ;;  %v2832_v41 = vsel %vm1687_vm3, %v2830_v14, %v2831_v5  ;;  %v1324_v11 = vmul.f32 %v3983_v28, %v6047_v8  ;;  %v2834_v13 = vsel %vm1687_vm3, %v2831_v5, %v2833_v24 }
 0x230   : > { %v2877_v61 = vsel %vm1687_vm3, %v6080_v47, %v2876_v3  ;;  %v2681_v56 = vadd.f32 %v2590_v32, %v2437_v46  ;;  %v2943_v17 = vadd.f32 %v2879_v62, %v5188_v48  ;;  %v1367_v22 = vmul.f32 %v3985_v29, %v6047_v8  ;;  %v6085_v32 = vld [vmem:[#allocation62_spill] sm:$0xff]  ;;  %v6087_v47 = vld [vmem:[#allocation60_spill] sm:$0xff] }
 0x231   : > { %v2942_v12 = vadd.f32 %v2877_v61, %v2698_v9  ;;  %v2680_v52 = vadd.f32 %v2588_v49, %v2436_v33  ;;  %v1325_v57 = vmul.f32 %v3983_v28, %v6048_v44  ;;  %v1368_v19 = vmul.f32 %v3985_v29, %v6048_v44 }
 0x232   : > { %v2925_v26 = vadd.f32 %v2834_v13, %v2681_v56  ;;  %v1612_v3 = vmul.f32 %v3987_v30, %v6047_v8  ;;  %v2981_v16 = vadd.f32 %v5260_v37, %v2943_v17  ;;  %v1613_v48 = vmul.f32 %v3987_v30, %v6048_v44  ;;  %v6090_v13 = vld [vmem:[#allocation63_spill] sm:$0xff] }
 0x233   : > { %v2924_v51 = vadd.f32 %v2832_v41, %v2680_v52  ;;  %v2980_v1 = vadd.f32 %v5260_v37, %v2942_v12  ;;  %v1478_v54 = vrot.slane %v1367_v22, 1  ;;  %v1479_v36 = vrot.slane %v1368_v19, 1 }
 0x234   : > { %v2963_v7 = vadd.f32 %v5260_v37, %v2925_v26  ;;  %v1723_v2 = vrot.slane %v1612_v3, 2  ;;  %v1724_v29 = vrot.slane %v1613_v48, 2  ;;  %v1850_v8 = vmul.f32 %v3997_v39, %v6074_v21 }
 0x235   : > { %v2962_v28 = vadd.f32 %v5260_v37, %v2924_v51  ;;  %v3544_v4 = vpack.c.bf16 %v2981_v16, %v2980_v1  ;;  %v1480_v31 = vsel %vm1442_vm2, %v1478_v54, %v1479_v36  ;;  %v6082_v6 = vrot.slane %v6081_v27, 1 }
 0x236   : > { %v1925_v30 = vmul.f32 %v3992_v34, %v6074_v21  ;;  %v1926_v44 = vmul.f32 %v3992_v34, %v6073_v59  ;;  %v1569_v58 = vadd.f32 %v1480_v31, %v1324_v11  ;;  %v1725_v40 = vsel %vm1687_vm3, %v1723_v2, %v1724_v29 }
 0x237   : > { %v1482_v25 = vsel %vm1442_vm2, %v1479_v36, %v6082_v6  ;;  %v3541_v35 = vpack.c.bf16 %v2963_v7, %v2962_v28  ;;  %v6084_v50 = vrot.slane %v6083_v53, 2  ;;  %v2169_v15 = vmul.f32 %v3995_v38, %v6074_v21 }
 0x238   : > { %v1570_v18 = vadd.f32 %v1482_v25, %v1325_v57  ;;  %v2035_v45 = vrot.slane %v1925_v30, 1  ;;  %v2036_v20 = vrot.slane %v1926_v44, 1  ;;  %v1814_v14 = vadd.f32 %v1725_v40, %v1569_v58  ;;  %v2987_v44 = vpop.permute.xlu0 %2986 }
 0x239   : > { %v1727_v60 = vsel %vm1687_vm3, %v1724_v29, %v6084_v50  ;;  %3543 = vmatpush3.bf16.xpose.msk.msra.mxu1 %vm4646_vm4, %v3541_v35  ;;  %v1851_v34 = vmul.f32 %v3997_v39, %v6073_v59  ;;  %v2170_v9 = vmul.f32 %v3995_v38, %v6073_v59  ;;  %v6086_v5 = vrot.slane %v6085_v32, 1  ;;  %v6088_v39 = vld [vmem:[#allocation65_spill] sm:$0xff]  ;;  %v6089_v38 = vld [vmem:[#allocation64_spill] sm:$0xff] }
 0x23a   : > { %v1815_v23 = vadd.f32 %v1727_v60, %v1570_v18  ;;  %3546 = vmatprep.subr.msk.bf16.mxu1 %vm4646_vm4, %v3544_v4  ;;  %v2037_v46 = vsel %vm1442_vm2, %v2035_v45, %v2036_v20  ;;  %v2279_v24 = vrot.slane %v2169_v15, 2  ;;  %v1882_v33 = vadd.f32 %v1850_v8, %v1814_v14 }
 0x23b   : > { %v2039_v21 = vsel %vm1442_vm2, %v2036_v20, %v6086_v5  ;;  %v2280_v55 = vrot.slane %v2170_v9, 2  ;;  %v2481_v61 = vmul.f32 %v4002_v43, %v6087_v47  ;;  %v2482_v62 = vmul.f32 %v4002_v43, %v6088_v39 }
 0x23c   : > { %v1883_v49 = vadd.f32 %v1851_v34, %v1815_v23  ;;  %v2483_v59 = vmul.f32 %v4002_v43, %v6089_v38  ;;  %v2725_v56 = vmul.f32 %v5920_v0, %v6087_v47  ;;  %v2726_v41 = vmul.f32 %v5920_v0, %v6088_v39 }
 0x23d   : > { %v2126_v12 = vadd.f32 %v2037_v46, %v1882_v33  ;;  %v2281_v52 = vsel %vm1687_vm3, %v2279_v24, %v2280_v55  ;;  %v6091_v17 = vrot.slane %v6090_v13, 2  ;;  %v2591_v26 = vrot.slane %v2481_v61, 1 }
 0x23e   : > { %v2127_v11 = vadd.f32 %v2039_v21, %v1883_v49  ;;  %v2592_v57 = vrot.slane %v2482_v62, 1  ;;  %v2594_v19 = vrot.slane %v2483_v59, 1  ;;  %v2727_v43 = vmul.f32 %v5920_v0, %v6089_v38 }
 0x23f   : > { %v2283_v22 = vsel %vm1687_vm3, %v2280_v55, %v6091_v17  ;;  %v2370_v3 = vadd.f32 %v2281_v52, %v2126_v12  ;;  %v2406_v1 = vmul.f32 %v4000_v42, %v6087_v47  ;;  %v2407_v16 = vmul.f32 %v4000_v42, %v6088_v39 }
 0x240   : > { %v2371_v51 = vadd.f32 %v2283_v22, %v2127_v11  ;;  %v2593_v48 = vsel %vm1442_vm2, %v2591_v26, %v2592_v57  ;;  %v2836_v7 = vrot.slane %v2726_v41, 2  ;;  %v2838_v54 = vrot.slane %v2727_v43, 2 }
 0x241   : > { %v2438_v36 = vadd.f32 %v2406_v1, %v2370_v3  ;;  %v2595_v28 = vsel %vm1442_vm2, %v2592_v57, %v2594_v19  ;;  %v2835_v4 = vrot.slane %v2725_v56, 2 }
 0x242   : > { %v2439_v2 = vadd.f32 %v2407_v16, %v2371_v51  ;;  %v2839_v31 = vsel %vm1687_vm3, %v2836_v7, %v2838_v54 }
 0x243   : > { %v2682_v29 = vadd.f32 %v2593_v48, %v2438_v36  ;;  %v2837_v8 = vsel %vm1687_vm3, %v2835_v4, %v2836_v7 }
 0x244   : > { %v2683_v0 = vadd.f32 %v2595_v28, %v2439_v2 }
 0x245   : > { %v2926_v27 = vadd.f32 %v2837_v8, %v2682_v29 }
 0x246   : > { %v2927_v6 = vadd.f32 %v2839_v31, %v2683_v0 }
 0x247   : > { %v2964_v42 = vadd.f32 %v5260_v37, %v2926_v27 }
 0x248   : > { %v2965_v25 = vadd.f32 %v5260_v37, %v2927_v6 }
 0x24a   : > { %v3547_v30 = vpack.c.bf16 %v2965_v25, %v2964_v42 }
 0x24c   : > { %3549 = vmatpush3.bf16.xpose.msk.msra.mxu1 %vm4646_vm4, %v3547_v30 }
 0x253   : > { %3418 = vmatmul.mubr.msk.f32.vlgmr.msra.gmra.mrb[0].mxu1 %vm422_vm1, %v5207_v63 }
 0x326   : > { %v3154_v35 = vpop.f32.mrb[0].mxu1 }
 0x327   : > { %v3155_v58 = vadd.f32 %v3154_v35, %v2987_v44  ;;  %v3156_v18 = vpop.f32.mrb[1].mxu1 }
 0x328   : > { %v3157_v40 = vadd.f32 %v3156_v18, %v2987_v44 }
 0x329   : > { %v3159_v53 = vmax.f32 %v3155_v58, 0.0 }
 0x32a   : > { %v3160_v50 = vmax.f32 %v3157_v40, 0.0 }
 0x32c   : > { %v3163_v37 = vcombine.low %v3159_v53, %v3160_v50 }
 0x32e   : > { %3326 = vst.sshfl [vmem:[%s305_s29] sm:$0x33 pattern:$0x76325410] %v3163_v37 }
 0x32f PF: > { %s18_s27 = sadd.s32 1, %s3570_s27  }
 0x330   : > { %p15_p4 = scmp.ge.s32.totalorder %s18_s27, 4  }
 0x332   :  { %17 = sbr.rel (!%p15_p4) target bundleno = 1 (0x1), region = 82 }

</bundles_post_ra>
